<compile_context>
chip_gen: v6e
topology: v6e:2x2x1
jax: 0.10.0
libtpu: 0.0.40
codegen_flags: <defaults>
</compile_context>

<pallas_src>
import math
import functools

import jax
import jax.numpy as jnp
from jax.experimental import pallas as pl
from jax.experimental.pallas import tpu as pltpu

CLS1, CLS2, NUM_CLASSES = 128, 64, 6   # classifier widths from the module


# ----------------------------------------------------------------------------
# Weight-slab layout (all row offsets multiples of 8, all widths <= 128 lanes)
# ----------------------------------------------------------------------------
def _slab_layout(input_dim, nhidden, embed_time, num_heads):
    H, ET = nhidden, embed_time
    shapes = [
        ("wqk", (ET, 2 * ET)),                  # fused Q|K projection (scale folded)
        ("wo",  (num_heads * input_dim, H)),    # attention output projection
        ("wih", (H, 6 * H)),                    # GRU input proj  [rf|rb|zf|zb|nf|nb]
        ("whh", (2 * H, 6 * H)),                # GRU hidden proj, block-diag, same order
        ("w1",  (2 * H, CLS1)),                 # classifier
        ("w2",  (CLS1, CLS2)),
        ("w3",  (CLS2, NUM_CLASSES)),
    ]
    layout, off = {}, 0
    for name, (r, c) in shapes:
        assert c <= 128
        layout[name] = (off, r, c)
        off += -(-r // 8) * 8
    return layout, off


# ----------------------------------------------------------------------------
# Fused kernel: attention + bidirectional GRU + classifier (empty grid)
# ----------------------------------------------------------------------------
def make_fused_kernel(input_dim, nhidden, embed_time, num_heads, seq_len, b_pad):
    H, ET, D, S, B = nhidden, embed_time, input_dim, seq_len, b_pad
    etk = ET // num_heads
    layout, _ = _slab_layout(input_dim, nhidden, embed_time, num_heads)

    def kernel(data_ref, w_ref, b_ref, out_ref, xg_ref):
        def wslice(name):
            off, r, c = layout[name]
            return w_ref[off:off + r, 0:c]

        # ------------------- attention (all batch rows at once) -------------
        data = data_ref[...]                                  # (B, S, ET + D)
        emb_flat = data[:, :, 0:ET].reshape(B * S, ET)
        v = data[:, :, ET:ET + D]                             # (B, S, D)

        qk = jnp.dot(emb_flat, wslice("wqk"),
                     preferred_element_type=jnp.float32) + b_ref[0:1, 0:2 * ET]
        q = qk[:, 0:ET].reshape(B, S, ET)                     # scale pre-folded
        k = qk[:, ET:2 * ET].reshape(B, S, ET)

        heads = []
        for hh in range(num_heads):
            qh = q[:, :, hh * etk:(hh + 1) * etk]
            kh = k[:, :, hh * etk:(hh + 1) * etk]
            s = jnp.einsum('bqe,bke->bqk', qh, kh,
                           preferred_element_type=jnp.float32)
            s = s - jnp.max(s, axis=-1, keepdims=True)
            e = jnp.exp(s)
            p_attn = e / jnp.sum(e, axis=-1, keepdims=True)   # softmax over keys
            heads.append(jnp.einsum('bqk,bkd->bqd', p_attn, v,
                                    preferred_element_type=jnp.float32))
        att = heads[0] if num_heads == 1 else jnp.concatenate(heads, axis=-1)
        att_h = jnp.dot(att.reshape(B * S, num_heads * D), wslice("wo"),
                        preferred_element_type=jnp.float32) + b_ref[1:2, 0:H]

        # --------- GRU input projections (both dirs, all gates), hoisted -----
        # Column order [rf | rb | zf | zb | nf | nb]; r/z recurrent biases are
        # already folded into this bias host-side.
        xg = jnp.dot(att_h, wslice("wih"),
                     preferred_element_type=jnp.float32) + b_ref[2:3, 0:6 * H]
        xg_ref[...] = xg.reshape(B, S, 6 * H)                 # S == 8 -> free reshape

        # ------------------- recurrence (fully unrolled, fused dirs) ---------
        whh = wslice("whh")                                   # (2H, 6H) block-diag
        bhn = jnp.broadcast_to(b_ref[3:4, 0:2 * H], (B, 2 * H))   # hoisted broadcast
        h = jnp.zeros((B, 2 * H), jnp.float32)                # [h_fwd | h_bwd]
        for t in range(S):                                    # static t -> static slices
            xf = xg_ref[:, t, :]                              # forward dir: time t
            xb = xg_ref[:, S - 1 - t, :]                      # backward dir: time S-1-t
            hg = jnp.dot(h, whh, preferred_element_type=jnp.float32)
            sig_pre = jnp.concatenate(
                [xf[:, 0:H], xb[:, H:2 * H],
                 xf[:, 2 * H:3 * H], xb[:, 3 * H:4 * H]], axis=-1) + hg[:, 0:4 * H]
            rz = jax.nn.sigmoid(sig_pre)                      # [rf | rb | zf | zb]
            n_x = jnp.concatenate([xf[:, 4 * H:5 * H], xb[:, 5 * H:6 * H]], axis=-1)
            n = jnp.tanh(n_x + rz[:, 0:2 * H] * (hg[:, 4 * H:6 * H] + bhn))
            z = rz[:, 2 * H:4 * H]
            h = (1.0 - z) * n + z * h

        # ------------------- classifier (no activations, per the module) -----
        h1 = jnp.dot(h, wslice("w1"),
                     preferred_element_type=jnp.float32) + b_ref[4:5, 0:CLS1]
        h2 = jnp.dot(h1, wslice("w2"),
                     preferred_element_type=jnp.float32) + b_ref[5:6, 0:CLS2]
        out = jnp.dot(h2, wslice("w3"),
                      preferred_element_type=jnp.float32) + b_ref[6:7, 0:NUM_CLASSES]
        out_ref[...] = out.astype(out_ref.dtype)

    return kernel


# ----------------------------------------------------------------------------
# Parameter initialization (deterministic, synthetic, torch-like layouts)
# ----------------------------------------------------------------------------
def init_params(key, input_dim, nhidden, embed_time, num_heads):
    ks = jax.random.split(key, 12)

    def lin(k, out_f, in_f, scale=0.1):
        kw, kb = jax.random.split(k)
        w = jax.random.normal(kw, (out_f, in_f), jnp.float32) * scale
        b = jax.random.normal(kb, (out_f,), jnp.float32) * scale
        return w, b

    p = {}
    p['lin_w'], p['lin_b'] = lin(ks[0], 1, 1)                      # Linear(1,1)
    p['per_w'], p['per_b'] = lin(ks[1], embed_time - 1, 1)         # Linear(1,et-1)
    p['wq'], p['bq'] = lin(ks[2], embed_time, embed_time)          # linears[0]
    p['wk'], p['bk'] = lin(ks[3], embed_time, embed_time)          # linears[1]
    p['wo'], p['bo'] = lin(ks[4], nhidden, input_dim * num_heads)  # linears[2]
    for d, kk in (('f', ks[5]), ('b', ks[6])):
        k1, k2, k3, k4 = jax.random.split(kk, 4)
        p[f'w_ih_{d}'] = jax.random.normal(k1, (3 * nhidden, nhidden),
                                           jnp.float32) * 0.1
        p[f'w_hh_{d}'] = jax.random.normal(k2, (3 * nhidden, nhidden),
                                           jnp.float32) * 0.1
        p[f'b_ih_{d}'] = jax.random.normal(k3, (3 * nhidden,), jnp.float32) * 0.1
        p[f'b_hh_{d}'] = jax.random.normal(k4, (3 * nhidden,), jnp.float32) * 0.1
    p['c1_w'], p['c1_b'] = lin(ks[7], CLS1, 2 * nhidden)
    p['c2_w'], p['c2_b'] = lin(ks[8], CLS2, CLS1)
    p['c3_w'], p['c3_b'] = lin(ks[9], NUM_CLASSES, CLS2)
    return p


# ----------------------------------------------------------------------------
# One-time host-side packing (runs OUTSIDE the jitted forward)
# ----------------------------------------------------------------------------
def pack_params(p, *, input_dim, nhidden, embed_time, num_heads):
    H, ET = nhidden, embed_time
    etk = ET // num_heads
    scale = 1.0 / math.sqrt(etk)
    layout, rows = _slab_layout(input_dim, nhidden, embed_time, num_heads)

    w_slab = jnp.zeros((rows, 128), jnp.float32)

    def put(slab, name, mat):
        off, r, c = layout[name]
        assert mat.shape == (r, c)
        return slab.at[off:off + r, 0:c].set(mat)

    def gsl(w, i):                       # gate i rows of a torch (3H, H) weight
        return w[i * H:(i + 1) * H, :]

    w_slab = put(w_slab, "wqk",
                 jnp.concatenate([p['wq'].T * scale, p['wk'].T], axis=1))
    w_slab = put(w_slab, "wo", p['wo'].T)
    wih = jnp.concatenate(
        [gsl(p['w_ih_f'], 0).T, gsl(p['w_ih_b'], 0).T,
         gsl(p['w_ih_f'], 1).T, gsl(p['w_ih_b'], 1).T,
         gsl(p['w_ih_f'], 2).T, gsl(p['w_ih_b'], 2).T], axis=1)      # (H, 6H)
    w_slab = put(w_slab, "wih", wih)
    Z = jnp.zeros((H, H), jnp.float32)
    whh = jnp.concatenate([
        jnp.concatenate([gsl(p['w_hh_f'], 0).T, Z, gsl(p['w_hh_f'], 1).T, Z,
                         gsl(p['w_hh_f'], 2).T, Z], axis=1),
        jnp.concatenate([Z, gsl(p['w_hh_b'], 0).T, Z, gsl(p['w_hh_b'], 1).T,
                         Z, gsl(p['w_hh_b'], 2).T], axis=1)], axis=0)  # (2H, 6H)
    w_slab = put(w_slab, "whh", whh)
    w_slab = put(w_slab, "w1", p['c1_w'].T)
    w_slab = put(w_slab, "w2", p['c2_w'].T)
    w_slab = put(w_slab, "w3", p['c3_w'].T)

    b_slab = jnp.zeros((8, 128), jnp.float32)

    def putb(slab, row, vec):
        return slab.at[row, 0:vec.shape[0]].set(vec)

    b_slab = putb(b_slab, 0, jnp.concatenate([p['bq'] * scale, p['bk']]))
    b_slab = putb(b_slab, 1, p['bo'])
    bih = jnp.concatenate(                                   # r/z recurrent biases folded
        [p['b_ih_f'][0:H] + p['b_hh_f'][0:H],
         p['b_ih_b'][0:H] + p['b_hh_b'][0:H],
         p['b_ih_f'][H:2 * H] + p['b_hh_f'][H:2 * H],
         p['b_ih_b'][H:2 * H] + p['b_hh_b'][H:2 * H],
         p['b_ih_f'][2 * H:3 * H], p['b_ih_b'][2 * H:3 * H]])
    b_slab = putb(b_slab, 2, bih)
    b_slab = putb(b_slab, 3,
                  jnp.concatenate([p['b_hh_f'][2 * H:], p['b_hh_b'][2 * H:]]))
    b_slab = putb(b_slab, 4, p['c1_b'])
    b_slab = putb(b_slab, 5, p['c2_b'])
    b_slab = putb(b_slab, 6, p['c3_b'])

    return {'w_slab': w_slab, 'b_slab': b_slab,
            'lin_wt': p['lin_w'].T, 'lin_b': p['lin_b'],
            'per_wt': p['per_w'].T, 'per_b': p['per_b']}


# ----------------------------------------------------------------------------
# Forward wrapper (single pallas_call, 3 operands, batch padded 30 -> 32)
# ----------------------------------------------------------------------------
def enc_mtan_forward(packed, x, time_steps, *, input_dim, nhidden, embed_time,
                     num_heads):
    B, S, D = x.shape
    assert D == input_dim
    assert B == 30      # torch forward hard-codes hidden.view(1, 2, 30, nhidden)
    B_pad, H, ET = 32, nhidden, embed_time

    pad = B_pad - B
    x_p = jnp.concatenate([x.astype(jnp.float32),
                           jnp.zeros((pad, S, D), jnp.float32)], axis=0)
    tt_p = jnp.concatenate([time_steps.astype(jnp.float32),
                            jnp.zeros((pad, S), jnp.float32)], axis=0)

    # Learned time embedding: trivial elementwise glue, fused by XLA.
    tt = tt_p[..., None]                                           # (B_pad, S, 1)
    out1 = tt @ packed['lin_wt'] + packed['lin_b']                 # (B_pad, S, 1)
    out2 = jnp.sin(tt @ packed['per_wt'] + packed['per_b'])        # (B_pad, S, ET-1)
    key_emb = jnp.concatenate([out1, out2], axis=-1)               # (B_pad, S, ET)

    # mask = x[:, :, input_dim:] is computed in torch but never used (mask=None)

    data = jnp.concatenate([key_emb, x_p], axis=-1)                # (B_pad, S, ET+D)

    kernel = make_fused_kernel(input_dim, nhidden, embed_time, num_heads, S, B_pad)
    out = pl.pallas_call(
        kernel,
        out_shape=jax.ShapeDtypeStruct((B_pad, NUM_CLASSES), jnp.float32),
        scratch_shapes=[pltpu.VMEM((B_pad, S, 6 * H), jnp.float32)],
    )(data, packed['w_slab'], packed['b_slab'])
    return out[:B]


# ----------------------------------------------------------------------------
# Pure-JAX reference (mirrors the PyTorch module) for correctness checks
# ----------------------------------------------------------------------------
def enc_mtan_reference(p, x, time_steps, *, input_dim, nhidden, embed_time,
                       num_heads):
    B, S, D = x.shape
    H = nhidden
    etk = embed_time // num_heads
    tt = time_steps[..., None].astype(jnp.float32)
    out1 = tt @ p['lin_w'].T + p['lin_b']
    out2 = jnp.sin(tt @ p['per_w'].T + p['per_b'])
    key = jnp.concatenate([out1, out2], axis=-1)                   # (B, S, ET)

    q = key @ p['wq'].T + p['bq']
    k = key @ p['wk'].T + p['bk']
    qh = q.reshape(B, S, num_heads, etk).transpose(0, 2, 1, 3)
    kh = k.reshape(B, S, num_heads, etk).transpose(0, 2, 1, 3)
    scores = jnp.einsum('bhqe,bhke->bhqk', qh, kh) / math.sqrt(etk)
    p_attn = jax.nn.softmax(scores, axis=-1)
    att = jnp.einsum('bhqk,bkd->bhqd', p_attn, x)
    att = att.transpose(0, 2, 1, 3).reshape(B, S, num_heads * D)
    att = att @ p['wo'].T + p['bo']                                # (B, S, H)

    def gru_dir(w_ih, w_hh, b_ih, b_hh, reverse):
        wi, wh = w_ih.T, w_hh.T
        h = jnp.zeros((B, H), jnp.float32)
        order = range(S - 1, -1, -1) if reverse else range(S)
        for t in order:
            x_t = att[:, t, :]
            xg = x_t @ wi + b_ih
            hg = h @ wh + b_hh
            r = jax.nn.sigmoid(xg[:, :H] + hg[:, :H])
            z = jax.nn.sigmoid(xg[:, H:2 * H] + hg[:, H:2 * H])
            n = jnp.tanh(xg[:, 2 * H:] + r * hg[:, 2 * H:])
            h = (1.0 - z) * n + z * h
        return h

    hf = gru_dir(p['w_ih_f'], p['w_hh_f'], p['b_ih_f'], p['b_hh_f'], False)
    hb = gru_dir(p['w_ih_b'], p['w_hh_b'], p['b_ih_b'], p['b_hh_b'], True)
    class_in = jnp.concatenate([hf, hb], axis=1)
    h1 = class_in @ p['c1_w'].T + p['c1_b']
    h2 = h1 @ p['c2_w'].T + p['c2_b']
    return h2 @ p['c3_w'].T + p['c3_b']


if __name__ == "__main__":
    # batch=30 is forced by the hard-coded hidden.view(1, 2, 30, nhidden).
    batch, seq_len = 30, 8
    configs = [
        dict(input_dim=4, nhidden=16, embed_time=16, num_heads=1),
        dict(input_dim=4, nhidden=16, embed_time=16, num_heads=2),  # multi-head check
    ]

    root = jax.random.PRNGKey(0)
    k_p, k_x, k_t = jax.random.split(root, 3)
    x = jax.random.normal(k_x, (batch, seq_len, 4), jnp.float32)
    time_steps = jnp.sort(
        jax.random.uniform(k_t, (batch, seq_len), jnp.float32), axis=1)

    for cfg in configs:
        params = init_params(k_p, cfg['input_dim'], cfg['nhidden'],
                             cfg['embed_time'], cfg['num_heads'])
        packed = pack_params(params, **cfg)            # one-time, outside the jit
        fwd = jax.jit(functools.partial(enc_mtan_forward, **cfg))

        out = fwd(packed, x, time_steps)
        jax.block_until_ready(out)
        assert out.shape == (batch, NUM_CLASSES) and out.dtype == jnp.float32

        ref = enc_mtan_reference(params, x, time_steps, **cfg)
        err = float(jnp.max(jnp.abs(out - ref)))
        assert err < 1e-4, (
            f"num_heads={cfg['num_heads']}: kernel/reference mismatch, "
            f"max |diff| = {err}")

    print("KERNEL_OK")
</pallas_src>

<mosaic_0001>
module attributes {stable_mosaic.version = 11 : i64} {
  func.func @kernel(%arg0: memref<32x8x20xf32, #tpu.memory_space<vmem>>, %arg1: memref<296x128xf32, #tpu.memory_space<vmem>>, %arg2: memref<8x128xf32, #tpu.memory_space<vmem>>, %arg3: memref<32x6xf32, #tpu.memory_space<vmem>>, %arg4: memref<32x8x96xf32, #tpu.memory_space<vmem>>) attributes {dimension_semantics = [], scalar_prefetch = 0 : i64, scratch_operands = 1 : i64, tpu.core_type = #tpu.core_type<tc>} {
    %c0 = arith.constant 0 : index
    %c0_0 = arith.constant 0 : index
    %c0_1 = arith.constant 0 : index
    %0 = vector.load %arg0[%c0, %c0_0, %c0_1] : memref<32x8x20xf32, #tpu.memory_space<vmem>>, vector<32x8x20xf32>
    %1 = vector.extract_strided_slice %0 {offsets = [0, 0, 0], sizes = [32, 8, 16], strides = [1, 1, 1]} : vector<32x8x20xf32> to vector<32x8x16xf32>
    %2 = vector.shape_cast %1 : vector<32x8x16xf32> to vector<256x16xf32>
    %3 = vector.extract_strided_slice %0 {offsets = [0, 0, 16], sizes = [32, 8, 4], strides = [1, 1, 1]} : vector<32x8x20xf32> to vector<32x8x4xf32>
    %c0_2 = arith.constant 0 : index
    %c0_3 = arith.constant 0 : index
    %4 = vector.load %arg1[%c0_2, %c0_3] : memref<296x128xf32, #tpu.memory_space<vmem>>, vector<16x32xf32>
    %cst = arith.constant dense<0.000000e+00> : vector<256x32xf32>
    %5 = tpu.matmul %2, %4, %cst {dimension_numbers = #tpu.dot_dimension_numbers<[1], [0], [0], [1], [0, 0, 1, 1], [], []>} : vector<256x16xf32>, vector<16x32xf32>, vector<256x32xf32> -> vector<256x32xf32>
    %c0_4 = arith.constant 0 : index
    %c0_5 = arith.constant 0 : index
    %6 = vector.load %arg2[%c0_4, %c0_5] : memref<8x128xf32, #tpu.memory_space<vmem>>, vector<1x32xf32>
    %7 = vector.broadcast %6 : vector<1x32xf32> to vector<256x32xf32>
    %8 = arith.addf %5, %7 : vector<256x32xf32>
    %9 = vector.extract_strided_slice %8 {offsets = [0, 0], sizes = [256, 16], strides = [1, 1]} : vector<256x32xf32> to vector<256x16xf32>
    %10 = vector.shape_cast %9 : vector<256x16xf32> to vector<32x8x16xf32>
    %11 = vector.extract_strided_slice %8 {offsets = [0, 16], sizes = [256, 16], strides = [1, 1]} : vector<256x32xf32> to vector<256x16xf32>
    %12 = vector.shape_cast %11 : vector<256x16xf32> to vector<32x8x16xf32>
    "tpu.trace_start"() <{level = 10 : i32, message = "bqe,bke->bqk"}> : () -> ()
    %cst_6 = arith.constant dense<0.000000e+00> : vector<32x8x8xf32>
    %13 = tpu.matmul %10, %12, %cst_6 {dimension_numbers = #tpu.dot_dimension_numbers<[2], [2], [1], [1], [0, 0, 0, 1, 1, 1], [0], [0]>} : vector<32x8x16xf32>, vector<32x8x16xf32>, vector<32x8x8xf32> -> vector<32x8x8xf32>
    "tpu.trace_stop"() : () -> ()
    %cst_7 = arith.constant dense<0xFF800000> : vector<32x8xf32>
    %14 = vector.multi_reduction <maximumf>, %13, %cst_7 [2] : vector<32x8x8xf32> to vector<32x8xf32>
    %15 = vector.shape_cast %14 : vector<32x8xf32> to vector<32x8x1xf32>
    %16 = vector.broadcast %15 : vector<32x8x1xf32> to vector<32x8x8xf32>
    %17 = arith.subf %13, %16 : vector<32x8x8xf32>
    %18 = math.exp %17 : vector<32x8x8xf32>
    %cst_8 = arith.constant dense<0.000000e+00> : vector<32x8xf32>
    %19 = vector.multi_reduction <add>, %18, %cst_8 [2] : vector<32x8x8xf32> to vector<32x8xf32>
    %20 = vector.shape_cast %19 : vector<32x8xf32> to vector<32x8x1xf32>
    %21 = vector.broadcast %20 : vector<32x8x1xf32> to vector<32x8x8xf32>
    %22 = arith.divf %18, %21 : vector<32x8x8xf32>
    "tpu.trace_start"() <{level = 10 : i32, message = "bqk,bkd->bqd"}> : () -> ()
    %cst_9 = arith.constant dense<0.000000e+00> : vector<32x8x4xf32>
    %23 = tpu.matmul %22, %3, %cst_9 {dimension_numbers = #tpu.dot_dimension_numbers<[2], [1], [1], [2], [0, 0, 0, 1, 1, 2], [0], [0]>} : vector<32x8x8xf32>, vector<32x8x4xf32>, vector<32x8x4xf32> -> vector<32x8x4xf32>
    "tpu.trace_stop"() : () -> ()
    %24 = vector.shape_cast %23 : vector<32x8x4xf32> to vector<256x4xf32>
    %c16 = arith.constant 16 : index
    %c0_10 = arith.constant 0 : index
    %25 = vector.load %arg1[%c16, %c0_10] : memref<296x128xf32, #tpu.memory_space<vmem>>, vector<4x16xf32>
    %cst_11 = arith.constant dense<0.000000e+00> : vector<256x16xf32>
    %26 = tpu.matmul %24, %25, %cst_11 {dimension_numbers = #tpu.dot_dimension_numbers<[1], [0], [0], [1], [0, 0, 1, 1], [], []>} : vector<256x4xf32>, vector<4x16xf32>, vector<256x16xf32> -> vector<256x16xf32>
    %c1 = arith.constant 1 : index
    %c0_12 = arith.constant 0 : index
    %27 = vector.load %arg2[%c1, %c0_12] : memref<8x128xf32, #tpu.memory_space<vmem>>, vector<1x16xf32>
    %28 = vector.broadcast %27 : vector<1x16xf32> to vector<256x16xf32>
    %29 = arith.addf %26, %28 : vector<256x16xf32>
    %c24 = arith.constant 24 : index
    %c0_13 = arith.constant 0 : index
    %30 = vector.load %arg1[%c24, %c0_13] : memref<296x128xf32, #tpu.memory_space<vmem>>, vector<16x96xf32>
    %cst_14 = arith.constant dense<0.000000e+00> : vector<256x96xf32>
    %31 = tpu.matmul %29, %30, %cst_14 {dimension_numbers = #tpu.dot_dimension_numbers<[1], [0], [0], [1], [0, 0, 1, 1], [], []>} : vector<256x16xf32>, vector<16x96xf32>, vector<256x96xf32> -> vector<256x96xf32>
    %c2 = arith.constant 2 : index
    %c0_15 = arith.constant 0 : index
    %32 = vector.load %arg2[%c2, %c0_15] : memref<8x128xf32, #tpu.memory_space<vmem>>, vector<1x96xf32>
    %33 = vector.broadcast %32 : vector<1x96xf32> to vector<256x96xf32>
    %34 = arith.addf %31, %33 : vector<256x96xf32>
    %35 = vector.shape_cast %34 : vector<256x96xf32> to vector<32x8x96xf32>
    %c0_16 = arith.constant 0 : index
    %c0_17 = arith.constant 0 : index
    %c0_18 = arith.constant 0 : index
    %36 = vector.load %arg4[%c0_16, %c0_17, %c0_18] : memref<32x8x96xf32, #tpu.memory_space<vmem>>, vector<32x8x96xf32>
    tpu.vector_store %arg4[%c0_16, %c0_17, %c0_18], %35 {strides = array<i32>} : memref<32x8x96xf32, #tpu.memory_space<vmem>>, vector<32x8x96xf32>,
    %c40 = arith.constant 40 : index
    %c0_19 = arith.constant 0 : index
    %37 = vector.load %arg1[%c40, %c0_19] : memref<296x128xf32, #tpu.memory_space<vmem>>, vector<32x96xf32>
    %c3 = arith.constant 3 : index
    %c0_20 = arith.constant 0 : index
    %38 = vector.load %arg2[%c3, %c0_20] : memref<8x128xf32, #tpu.memory_space<vmem>>, vector<1x32xf32>
    %39 = vector.shape_cast %38 : vector<1x32xf32> to vector<1x32xf32>
    %40 = vector.broadcast %39 : vector<1x32xf32> to vector<32x32xf32>
    %cst_21 = arith.constant 0.000000e+00 : f32
    %41 = vector.broadcast %cst_21 : f32 to vector<32x32xf32>
    %c0_22 = arith.constant 0 : index
    %c0_23 = arith.constant 0 : index
    %c0_24 = arith.constant 0 : index
    %42 = vector.load %arg4[%c0_22, %c0_23, %c0_24] : memref<32x8x96xf32, #tpu.memory_space<vmem>>, vector<32x1x96xf32>
    %43 = vector.shape_cast %42 : vector<32x1x96xf32> to vector<32x96xf32>
    %c0_25 = arith.constant 0 : index
    %c7 = arith.constant 7 : index
    %c0_26 = arith.constant 0 : index
    %44 = vector.load %arg4[%c0_25, %c7, %c0_26] : memref<32x8x96xf32, #tpu.memory_space<vmem>>, vector<32x1x96xf32>
    %45 = vector.shape_cast %44 : vector<32x1x96xf32> to vector<32x96xf32>
    %cst_27 = arith.constant dense<0.000000e+00> : vector<32x96xf32>
    %46 = tpu.matmul %41, %37, %cst_27 {dimension_numbers = #tpu.dot_dimension_numbers<[1], [0], [0], [1], [0, 0, 1, 1], [], []>} : vector<32x32xf32>, vector<32x96xf32>, vector<32x96xf32> -> vector<32x96xf32>
    %47 = vector.extract_strided_slice %43 {offsets = [0, 0], sizes = [32, 16], strides = [1, 1]} : vector<32x96xf32> to vector<32x16xf32>
    %48 = vector.extract_strided_slice %45 {offsets = [0, 16], sizes = [32, 16], strides = [1, 1]} : vector<32x96xf32> to vector<32x16xf32>
    %49 = vector.extract_strided_slice %43 {offsets = [0, 32], sizes = [32, 16], strides = [1, 1]} : vector<32x96xf32> to vector<32x16xf32>
    %50 = vector.extract_strided_slice %45 {offsets = [0, 48], sizes = [32, 16], strides = [1, 1]} : vector<32x96xf32> to vector<32x16xf32>
    %51 = tpu.concatenate %47, %48, %49, %50 in 1 : vector<32x16xf32>, vector<32x16xf32>, vector<32x16xf32>, vector<32x16xf32> -> vector<32x64xf32>
    %52 = vector.extract_strided_slice %46 {offsets = [0, 0], sizes = [32, 64], strides = [1, 1]} : vector<32x96xf32> to vector<32x64xf32>
    %53 = arith.addf %51, %52 : vector<32x64xf32>
    %54 = arith.negf %53 : vector<32x64xf32>
    %55 = math.exp %54 : vector<32x64xf32>
    %cst_28 = arith.constant 1.000000e+00 : f32
    %56 = vector.broadcast %cst_28 : f32 to vector<32x64xf32>
    %57 = arith.addf %56, %55 : vector<32x64xf32>
    %58 = arith.divf %56, %57 : vector<32x64xf32>
    %59 = vector.extract_strided_slice %43 {offsets = [0, 64], sizes = [32, 16], strides = [1, 1]} : vector<32x96xf32> to vector<32x16xf32>
    %60 = vector.extract_strided_slice %45 {offsets = [0, 80], sizes = [32, 16], strides = [1, 1]} : vector<32x96xf32> to vector<32x16xf32>
    %61 = tpu.concatenate %59, %60 in 1 : vector<32x16xf32>, vector<32x16xf32> -> vector<32x32xf32>
    %62 = vector.extract_strided_slice %58 {offsets = [0, 0], sizes = [32, 32], strides = [1, 1]} : vector<32x64xf32> to vector<32x32xf32>
    %63 = vector.extract_strided_slice %46 {offsets = [0, 64], sizes = [32, 32], strides = [1, 1]} : vector<32x96xf32> to vector<32x32xf32>
    %64 = arith.addf %63, %40 : vector<32x32xf32>
    %65 = arith.mulf %62, %64 : vector<32x32xf32>
    %66 = arith.addf %61, %65 : vector<32x32xf32>
    %67 = math.tanh %66 : vector<32x32xf32>
    %68 = vector.extract_strided_slice %58 {offsets = [0, 32], sizes = [32, 32], strides = [1, 1]} : vector<32x64xf32> to vector<32x32xf32>
    %cst_29 = arith.constant 1.000000e+00 : f32
    %69 = vector.broadcast %cst_29 : f32 to vector<32x32xf32>
    %70 = arith.subf %69, %68 : vector<32x32xf32>
    %71 = arith.mulf %70, %67 : vector<32x32xf32>
    %72 = arith.mulf %68, %41 : vector<32x32xf32>
    %73 = arith.addf %71, %72 : vector<32x32xf32>
    %c0_30 = arith.constant 0 : index
    %c1_31 = arith.constant 1 : index
    %c0_32 = arith.constant 0 : index
    %74 = vector.load %arg4[%c0_30, %c1_31, %c0_32] : memref<32x8x96xf32, #tpu.memory_space<vmem>>, vector<32x1x96xf32>
    %75 = vector.shape_cast %74 : vector<32x1x96xf32> to vector<32x96xf32>
    %c0_33 = arith.constant 0 : index
    %c6 = arith.constant 6 : index
    %c0_34 = arith.constant 0 : index
    %76 = vector.load %arg4[%c0_33, %c6, %c0_34] : memref<32x8x96xf32, #tpu.memory_space<vmem>>, vector<32x1x96xf32>
    %77 = vector.shape_cast %76 : vector<32x1x96xf32> to vector<32x96xf32>
    %cst_35 = arith.constant dense<0.000000e+00> : vector<32x96xf32>
    %78 = tpu.matmul %73, %37, %cst_35 {dimension_numbers = #tpu.dot_dimension_numbers<[1], [0], [0], [1], [0, 0, 1, 1], [], []>} : vector<32x32xf32>, vector<32x96xf32>, vector<32x96xf32> -> vector<32x96xf32>
    %79 = vector.extract_strided_slice %75 {offsets = [0, 0], sizes = [32, 16], strides = [1, 1]} : vector<32x96xf32> to vector<32x16xf32>
    %80 = vector.extract_strided_slice %77 {offsets = [0, 16], sizes = [32, 16], strides = [1, 1]} : vector<32x96xf32> to vector<32x16xf32>
    %81 = vector.extract_strided_slice %75 {offsets = [0, 32], sizes = [32, 16], strides = [1, 1]} : vector<32x96xf32> to vector<32x16xf32>
    %82 = vector.extract_strided_slice %77 {offsets = [0, 48], sizes = [32, 16], strides = [1, 1]} : vector<32x96xf32> to vector<32x16xf32>
    %83 = tpu.concatenate %79, %80, %81, %82 in 1 : vector<32x16xf32>, vector<32x16xf32>, vector<32x16xf32>, vector<32x16xf32> -> vector<32x64xf32>
    %84 = vector.extract_strided_slice %78 {offsets = [0, 0], sizes = [32, 64], strides = [1, 1]} : vector<32x96xf32> to vector<32x64xf32>
    %85 = arith.addf %83, %84 : vector<32x64xf32>
    %86 = arith.negf %85 : vector<32x64xf32>
    %87 = math.exp %86 : vector<32x64xf32>
    %cst_36 = arith.constant 1.000000e+00 : f32
    %88 = vector.broadcast %cst_36 : f32 to vector<32x64xf32>
    %89 = arith.addf %88, %87 : vector<32x64xf32>
    %90 = arith.divf %88, %89 : vector<32x64xf32>
    %91 = vector.extract_strided_slice %75 {offsets = [0, 64], sizes = [32, 16], strides = [1, 1]} : vector<32x96xf32> to vector<32x16xf32>
    %92 = vector.extract_strided_slice %77 {offsets = [0, 80], sizes = [32, 16], strides = [1, 1]} : vector<32x96xf32> to vector<32x16xf32>
    %93 = tpu.concatenate %91, %92 in 1 : vector<32x16xf32>, vector<32x16xf32> -> vector<32x32xf32>
    %94 = vector.extract_strided_slice %90 {offsets = [0, 0], sizes = [32, 32], strides = [1, 1]} : vector<32x64xf32> to vector<32x32xf32>
    %95 = vector.extract_strided_slice %78 {offsets = [0, 64], sizes = [32, 32], strides = [1, 1]} : vector<32x96xf32> to vector<32x32xf32>
    %96 = arith.addf %95, %40 : vector<32x32xf32>
    %97 = arith.mulf %94, %96 : vector<32x32xf32>
    %98 = arith.addf %93, %97 : vector<32x32xf32>
    %99 = math.tanh %98 : vector<32x32xf32>
    %100 = vector.extract_strided_slice %90 {offsets = [0, 32], sizes = [32, 32], strides = [1, 1]} : vector<32x64xf32> to vector<32x32xf32>
    %cst_37 = arith.constant 1.000000e+00 : f32
    %101 = vector.broadcast %cst_37 : f32 to vector<32x32xf32>
    %102 = arith.subf %101, %100 : vector<32x32xf32>
    %103 = arith.mulf %102, %99 : vector<32x32xf32>
    %104 = arith.mulf %100, %73 : vector<32x32xf32>
    %105 = arith.addf %103, %104 : vector<32x32xf32>
    %c0_38 = arith.constant 0 : index
    %c2_39 = arith.constant 2 : index
    %c0_40 = arith.constant 0 : index
    %106 = vector.load %arg4[%c0_38, %c2_39, %c0_40] : memref<32x8x96xf32, #tpu.memory_space<vmem>>, vector<32x1x96xf32>
    %107 = vector.shape_cast %106 : vector<32x1x96xf32> to vector<32x96xf32>
    %c0_41 = arith.constant 0 : index
    %c5 = arith.constant 5 : index
    %c0_42 = arith.constant 0 : index
    %108 = vector.load %arg4[%c0_41, %c5, %c0_42] : memref<32x8x96xf32, #tpu.memory_space<vmem>>, vector<32x1x96xf32>
    %109 = vector.shape_cast %108 : vector<32x1x96xf32> to vector<32x96xf32>
    %cst_43 = arith.constant dense<0.000000e+00> : vector<32x96xf32>
    %110 = tpu.matmul %105, %37, %cst_43 {dimension_numbers = #tpu.dot_dimension_numbers<[1], [0], [0], [1], [0, 0, 1, 1], [], []>} : vector<32x32xf32>, vector<32x96xf32>, vector<32x96xf32> -> vector<32x96xf32>
    %111 = vector.extract_strided_slice %107 {offsets = [0, 0], sizes = [32, 16], strides = [1, 1]} : vector<32x96xf32> to vector<32x16xf32>
    %112 = vector.extract_strided_slice %109 {offsets = [0, 16], sizes = [32, 16], strides = [1, 1]} : vector<32x96xf32> to vector<32x16xf32>
    %113 = vector.extract_strided_slice %107 {offsets = [0, 32], sizes = [32, 16], strides = [1, 1]} : vector<32x96xf32> to vector<32x16xf32>
    %114 = vector.extract_strided_slice %109 {offsets = [0, 48], sizes = [32, 16], strides = [1, 1]} : vector<32x96xf32> to vector<32x16xf32>
    %115 = tpu.concatenate %111, %112, %113, %114 in 1 : vector<32x16xf32>, vector<32x16xf32>, vector<32x16xf32>, vector<32x16xf32> -> vector<32x64xf32>
    %116 = vector.extract_strided_slice %110 {offsets = [0, 0], sizes = [32, 64], strides = [1, 1]} : vector<32x96xf32> to vector<32x64xf32>
    %117 = arith.addf %115, %116 : vector<32x64xf32>
    %118 = arith.negf %117 : vector<32x64xf32>
    %119 = math.exp %118 : vector<32x64xf32>
    %cst_44 = arith.constant 1.000000e+00 : f32
    %120 = vector.broadcast %cst_44 : f32 to vector<32x64xf32>
    %121 = arith.addf %120, %119 : vector<32x64xf32>
    %122 = arith.divf %120, %121 : vector<32x64xf32>
    %123 = vector.extract_strided_slice %107 {offsets = [0, 64], sizes = [32, 16], strides = [1, 1]} : vector<32x96xf32> to vector<32x16xf32>
    %124 = vector.extract_strided_slice %109 {offsets = [0, 80], sizes = [32, 16], strides = [1, 1]} : vector<32x96xf32> to vector<32x16xf32>
    %125 = tpu.concatenate %123, %124 in 1 : vector<32x16xf32>, vector<32x16xf32> -> vector<32x32xf32>
    %126 = vector.extract_strided_slice %122 {offsets = [0, 0], sizes = [32, 32], strides = [1, 1]} : vector<32x64xf32> to vector<32x32xf32>
    %127 = vector.extract_strided_slice %110 {offsets = [0, 64], sizes = [32, 32], strides = [1, 1]} : vector<32x96xf32> to vector<32x32xf32>
    %128 = arith.addf %127, %40 : vector<32x32xf32>
    %129 = arith.mulf %126, %128 : vector<32x32xf32>
    %130 = arith.addf %125, %129 : vector<32x32xf32>
    %131 = math.tanh %130 : vector<32x32xf32>
    %132 = vector.extract_strided_slice %122 {offsets = [0, 32], sizes = [32, 32], strides = [1, 1]} : vector<32x64xf32> to vector<32x32xf32>
    %cst_45 = arith.constant 1.000000e+00 : f32
    %133 = vector.broadcast %cst_45 : f32 to vector<32x32xf32>
    %134 = arith.subf %133, %132 : vector<32x32xf32>
    %135 = arith.mulf %134, %131 : vector<32x32xf32>
    %136 = arith.mulf %132, %105 : vector<32x32xf32>
    %137 = arith.addf %135, %136 : vector<32x32xf32>
    %c0_46 = arith.constant 0 : index
    %c3_47 = arith.constant 3 : index
    %c0_48 = arith.constant 0 : index
    %138 = vector.load %arg4[%c0_46, %c3_47, %c0_48] : memref<32x8x96xf32, #tpu.memory_space<vmem>>, vector<32x1x96xf32>
    %139 = vector.shape_cast %138 : vector<32x1x96xf32> to vector<32x96xf32>
    %c0_49 = arith.constant 0 : index
    %c4 = arith.constant 4 : index
    %c0_50 = arith.constant 0 : index
    %140 = vector.load %arg4[%c0_49, %c4, %c0_50] : memref<32x8x96xf32, #tpu.memory_space<vmem>>, vector<32x1x96xf32>
    %141 = vector.shape_cast %140 : vector<32x1x96xf32> to vector<32x96xf32>
    %cst_51 = arith.constant dense<0.000000e+00> : vector<32x96xf32>
    %142 = tpu.matmul %137, %37, %cst_51 {dimension_numbers = #tpu.dot_dimension_numbers<[1], [0], [0], [1], [0, 0, 1, 1], [], []>} : vector<32x32xf32>, vector<32x96xf32>, vector<32x96xf32> -> vector<32x96xf32>
    %143 = vector.extract_strided_slice %139 {offsets = [0, 0], sizes = [32, 16], strides = [1, 1]} : vector<32x96xf32> to vector<32x16xf32>
    %144 = vector.extract_strided_slice %141 {offsets = [0, 16], sizes = [32, 16], strides = [1, 1]} : vector<32x96xf32> to vector<32x16xf32>
    %145 = vector.extract_strided_slice %139 {offsets = [0, 32], sizes = [32, 16], strides = [1, 1]} : vector<32x96xf32> to vector<32x16xf32>
    %146 = vector.extract_strided_slice %141 {offsets = [0, 48], sizes = [32, 16], strides = [1, 1]} : vector<32x96xf32> to vector<32x16xf32>
    %147 = tpu.concatenate %143, %144, %145, %146 in 1 : vector<32x16xf32>, vector<32x16xf32>, vector<32x16xf32>, vector<32x16xf32> -> vector<32x64xf32>
    %148 = vector.extract_strided_slice %142 {offsets = [0, 0], sizes = [32, 64], strides = [1, 1]} : vector<32x96xf32> to vector<32x64xf32>
    %149 = arith.addf %147, %148 : vector<32x64xf32>
    %150 = arith.negf %149 : vector<32x64xf32>
    %151 = math.exp %150 : vector<32x64xf32>
    %cst_52 = arith.constant 1.000000e+00 : f32
    %152 = vector.broadcast %cst_52 : f32 to vector<32x64xf32>
    %153 = arith.addf %152, %151 : vector<32x64xf32>
    %154 = arith.divf %152, %153 : vector<32x64xf32>
    %155 = vector.extract_strided_slice %139 {offsets = [0, 64], sizes = [32, 16], strides = [1, 1]} : vector<32x96xf32> to vector<32x16xf32>
    %156 = vector.extract_strided_slice %141 {offsets = [0, 80], sizes = [32, 16], strides = [1, 1]} : vector<32x96xf32> to vector<32x16xf32>
    %157 = tpu.concatenate %155, %156 in 1 : vector<32x16xf32>, vector<32x16xf32> -> vector<32x32xf32>
    %158 = vector.extract_strided_slice %154 {offsets = [0, 0], sizes = [32, 32], strides = [1, 1]} : vector<32x64xf32> to vector<32x32xf32>
    %159 = vector.extract_strided_slice %142 {offsets = [0, 64], sizes = [32, 32], strides = [1, 1]} : vector<32x96xf32> to vector<32x32xf32>
    %160 = arith.addf %159, %40 : vector<32x32xf32>
    %161 = arith.mulf %158, %160 : vector<32x32xf32>
    %162 = arith.addf %157, %161 : vector<32x32xf32>
    %163 = math.tanh %162 : vector<32x32xf32>
    %164 = vector.extract_strided_slice %154 {offsets = [0, 32], sizes = [32, 32], strides = [1, 1]} : vector<32x64xf32> to vector<32x32xf32>
    %cst_53 = arith.constant 1.000000e+00 : f32
    %165 = vector.broadcast %cst_53 : f32 to vector<32x32xf32>
    %166 = arith.subf %165, %164 : vector<32x32xf32>
    %167 = arith.mulf %166, %163 : vector<32x32xf32>
    %168 = arith.mulf %164, %137 : vector<32x32xf32>
    %169 = arith.addf %167, %168 : vector<32x32xf32>
    %c0_54 = arith.constant 0 : index
    %c4_55 = arith.constant 4 : index
    %c0_56 = arith.constant 0 : index
    %170 = vector.load %arg4[%c0_54, %c4_55, %c0_56] : memref<32x8x96xf32, #tpu.memory_space<vmem>>, vector<32x1x96xf32>
    %171 = vector.shape_cast %170 : vector<32x1x96xf32> to vector<32x96xf32>
    %c0_57 = arith.constant 0 : index
    %c3_58 = arith.constant 3 : index
    %c0_59 = arith.constant 0 : index
    %172 = vector.load %arg4[%c0_57, %c3_58, %c0_59] : memref<32x8x96xf32, #tpu.memory_space<vmem>>, vector<32x1x96xf32>
    %173 = vector.shape_cast %172 : vector<32x1x96xf32> to vector<32x96xf32>
    %cst_60 = arith.constant dense<0.000000e+00> : vector<32x96xf32>
    %174 = tpu.matmul %169, %37, %cst_60 {dimension_numbers = #tpu.dot_dimension_numbers<[1], [0], [0], [1], [0, 0, 1, 1], [], []>} : vector<32x32xf32>, vector<32x96xf32>, vector<32x96xf32> -> vector<32x96xf32>
    %175 = vector.extract_strided_slice %171 {offsets = [0, 0], sizes = [32, 16], strides = [1, 1]} : vector<32x96xf32> to vector<32x16xf32>
    %176 = vector.extract_strided_slice %173 {offsets = [0, 16], sizes = [32, 16], strides = [1, 1]} : vector<32x96xf32> to vector<32x16xf32>
    %177 = vector.extract_strided_slice %171 {offsets = [0, 32], sizes = [32, 16], strides = [1, 1]} : vector<32x96xf32> to vector<32x16xf32>
    %178 = vector.extract_strided_slice %173 {offsets = [0, 48], sizes = [32, 16], strides = [1, 1]} : vector<32x96xf32> to vector<32x16xf32>
    %179 = tpu.concatenate %175, %176, %177, %178 in 1 : vector<32x16xf32>, vector<32x16xf32>, vector<32x16xf32>, vector<32x16xf32> -> vector<32x64xf32>
    %180 = vector.extract_strided_slice %174 {offsets = [0, 0], sizes = [32, 64], strides = [1, 1]} : vector<32x96xf32> to vector<32x64xf32>
    %181 = arith.addf %179, %180 : vector<32x64xf32>
    %182 = arith.negf %181 : vector<32x64xf32>
    %183 = math.exp %182 : vector<32x64xf32>
    %cst_61 = arith.constant 1.000000e+00 : f32
    %184 = vector.broadcast %cst_61 : f32 to vector<32x64xf32>
    %185 = arith.addf %184, %183 : vector<32x64xf32>
    %186 = arith.divf %184, %185 : vector<32x64xf32>
    %187 = vector.extract_strided_slice %171 {offsets = [0, 64], sizes = [32, 16], strides = [1, 1]} : vector<32x96xf32> to vector<32x16xf32>
    %188 = vector.extract_strided_slice %173 {offsets = [0, 80], sizes = [32, 16], strides = [1, 1]} : vector<32x96xf32> to vector<32x16xf32>
    %189 = tpu.concatenate %187, %188 in 1 : vector<32x16xf32>, vector<32x16xf32> -> vector<32x32xf32>
    %190 = vector.extract_strided_slice %186 {offsets = [0, 0], sizes = [32, 32], strides = [1, 1]} : vector<32x64xf32> to vector<32x32xf32>
    %191 = vector.extract_strided_slice %174 {offsets = [0, 64], sizes = [32, 32], strides = [1, 1]} : vector<32x96xf32> to vector<32x32xf32>
    %192 = arith.addf %191, %40 : vector<32x32xf32>
    %193 = arith.mulf %190, %192 : vector<32x32xf32>
    %194 = arith.addf %189, %193 : vector<32x32xf32>
    %195 = math.tanh %194 : vector<32x32xf32>
    %196 = vector.extract_strided_slice %186 {offsets = [0, 32], sizes = [32, 32], strides = [1, 1]} : vector<32x64xf32> to vector<32x32xf32>
    %cst_62 = arith.constant 1.000000e+00 : f32
    %197 = vector.broadcast %cst_62 : f32 to vector<32x32xf32>
    %198 = arith.subf %197, %196 : vector<32x32xf32>
    %199 = arith.mulf %198, %195 : vector<32x32xf32>
    %200 = arith.mulf %196, %169 : vector<32x32xf32>
    %201 = arith.addf %199, %200 : vector<32x32xf32>
    %c0_63 = arith.constant 0 : index
    %c5_64 = arith.constant 5 : index
    %c0_65 = arith.constant 0 : index
    %202 = vector.load %arg4[%c0_63, %c5_64, %c0_65] : memref<32x8x96xf32, #tpu.memory_space<vmem>>, vector<32x1x96xf32>
    %203 = vector.shape_cast %202 : vector<32x1x96xf32> to vector<32x96xf32>
    %c0_66 = arith.constant 0 : index
    %c2_67 = arith.constant 2 : index
    %c0_68 = arith.constant 0 : index
    %204 = vector.load %arg4[%c0_66, %c2_67, %c0_68] : memref<32x8x96xf32, #tpu.memory_space<vmem>>, vector<32x1x96xf32>
    %205 = vector.shape_cast %204 : vector<32x1x96xf32> to vector<32x96xf32>
    %cst_69 = arith.constant dense<0.000000e+00> : vector<32x96xf32>
    %206 = tpu.matmul %201, %37, %cst_69 {dimension_numbers = #tpu.dot_dimension_numbers<[1], [0], [0], [1], [0, 0, 1, 1], [], []>} : vector<32x32xf32>, vector<32x96xf32>, vector<32x96xf32> -> vector<32x96xf32>
    %207 = vector.extract_strided_slice %203 {offsets = [0, 0], sizes = [32, 16], strides = [1, 1]} : vector<32x96xf32> to vector<32x16xf32>
    %208 = vector.extract_strided_slice %205 {offsets = [0, 16], sizes = [32, 16], strides = [1, 1]} : vector<32x96xf32> to vector<32x16xf32>
    %209 = vector.extract_strided_slice %203 {offsets = [0, 32], sizes = [32, 16], strides = [1, 1]} : vector<32x96xf32> to vector<32x16xf32>
    %210 = vector.extract_strided_slice %205 {offsets = [0, 48], sizes = [32, 16], strides = [1, 1]} : vector<32x96xf32> to vector<32x16xf32>
    %211 = tpu.concatenate %207, %208, %209, %210 in 1 : vector<32x16xf32>, vector<32x16xf32>, vector<32x16xf32>, vector<32x16xf32> -> vector<32x64xf32>
    %212 = vector.extract_strided_slice %206 {offsets = [0, 0], sizes = [32, 64], strides = [1, 1]} : vector<32x96xf32> to vector<32x64xf32>
    %213 = arith.addf %211, %212 : vector<32x64xf32>
    %214 = arith.negf %213 : vector<32x64xf32>
    %215 = math.exp %214 : vector<32x64xf32>
    %cst_70 = arith.constant 1.000000e+00 : f32
    %216 = vector.broadcast %cst_70 : f32 to vector<32x64xf32>
    %217 = arith.addf %216, %215 : vector<32x64xf32>
    %218 = arith.divf %216, %217 : vector<32x64xf32>
    %219 = vector.extract_strided_slice %203 {offsets = [0, 64], sizes = [32, 16], strides = [1, 1]} : vector<32x96xf32> to vector<32x16xf32>
    %220 = vector.extract_strided_slice %205 {offsets = [0, 80], sizes = [32, 16], strides = [1, 1]} : vector<32x96xf32> to vector<32x16xf32>
    %221 = tpu.concatenate %219, %220 in 1 : vector<32x16xf32>, vector<32x16xf32> -> vector<32x32xf32>
    %222 = vector.extract_strided_slice %218 {offsets = [0, 0], sizes = [32, 32], strides = [1, 1]} : vector<32x64xf32> to vector<32x32xf32>
    %223 = vector.extract_strided_slice %206 {offsets = [0, 64], sizes = [32, 32], strides = [1, 1]} : vector<32x96xf32> to vector<32x32xf32>
    %224 = arith.addf %223, %40 : vector<32x32xf32>
    %225 = arith.mulf %222, %224 : vector<32x32xf32>
    %226 = arith.addf %221, %225 : vector<32x32xf32>
    %227 = math.tanh %226 : vector<32x32xf32>
    %228 = vector.extract_strided_slice %218 {offsets = [0, 32], sizes = [32, 32], strides = [1, 1]} : vector<32x64xf32> to vector<32x32xf32>
    %cst_71 = arith.constant 1.000000e+00 : f32
    %229 = vector.broadcast %cst_71 : f32 to vector<32x32xf32>
    %230 = arith.subf %229, %228 : vector<32x32xf32>
    %231 = arith.mulf %230, %227 : vector<32x32xf32>
    %232 = arith.mulf %228, %201 : vector<32x32xf32>
    %233 = arith.addf %231, %232 : vector<32x32xf32>
    %c0_72 = arith.constant 0 : index
    %c6_73 = arith.constant 6 : index
    %c0_74 = arith.constant 0 : index
    %234 = vector.load %arg4[%c0_72, %c6_73, %c0_74] : memref<32x8x96xf32, #tpu.memory_space<vmem>>, vector<32x1x96xf32>
    %235 = vector.shape_cast %234 : vector<32x1x96xf32> to vector<32x96xf32>
    %c0_75 = arith.constant 0 : index
    %c1_76 = arith.constant 1 : index
    %c0_77 = arith.constant 0 : index
    %236 = vector.load %arg4[%c0_75, %c1_76, %c0_77] : memref<32x8x96xf32, #tpu.memory_space<vmem>>, vector<32x1x96xf32>
    %237 = vector.shape_cast %236 : vector<32x1x96xf32> to vector<32x96xf32>
    %cst_78 = arith.constant dense<0.000000e+00> : vector<32x96xf32>
    %238 = tpu.matmul %233, %37, %cst_78 {dimension_numbers = #tpu.dot_dimension_numbers<[1], [0], [0], [1], [0, 0, 1, 1], [], []>} : vector<32x32xf32>, vector<32x96xf32>, vector<32x96xf32> -> vector<32x96xf32>
    %239 = vector.extract_strided_slice %235 {offsets = [0, 0], sizes = [32, 16], strides = [1, 1]} : vector<32x96xf32> to vector<32x16xf32>
    %240 = vector.extract_strided_slice %237 {offsets = [0, 16], sizes = [32, 16], strides = [1, 1]} : vector<32x96xf32> to vector<32x16xf32>
    %241 = vector.extract_strided_slice %235 {offsets = [0, 32], sizes = [32, 16], strides = [1, 1]} : vector<32x96xf32> to vector<32x16xf32>
    %242 = vector.extract_strided_slice %237 {offsets = [0, 48], sizes = [32, 16], strides = [1, 1]} : vector<32x96xf32> to vector<32x16xf32>
    %243 = tpu.concatenate %239, %240, %241, %242 in 1 : vector<32x16xf32>, vector<32x16xf32>, vector<32x16xf32>, vector<32x16xf32> -> vector<32x64xf32>
    %244 = vector.extract_strided_slice %238 {offsets = [0, 0], sizes = [32, 64], strides = [1, 1]} : vector<32x96xf32> to vector<32x64xf32>
    %245 = arith.addf %243, %244 : vector<32x64xf32>
    %246 = arith.negf %245 : vector<32x64xf32>
    %247 = math.exp %246 : vector<32x64xf32>
    %cst_79 = arith.constant 1.000000e+00 : f32
    %248 = vector.broadcast %cst_79 : f32 to vector<32x64xf32>
    %249 = arith.addf %248, %247 : vector<32x64xf32>
    %250 = arith.divf %248, %249 : vector<32x64xf32>
    %251 = vector.extract_strided_slice %235 {offsets = [0, 64], sizes = [32, 16], strides = [1, 1]} : vector<32x96xf32> to vector<32x16xf32>
    %252 = vector.extract_strided_slice %237 {offsets = [0, 80], sizes = [32, 16], strides = [1, 1]} : vector<32x96xf32> to vector<32x16xf32>
    %253 = tpu.concatenate %251, %252 in 1 : vector<32x16xf32>, vector<32x16xf32> -> vector<32x32xf32>
    %254 = vector.extract_strided_slice %250 {offsets = [0, 0], sizes = [32, 32], strides = [1, 1]} : vector<32x64xf32> to vector<32x32xf32>
    %255 = vector.extract_strided_slice %238 {offsets = [0, 64], sizes = [32, 32], strides = [1, 1]} : vector<32x96xf32> to vector<32x32xf32>
    %256 = arith.addf %255, %40 : vector<32x32xf32>
    %257 = arith.mulf %254, %256 : vector<32x32xf32>
    %258 = arith.addf %253, %257 : vector<32x32xf32>
    %259 = math.tanh %258 : vector<32x32xf32>
    %260 = vector.extract_strided_slice %250 {offsets = [0, 32], sizes = [32, 32], strides = [1, 1]} : vector<32x64xf32> to vector<32x32xf32>
    %cst_80 = arith.constant 1.000000e+00 : f32
    %261 = vector.broadcast %cst_80 : f32 to vector<32x32xf32>
    %262 = arith.subf %261, %260 : vector<32x32xf32>
    %263 = arith.mulf %262, %259 : vector<32x32xf32>
    %264 = arith.mulf %260, %233 : vector<32x32xf32>
    %265 = arith.addf %263, %264 : vector<32x32xf32>
    %c0_81 = arith.constant 0 : index
    %c7_82 = arith.constant 7 : index
    %c0_83 = arith.constant 0 : index
    %266 = vector.load %arg4[%c0_81, %c7_82, %c0_83] : memref<32x8x96xf32, #tpu.memory_space<vmem>>, vector<32x1x96xf32>
    %267 = vector.shape_cast %266 : vector<32x1x96xf32> to vector<32x96xf32>
    %c0_84 = arith.constant 0 : index
    %c0_85 = arith.constant 0 : index
    %c0_86 = arith.constant 0 : index
    %268 = vector.load %arg4[%c0_84, %c0_85, %c0_86] : memref<32x8x96xf32, #tpu.memory_space<vmem>>, vector<32x1x96xf32>
    %269 = vector.shape_cast %268 : vector<32x1x96xf32> to vector<32x96xf32>
    %cst_87 = arith.constant dense<0.000000e+00> : vector<32x96xf32>
    %270 = tpu.matmul %265, %37, %cst_87 {dimension_numbers = #tpu.dot_dimension_numbers<[1], [0], [0], [1], [0, 0, 1, 1], [], []>} : vector<32x32xf32>, vector<32x96xf32>, vector<32x96xf32> -> vector<32x96xf32>
    %271 = vector.extract_strided_slice %267 {offsets = [0, 0], sizes = [32, 16], strides = [1, 1]} : vector<32x96xf32> to vector<32x16xf32>
    %272 = vector.extract_strided_slice %269 {offsets = [0, 16], sizes = [32, 16], strides = [1, 1]} : vector<32x96xf32> to vector<32x16xf32>
    %273 = vector.extract_strided_slice %267 {offsets = [0, 32], sizes = [32, 16], strides = [1, 1]} : vector<32x96xf32> to vector<32x16xf32>
    %274 = vector.extract_strided_slice %269 {offsets = [0, 48], sizes = [32, 16], strides = [1, 1]} : vector<32x96xf32> to vector<32x16xf32>
    %275 = tpu.concatenate %271, %272, %273, %274 in 1 : vector<32x16xf32>, vector<32x16xf32>, vector<32x16xf32>, vector<32x16xf32> -> vector<32x64xf32>
    %276 = vector.extract_strided_slice %270 {offsets = [0, 0], sizes = [32, 64], strides = [1, 1]} : vector<32x96xf32> to vector<32x64xf32>
    %277 = arith.addf %275, %276 : vector<32x64xf32>
    %278 = arith.negf %277 : vector<32x64xf32>
    %279 = math.exp %278 : vector<32x64xf32>
    %cst_88 = arith.constant 1.000000e+00 : f32
    %280 = vector.broadcast %cst_88 : f32 to vector<32x64xf32>
    %281 = arith.addf %280, %279 : vector<32x64xf32>
    %282 = arith.divf %280, %281 : vector<32x64xf32>
    %283 = vector.extract_strided_slice %267 {offsets = [0, 64], sizes = [32, 16], strides = [1, 1]} : vector<32x96xf32> to vector<32x16xf32>
    %284 = vector.extract_strided_slice %269 {offsets = [0, 80], sizes = [32, 16], strides = [1, 1]} : vector<32x96xf32> to vector<32x16xf32>
    %285 = tpu.concatenate %283, %284 in 1 : vector<32x16xf32>, vector<32x16xf32> -> vector<32x32xf32>
    %286 = vector.extract_strided_slice %282 {offsets = [0, 0], sizes = [32, 32], strides = [1, 1]} : vector<32x64xf32> to vector<32x32xf32>
    %287 = vector.extract_strided_slice %270 {offsets = [0, 64], sizes = [32, 32], strides = [1, 1]} : vector<32x96xf32> to vector<32x32xf32>
    %288 = arith.addf %287, %40 : vector<32x32xf32>
    %289 = arith.mulf %286, %288 : vector<32x32xf32>
    %290 = arith.addf %285, %289 : vector<32x32xf32>
    %291 = math.tanh %290 : vector<32x32xf32>
    %292 = vector.extract_strided_slice %282 {offsets = [0, 32], sizes = [32, 32], strides = [1, 1]} : vector<32x64xf32> to vector<32x32xf32>
    %cst_89 = arith.constant 1.000000e+00 : f32
    %293 = vector.broadcast %cst_89 : f32 to vector<32x32xf32>
    %294 = arith.subf %293, %292 : vector<32x32xf32>
    %295 = arith.mulf %294, %291 : vector<32x32xf32>
    %296 = arith.mulf %292, %265 : vector<32x32xf32>
    %297 = arith.addf %295, %296 : vector<32x32xf32>
    %c72 = arith.constant 72 : index
    %c0_90 = arith.constant 0 : index
    %298 = vector.load %arg1[%c72, %c0_90] : memref<296x128xf32, #tpu.memory_space<vmem>>, vector<32x128xf32>
    %cst_91 = arith.constant dense<0.000000e+00> : vector<32x128xf32>
    %299 = tpu.matmul %297, %298, %cst_91 {dimension_numbers = #tpu.dot_dimension_numbers<[1], [0], [0], [1], [0, 0, 1, 1], [], []>} : vector<32x32xf32>, vector<32x128xf32>, vector<32x128xf32> -> vector<32x128xf32>
    %c4_92 = arith.constant 4 : index
    %c0_93 = arith.constant 0 : index
    %300 = vector.load %arg2[%c4_92, %c0_93] : memref<8x128xf32, #tpu.memory_space<vmem>>, vector<1x128xf32>
    %301 = vector.broadcast %300 : vector<1x128xf32> to vector<32x128xf32>
    %302 = arith.addf %299, %301 : vector<32x128xf32>
    %c104 = arith.constant 104 : index
    %c0_94 = arith.constant 0 : index
    %303 = vector.load %arg1[%c104, %c0_94] : memref<296x128xf32, #tpu.memory_space<vmem>>, vector<128x64xf32>
    %cst_95 = arith.constant dense<0.000000e+00> : vector<32x64xf32>
    %304 = tpu.matmul %302, %303, %cst_95 {dimension_numbers = #tpu.dot_dimension_numbers<[1], [0], [0], [1], [0, 0, 1, 1], [], []>} : vector<32x128xf32>, vector<128x64xf32>, vector<32x64xf32> -> vector<32x64xf32>
    %c5_96 = arith.constant 5 : index
    %c0_97 = arith.constant 0 : index
    %305 = vector.load %arg2[%c5_96, %c0_97] : memref<8x128xf32, #tpu.memory_space<vmem>>, vector<1x64xf32>
    %306 = vector.broadcast %305 : vector<1x64xf32> to vector<32x64xf32>
    %307 = arith.addf %304, %306 : vector<32x64xf32>
    %c232 = arith.constant 232 : index
    %c0_98 = arith.constant 0 : index
    %308 = vector.load %arg1[%c232, %c0_98] : memref<296x128xf32, #tpu.memory_space<vmem>>, vector<64x6xf32>
    %cst_99 = arith.constant dense<0.000000e+00> : vector<32x6xf32>
    %309 = tpu.matmul %307, %308, %cst_99 {dimension_numbers = #tpu.dot_dimension_numbers<[1], [0], [0], [1], [0, 0, 1, 1], [], []>} : vector<32x64xf32>, vector<64x6xf32>, vector<32x6xf32> -> vector<32x6xf32>
    %c6_100 = arith.constant 6 : index
    %c0_101 = arith.constant 0 : index
    %310 = vector.load %arg2[%c6_100, %c0_101] : memref<8x128xf32, #tpu.memory_space<vmem>>, vector<1x6xf32>
    %311 = vector.broadcast %310 : vector<1x6xf32> to vector<32x6xf32>
    %312 = arith.addf %309, %311 : vector<32x6xf32>
    %c0_102 = arith.constant 0 : index
    %c0_103 = arith.constant 0 : index
    %313 = vector.load %arg3[%c0_102, %c0_103] : memref<32x6xf32, #tpu.memory_space<vmem>>, vector<32x6xf32>
    tpu.vector_store %arg3[%c0_102, %c0_103], %312 {strides = array<i32>} : memref<32x6xf32, #tpu.memory_space<vmem>>, vector<32x6xf32>,
    return
  }
}

</mosaic_0001>

<bundles_post_ra>
// kernel: enc_mtan_forward.1
= control target key start
LH: loop header
LB: loop body
LE: loop exit
PB: predicated region body
PF: predicated region fallthrough
CT: control target
= control target key end

     0   :  { %vm53_vm0 = vcmask 130048   ;;  %v13787_v34 = vmov 0.0   ;;  %vm11053_vm1 = vmmov 0   ;;  %s11054_s28 = smov 112   ;;  %vm2839_vm2 = vcmask 64512   ;;  %s11055_s23 = smov 64   ;;  %s13783_s1 = inlined_call_operand.vmem [shape: f32[296,128], index: 1, kind: input, shape index: {}]   ;;  %s13784_s0 = inlined_call_operand.vmem [shape: f32[32,8,20], index: 0, kind: input, shape index: {}]   ;;  %s13785_s2 = inlined_call_operand.vmem [shape: f32[8,128], index: 2, kind: input, shape index: {}]   ;;  %s13786_s3 = inlined_call_operand.vmem [shape: f32[32,6], index: 3, kind: output, shape index: {}]  }
   0x1   :  { %v47_v0 = vld [vmem:[%s13783_s1 + $0x8] sm:$0xff]  ;;  %v46_v1 = vld [vmem:[%s13783_s1] sm:$0xff]  ;;  %v11099_v4 = vld [vmem:[%s13784_s0 + $0x10] sm:$0xff]  ;;  %10112 = vmatprep.subr.mxu1 %v13787_v34  ;;  %10114 = vmatprep.mubr.msk.f32.mxu1 %vm11053_vm1, %v13787_v34  ;;  %vm5727_vm3 = vcmask 1043456   ;;  %vm5630_vm4 = vcmask 31744   ;;  %vm6284_vm5 = vcmask 785408  }
   0x2   :  { %v11087_v2 = vld [vmem:[%s13784_s0] sm:$0xff]  ;;  %10055 = vmatprep.subr.mxu0 %v47_v0  ;;  %v11094_v3 = vld [vmem:[%s13784_s0 + $0x8] sm:$0xff]  ;;  %v11108_v5 = vld [vmem:[%s13784_s0 + $0x18] sm:$0xff]  ;;  %vm6512_vm6 = vcmask 1041409   ;;  %vm6515_vm7 = vcmask 1042434   ;;  %vm6518_vm8 = vcmask 1043459  }
   0x3   :  { %10059 = vmatprep.mubr.msk.f32.mxu0 %vm53_vm0, %v11087_v2  ;;  %10056 = vmatpush3.msra.mxu0 %v47_v0  ;;  %v11113_v6 = vld [vmem:[%s13784_s0 + $0x20] sm:$0xff]  ;;  %v11122_v7 = vld [vmem:[%s13784_s0 + $0x28] sm:$0xff]  ;;  %v11127_v8 = vld [vmem:[%s13784_s0 + $0x30] sm:$0xff]  ;;  %vm6521_vm9 = vcmask 1044484   ;;  %vm6524_vm10 = vcmask 1045509   ;;  %vm6527_vm11 = vcmask 1046534  }
   0x4   :  { %10057 = vmatprep.subr.mxu0 %v46_v1  ;;  %v11136_v9 = vld [vmem:[%s13784_s0 + $0x38] sm:$0xff]  ;;  %v11141_v10 = vld [vmem:[%s13784_s0 + $0x40] sm:$0xff]  ;;  %v11150_v11 = vld [vmem:[%s13784_s0 + $0x48] sm:$0xff]  ;;  %vm6530_vm12 = vcmask 1047559   ;;  %vm6390_vm13 = vcmask 261120   ;;  %vm6678_vm14 = vcmask 392192  }
   0x5   :  { %10058 = vmatpush3.msra.mxu0 %v46_v1  ;;  %v11155_v12 = vld [vmem:[%s13784_s0 + $0x50] sm:$0xff]  ;;  %v11164_v13 = vld [vmem:[%s13784_s0 + $0x58] sm:$0xff]  ;;  %v11169_v14 = vld [vmem:[%s13784_s0 + $0x60] sm:$0xff]  ;;  %s11057_s29 = smov 96   ;;  %vm9347_vm15 = vcmask 523264  }
   0x6   :  { %10060 = vmatmul.mubr.msk.f32.vlgmr.msra.gmra.mxu0 %vm53_vm0, %v11094_v3  ;;  %v11178_v15 = vld [vmem:[%s13784_s0 + $0x68] sm:$0xff]  ;;  %v11183_v16 = vld [vmem:[%s13784_s0 + $0x70] sm:$0xff]  ;;  %v11192_v17 = vld [vmem:[%s13784_s0 + $0x78] sm:$0xff]  ;;  %10107 = vmatprep.subr.mxu0 %v13787_v34 }
   0x7   :  { %10062 = vmatprep.mubr.msk.f32.mxu0 %vm53_vm0, %v11099_v4  ;;  %v11197_v18 = vld [vmem:[%s13784_s0 + $0x80] sm:$0xff]  ;;  %v11206_v19 = vld [vmem:[%s13784_s0 + $0x88] sm:$0xff]  ;;  %v11211_v20 = vld [vmem:[%s13784_s0 + $0x90] sm:$0xff] }
   0x8   :  { %v11220_v21 = vld [vmem:[%s13784_s0 + $0x98] sm:$0xff]  ;;  %v11225_v22 = vld [vmem:[%s13784_s0 + $0xa0] sm:$0xff]  ;;  %v11234_v23 = vld [vmem:[%s13784_s0 + $0xa8] sm:$0xff] }
   0x9   :  { %v11239_v24 = vld [vmem:[%s13784_s0 + $0xb0] sm:$0xff]  ;;  %v11248_v25 = vld [vmem:[%s13784_s0 + $0xb8] sm:$0xff]  ;;  %v11253_v26 = vld [vmem:[%s13784_s0 + $0xc0] sm:$0xff] }
   0xa   :  { %10063 = vmatmul.mubr.msk.f32.gmra.mxu0 %vm53_vm0, %v11108_v5  ;;  %v11262_v27 = vld [vmem:[%s13784_s0 + $0xc8] sm:$0xff]  ;;  %v11267_v28 = vld [vmem:[%s13784_s0 + $0xd0] sm:$0xff]  ;;  %v11276_v29 = vld [vmem:[%s13784_s0 + $0xd8] sm:$0xff] }
   0xb   :  { %10065 = vmatprep.mubr.msk.f32.mxu0 %vm53_vm0, %v11113_v6  ;;  %v11281_v30 = vld [vmem:[%s13784_s0 + $0xe0] sm:$0xff]  ;;  %v43_v31 = vld [vmem:[%s13784_s0 + $0xe8] sm:$0xff]  ;;  %v44_v32 = vld [vmem:[%s13784_s0 + $0xf0] sm:$0xff] }
   0xc   :  { %13821 = vst [vmem:[#allocation3_spill] sm:$0xff] %v11281_v30  ;;  %v45_v33 = vld [vmem:[%s13784_s0 + $0xf8] sm:$0xff]  ;;  %v11308_v35 = vld [vmem:[%s13785_s2] ss:$0 sm:$0xff] }
   0xe   :  { %10066 = vmatmul.mubr.msk.f32.gmra.mxu0 %vm53_vm0, %v11122_v7 }
   0xf   :  { %10068 = vmatprep.mubr.msk.f32.mxu0 %vm53_vm0, %v11127_v8 }
  0x12   :  { %10069 = vmatmul.mubr.msk.f32.gmra.mxu0 %vm53_vm0, %v11136_v9 }
  0x13   :  { %10071 = vmatprep.mubr.msk.f32.mxu0 %vm53_vm0, %v11141_v10 }
  0x16   :  { %10072 = vmatmul.mubr.msk.f32.gmra.mxu0 %vm53_vm0, %v11150_v11 }
  0x17   :  { %10074 = vmatprep.mubr.msk.f32.mxu0 %vm53_vm0, %v11155_v12 }
  0x1a   :  { %10075 = vmatmul.mubr.msk.f32.gmra.mxu0 %vm53_vm0, %v11164_v13 }
  0x1b   :  { %10077 = vmatprep.mubr.msk.f32.mxu0 %vm53_vm0, %v11169_v14 }
  0x1e   :  { %10078 = vmatmul.mubr.msk.f32.gmra.mxu0 %vm53_vm0, %v11178_v15 }
  0x1f   :  { %10080 = vmatprep.mubr.msk.f32.mxu0 %vm53_vm0, %v11183_v16 }
  0x22   :  { %10081 = vmatmul.mubr.msk.f32.gmra.mxu0 %vm53_vm0, %v11192_v17 }
  0x23   :  { %10083 = vmatprep.mubr.msk.f32.mxu0 %vm53_vm0, %v11197_v18 }
  0x26   :  { %10084 = vmatmul.mubr.msk.f32.gmra.mxu0 %vm53_vm0, %v11206_v19 }
  0x27   :  { %10086 = vmatprep.mubr.msk.f32.mxu0 %vm53_vm0, %v11211_v20 }
  0x2a   :  { %10087 = vmatmul.mubr.msk.f32.gmra.mxu0 %vm53_vm0, %v11220_v21 }
  0x2b   :  { %10089 = vmatprep.mubr.msk.f32.mxu0 %vm53_vm0, %v11225_v22 }
  0x2e   :  { %10090 = vmatmul.mubr.msk.f32.gmra.mxu0 %vm53_vm0, %v11234_v23 }
  0x2f   :  { %10092 = vmatprep.mubr.msk.f32.mxu0 %vm53_vm0, %v11239_v24 }
  0x32   :  { %10093 = vmatmul.mubr.msk.f32.gmra.mxu0 %vm53_vm0, %v11248_v25 }
  0x33   :  { %10095 = vmatprep.mubr.msk.f32.mxu0 %vm53_vm0, %v11253_v26 }
  0x36   :  { %10096 = vmatmul.mubr.msk.f32.gmra.mxu0 %vm53_vm0, %v11262_v27 }
  0x37   :  { %10098 = vmatprep.mubr.msk.f32.mxu0 %vm53_vm0, %v11267_v28 }
  0x3a   :  { %10099 = vmatmul.mubr.msk.f32.gmra.mxu0 %vm53_vm0, %v11276_v29 }
  0x3b   :  { %10101 = vmatprep.mubr.msk.f32.mxu0 %vm53_vm0, %v11281_v30 }
  0x3e   :  { %10102 = vmatmul.mubr.msk.f32.gmra.mxu0 %vm53_vm0, %v43_v31 }
  0x3f   :  { %10104 = vmatprep.mubr.msk.f32.mxu0 %vm53_vm0, %v44_v32 }
  0x42   :  { %10105 = vmatmul.mubr.msk.f32.gmra.mxu0 %vm53_vm0, %v45_v33 }
  0x43   :  { %10109 = vmatprep.mubr.msk.f32.mxu0 %vm11053_vm1, %v13787_v34 }
  0xc6   :  { %v10061_v36 = vpop.f32.mrf.mxu0 }
  0xc7   :  { %v11311_v37 = vadd.f32 %v10061_v36, %v11308_v35 }
  0xc8   :  { %v216_v38 = vpop.f32.mrf.mxu0 }
  0xc9   :  { %453 = vrot.lane.b32.xlu0 %v11311_v37, %s11054_s28  ;;  %v11346_v53 = vadd.f32 %v11308_v35, %v216_v38 }
  0xca   :  { %v10064_v39 = vpop.f32.mrf.mxu0 }
  0xcb   :  { %v11316_v40 = vadd.f32 %v10064_v39, %v11308_v35 }
  0xcc   :  { %v226_v41 = vpop.f32.mrf.mxu0 }
  0xcd   :  { %v11319_v42 = vadd.f32 %v11308_v35, %v226_v41  ;;  %607 = vrot.lane.b32.xlu1 %v11316_v40, %s11054_s28 }
  0xce   :  { %v10067_v43 = vpop.f32.mrf.mxu0 }
  0xcf   :  { %530 = vrot.lane.b32.xlu0 %v11319_v42, %s11054_s28  ;;  %v11326_v45 = vadd.f32 %v10067_v43, %v11308_v35 }
  0xd0   :  { %v236_v44 = vpop.f32.mrf.mxu0 }
  0xd1   :  { %v11329_v46 = vadd.f32 %v11308_v35, %v236_v44 }
  0xd2   :  { %v10070_v47 = vpop.f32.mrf.mxu0 }
  0xd3   :  { %684 = vrot.lane.b32.xlu1 %v11329_v46, %s11054_s28  ;;  %761 = vrot.lane.b32.xlu0 %v11326_v45, %s11054_s28  ;;  %v11336_v49 = vadd.f32 %v10070_v47, %v11308_v35 }
  0xd4   :  { %v246_v48 = vpop.f32.mrf.mxu0 }
  0xd5   :  { %v11339_v50 = vadd.f32 %v11308_v35, %v246_v48 }
  0xd6   :  { %v10073_v51 = vpop.f32.mrf.mxu0 }
  0xd7   :  { %838 = vrot.lane.b32.xlu1 %v11339_v50, %s11054_s28  ;;  %915 = vrot.lane.b32.xlu0 %v11336_v49, %s11054_s28  ;;  %v11356_v57 = vadd.f32 %v10073_v51, %v11308_v35 }
  0xd8   :  { %v256_v52 = vpop.f32.mrf.mxu0 }
  0xd9   :  { %v11349_v54 = vadd.f32 %v11308_v35, %v256_v52 }
  0xda   :  { %v10076_v55 = vpop.f32.mrf.mxu0 }
  0xdb   :  { %992 = vrot.lane.b32.xlu0 %v11349_v54, %s11054_s28  ;;  %376 = vrot.lane.b32.xlu1 %v11346_v53, %s11054_s28  ;;  %v11366_v61 = vadd.f32 %v10076_v55, %v11308_v35 }
  0xdc   :  { %v266_v56 = vpop.f32.mrf.mxu0 }
  0xdd   :  { %v11359_v58 = vadd.f32 %v11308_v35, %v266_v56 }
  0xde   :  { %v10079_v59 = vpop.f32.mrf.mxu0 }
  0xdf   :  { %1146 = vrot.lane.b32.xlu0 %v11359_v58, %s11054_s28  ;;  %1069 = vrot.lane.b32.xlu1 %v11356_v57, %s11054_s28  ;;  %v11376_v1 = vadd.f32 %v10079_v59, %v11308_v35 }
  0xe0   :  { %v276_v60 = vpop.f32.mrf.mxu0 }
  0xe1   :  { %v11369_v62 = vadd.f32 %v11308_v35, %v276_v60 }
  0xe2   :  { %v10082_v63 = vpop.f32.mrf.mxu0 }
  0xe3   :  { %1300 = vrot.lane.b32.xlu0 %v11369_v62, %s11054_s28  ;;  %1223 = vrot.lane.b32.xlu1 %v11366_v61, %s11054_s28  ;;  %v11386_v36 = vadd.f32 %v10082_v63, %v11308_v35 }
  0xe4   :  { %v286_v0 = vpop.f32.mrf.mxu0 }
  0xe5   :  { %v11379_v31 = vadd.f32 %v11308_v35, %v286_v0 }
  0xe6   :  { %v10085_v32 = vpop.f32.mrf.mxu0 }
  0xe7   :  { %1454 = vrot.lane.b32.xlu0 %v11379_v31, %s11054_s28  ;;  %1377 = vrot.lane.b32.xlu1 %v11376_v1, %s11054_s28  ;;  %v11396_v43 = vadd.f32 %v10085_v32, %v11308_v35 }
  0xe8   :  { %v296_v33 = vpop.f32.mrf.mxu0 }
  0xe9   :  { %v11389_v38 = vadd.f32 %v11308_v35, %v296_v33 }
  0xea   :  { %v10088_v39 = vpop.f32.mrf.mxu0 }
  0xeb   :  { %1608 = vrot.lane.b32.xlu0 %v11389_v38, %s11054_s28  ;;  %1531 = vrot.lane.b32.xlu1 %v11386_v36, %s11054_s28  ;;  %v11406_v51 = vadd.f32 %v10088_v39, %v11308_v35 }
  0xec   :  { %v306_v41 = vpop.f32.mrf.mxu0 }
  0xed   :  { %v11399_v44 = vadd.f32 %v11308_v35, %v306_v41 }
  0xee   :  { %v10091_v47 = vpop.f32.mrf.mxu0 }
  0xef   :  { %1762 = vrot.lane.b32.xlu0 %v11399_v44, %s11054_s28  ;;  %1685 = vrot.lane.b32.xlu1 %v11396_v43, %s11054_s28  ;;  %v11416_v59 = vadd.f32 %v10091_v47, %v11308_v35 }
  0xf0   :  { %v316_v48 = vpop.f32.mrf.mxu0 }
  0xf1   :  { %v11409_v52 = vadd.f32 %v11308_v35, %v316_v48 }
  0xf2   :  { %v10094_v55 = vpop.f32.mrf.mxu0 }
  0xf3   :  { %1916 = vrot.lane.b32.xlu0 %v11409_v52, %s11054_s28  ;;  %1839 = vrot.lane.b32.xlu1 %v11406_v51, %s11054_s28  ;;  %v11422_v0 = vadd.f32 %v10094_v55, %v11308_v35 }
  0xf4   :  { %v326_v56 = vpop.f32.mrf.mxu0 }
  0xf5   :  { %v11419_v60 = vadd.f32 %v11308_v35, %v326_v56 }
  0xf6   :  { %v10097_v63 = vpop.f32.mrf.mxu0 }
  0xf7   :  { %2070 = vrot.lane.b32.xlu0 %v11419_v60, %s11054_s28  ;;  %1993 = vrot.lane.b32.xlu1 %v11416_v59, %s11054_s28  ;;  %v11432_v41 = vadd.f32 %v10097_v63, %v11308_v35 }
  0xf8   :  { %v336_v32 = vpop.f32.mrf.mxu0 }
  0xf9   :  { %v11429_v33 = vadd.f32 %v11308_v35, %v336_v32  ;;  %13822 = vst [vmem:[#allocation4_spill] sm:$0xff] %v11432_v41 }
  0xfa   :  { %v10100_v39 = vpop.f32.mrf.mxu0 }
  0xfb   :  { %2224 = vrot.lane.b32.xlu0 %v11429_v33, %s11054_s28  ;;  %2147 = vrot.lane.b32.xlu1 %v11422_v0, %s11054_s28  ;;  %v11442_v56 = vadd.f32 %v10100_v39, %v11308_v35 }
  0xfc   :  { %v346_v47 = vpop.f32.mrf.mxu0 }
  0xfd   :  { %v11439_v48 = vadd.f32 %v11308_v35, %v346_v47 }
  0xfe   :  { %v10103_v55 = vpop.f32.mrf.mxu0 }
  0xff   :  { %2378 = vrot.lane.b32.xlu0 %v11439_v48, %s11054_s28  ;;  %2301 = vrot.lane.b32.xlu1 %v11432_v41, %s11054_s28  ;;  %v11452_v30 = vadd.f32 %v10103_v55, %v11308_v35 }
 0x100   :  { %v356_v63 = vpop.f32.mrf.mxu0 }
 0x101   :  { %v11449_v32 = vadd.f32 %v11308_v35, %v356_v63 }
 0x102   :  { %v10106_v34 = vpop.f32.mrf.mxu0 }
 0x103   :  { %2532 = vrot.lane.b32.xlu0 %v11449_v32, %s11054_s28  ;;  %2455 = vrot.lane.b32.xlu1 %v11442_v56, %s11054_s28  ;;  %v11462_v41 = vadd.f32 %v10106_v34, %v11308_v35 }
 0x104   :  { %v366_v39 = vpop.f32.mrf.mxu0 }
 0x105   :  { %v11459_v47 = vadd.f32 %v11308_v35, %v366_v39 }
 0x107   :  { %2686 = vrot.lane.b32.xlu0 %v11459_v47, %s11054_s28  ;;  %2609 = vrot.lane.b32.xlu1 %v11452_v30, %s11054_s28 }
 0x10b   :  { %2763 = vrot.lane.b32.xlu1 %v11462_v41, %s11054_s28  ;;  %3268 = vrot.lane.b32.xlu0 %v11094_v3, %s11054_s28  ;;  %v13823_v3 = vmov 0.0  }
 0x10f   :  { %3192 = vrot.lane.b32.xlu1 %v11087_v2, %s11054_s28  ;;  %3344 = vrot.lane.b32.xlu0 %v11099_v4, %s11054_s28 }
 0x113   :  { %3420 = vrot.lane.b32.xlu1 %v11108_v5, %s11054_s28  ;;  %3496 = vrot.lane.b32.xlu0 %v11113_v6, %s11054_s28 }
 0x117   :  { %3648 = vrot.lane.b32.xlu1 %v11127_v8, %s11054_s28  ;;  %3572 = vrot.lane.b32.xlu0 %v11122_v7, %s11054_s28 }
 0x11b   :  { %3800 = vrot.lane.b32.xlu1 %v11141_v10, %s11054_s28  ;;  %3724 = vrot.lane.b32.xlu0 %v11136_v9, %s11054_s28 }
 0x11f   :  { %3952 = vrot.lane.b32.xlu1 %v11155_v12, %s11054_s28  ;;  %3876 = vrot.lane.b32.xlu0 %v11150_v11, %s11054_s28 }
 0x123   :  { %4104 = vrot.lane.b32.xlu1 %v11169_v14, %s11054_s28  ;;  %4028 = vrot.lane.b32.xlu0 %v11164_v13, %s11054_s28 }
 0x127   :  { %4256 = vrot.lane.b32.xlu1 %v11183_v16, %s11054_s28  ;;  %4180 = vrot.lane.b32.xlu0 %v11178_v15, %s11054_s28 }
 0x12b   :  { %4408 = vrot.lane.b32.xlu1 %v11197_v18, %s11054_s28  ;;  %4332 = vrot.lane.b32.xlu0 %v11192_v17, %s11054_s28 }
 0x12f   :  { %4560 = vrot.lane.b32.xlu1 %v11211_v20, %s11054_s28  ;;  %4484 = vrot.lane.b32.xlu0 %v11206_v19, %s11054_s28 }
 0x133   :  { %4636 = vrot.lane.b32.xlu1 %v11220_v21, %s11054_s28  ;;  %4712 = vrot.lane.b32.xlu0 %v11225_v22, %s11054_s28 }
 0x137   :  { %4788 = vrot.lane.b32.xlu1 %v11234_v23, %s11054_s28  ;;  %5168 = vrot.lane.b32.xlu0 %v11267_v28, %s11054_s28 }
 0x13b   :  { %v454_v2 = vpop.permute.xlu0 %453  ;;  %4864 = vrot.lane.b32.xlu1 %v11239_v24, %s11054_s28 }
 0x13c   :  { %10113 = vmatpush3.xpose.msk.msra.mxu1 %vm53_vm0, %v454_v2 }
 0x13d   :  { %10117 = vmatprep.subr.mxu1 %v13823_v3 }
 0x13f   :  { %10115 = vmatmul.mubr.msk.f32.vlgmr.msra.gmra.mxu1 %vm53_vm0, %v11311_v37  ;;  %4940 = vrot.lane.b32.xlu1 %v11248_v25, %s11054_s28  ;;  %v608_v4 = vpop.permute.xlu1 %607 }
 0x140   :  { %10119 = vmatprep.mubr.msk.f32.mxu1 %vm11053_vm1, %v13823_v3 }
 0x141   :  { %v531_v5 = vpop.permute.xlu0 %530 }
 0x142   :  { %10118 = vmatpush3.xpose.msk.msra.mxu1 %vm53_vm0, %v531_v5 }
 0x143   :  { %10122 = vmatprep.subr.mxu1 %v13823_v3  ;;  %5016 = vrot.lane.b32.xlu1 %v11253_v26, %s11054_s28 }
 0x145   :  { %v685_v6 = vpop.permute.xlu1 %684  ;;  %10120 = vmatmul.mubr.msk.f32.vlgmr.msra.gmra.mxu1 %vm53_vm0, %v11319_v42  ;;  %v762_v7 = vpop.permute.xlu0 %761 }
 0x146   :  { %10123 = vmatpush3.xpose.msk.msra.mxu1 %vm53_vm0, %v608_v4  ;;  %10124 = vmatprep.mubr.msk.f32.mxu1 %vm11053_vm1, %v13823_v3 }
 0x147   :  { %10127 = vmatprep.subr.mxu1 %v13823_v3  ;;  %5092 = vrot.lane.b32.xlu1 %v11262_v27, %s11054_s28 }
 0x149   :  { %v839_v8 = vpop.permute.xlu1 %838  ;;  %10125 = vmatmul.mubr.msk.f32.vlgmr.msra.gmra.mxu1 %vm53_vm0, %v11316_v40  ;;  %v916_v9 = vpop.permute.xlu0 %915  ;;  %v13824_v40 = vld [vmem:[#allocation4_spill] sm:$0xff] }
 0x14a   :  { %10128 = vmatpush3.xpose.msk.msra.mxu1 %vm53_vm0, %v685_v6  ;;  %10129 = vmatprep.mubr.msk.f32.mxu1 %vm11053_vm1, %v13823_v3 }
 0x14b   :  { %10132 = vmatprep.subr.mxu1 %v13823_v3  ;;  %5244 = vrot.lane.b32.xlu1 %v11276_v29, %s11054_s28 }
 0x14d   :  { %10130 = vmatmul.mubr.msk.f32.vlgmr.msra.gmra.mxu1 %vm53_vm0, %v11329_v46  ;;  %v993_v10 = vpop.permute.xlu0 %992  ;;  %v377_v11 = vpop.permute.xlu1 %376 }
 0x14e   :  { %10108 = vmatpush3.xpose.msk.msra.mxu0 %vm53_vm0, %v377_v11  ;;  %10133 = vmatpush3.xpose.msk.msra.mxu1 %vm53_vm0, %v762_v7 }
 0x14f   :  { %10134 = vmatprep.mubr.msk.f32.mxu1 %vm11053_vm1, %v13823_v3  ;;  %10137 = vmatprep.subr.mxu1 %v13823_v3 }
 0x150   :  { %10187 = vmatprep.subr.mxu0 %v13823_v3 }
 0x151   :  { %10135 = vmatmul.mubr.msk.f32.vlgmr.msra.gmra.mxu1 %vm53_vm0, %v11326_v45  ;;  %v1147_v12 = vpop.permute.xlu0 %1146  ;;  %10110 = vmatmul.mubr.msk.f32.vlgmr.msra.gmra.mxu0 %vm53_vm0, %v11346_v53  ;;  %v1070_v14 = vpop.permute.xlu1 %1069 }
 0x152   :  { %10138 = vmatpush3.xpose.msk.msra.mxu1 %vm53_vm0, %v839_v8  ;;  %10139 = vmatprep.mubr.msk.f32.mxu1 %vm11053_vm1, %v13823_v3 }
 0x153   :  { %10142 = vmatprep.subr.mxu1 %v13823_v3  ;;  %10189 = vmatprep.mubr.msk.f32.mxu0 %vm11053_vm1, %v13823_v3 }
 0x155   :  { %10140 = vmatmul.mubr.msk.f32.vlgmr.msra.gmra.mxu1 %vm53_vm0, %v11339_v50  ;;  %v1301_v13 = vpop.permute.xlu0 %1300  ;;  %v1224_v17 = vpop.permute.xlu1 %1223 }
 0x156   :  { %10143 = vmatpush3.xpose.msk.msra.mxu1 %vm53_vm0, %v916_v9  ;;  %10144 = vmatprep.mubr.msk.f32.mxu1 %vm11053_vm1, %v13823_v3 }
 0x157   :  { %10147 = vmatprep.subr.mxu1 %v13823_v3 }
 0x159   :  { %10145 = vmatmul.mubr.msk.f32.vlgmr.msra.gmra.mxu1 %vm53_vm0, %v11336_v49  ;;  %v1455_v15 = vpop.permute.xlu0 %1454  ;;  %v1378_v19 = vpop.permute.xlu1 %1377 }
 0x15a   :  { %10148 = vmatpush3.xpose.msk.msra.mxu1 %vm53_vm0, %v993_v10  ;;  %10149 = vmatprep.mubr.msk.f32.mxu1 %vm11053_vm1, %v13823_v3 }
 0x15b   :  { %10152 = vmatprep.subr.mxu1 %v13823_v3 }
 0x15d   :  { %10150 = vmatmul.mubr.msk.f32.vlgmr.msra.gmra.mxu1 %vm53_vm0, %v11349_v54  ;;  %v1609_v16 = vpop.permute.xlu0 %1608  ;;  %v1532_v22 = vpop.permute.xlu1 %1531 }
 0x15e   :  { %10153 = vmatpush3.xpose.msk.msra.mxu1 %vm53_vm0, %v1070_v14  ;;  %10188 = vmatpush3.xpose.msk.msra.mxu0 %vm53_vm0, %v1609_v16 }
 0x15f   :  { %10154 = vmatprep.mubr.msk.f32.mxu1 %vm11053_vm1, %v13823_v3  ;;  %10157 = vmatprep.subr.mxu1 %v13823_v3 }
 0x160   :  { %10197 = vmatprep.subr.mxu0 %v13823_v3 }
 0x161   :  { %v1763_v18 = vpop.permute.xlu0 %1762  ;;  %10155 = vmatmul.mubr.msk.f32.vlgmr.msra.gmra.mxu1 %vm53_vm0, %v11356_v57  ;;  %10190 = vmatmul.mubr.msk.f32.vlgmr.msra.gmra.mxu0 %vm53_vm0, %v11389_v38  ;;  %v1686_v24 = vpop.permute.xlu1 %1685 }
 0x162   :  { %10158 = vmatpush3.xpose.msk.msra.mxu1 %vm53_vm0, %v1147_v12  ;;  %10198 = vmatpush3.xpose.msk.msra.mxu0 %vm53_vm0, %v1763_v18 }
 0x163   :  { %10159 = vmatprep.mubr.msk.f32.mxu1 %vm11053_vm1, %v13823_v3  ;;  %10199 = vmatprep.mubr.msk.f32.mxu0 %vm11053_vm1, %v13823_v3 }
 0x164   :  { %10162 = vmatprep.subr.mxu1 %v13823_v3  ;;  %10207 = vmatprep.subr.mxu0 %v13823_v3 }
 0x165   :  { %v1917_v20 = vpop.permute.xlu0 %1916  ;;  %10160 = vmatmul.mubr.msk.f32.vlgmr.msra.gmra.mxu1 %vm53_vm0, %v11359_v58  ;;  %10200 = vmatmul.mubr.msk.f32.vlgmr.msra.gmra.mxu0 %vm53_vm0, %v11399_v44  ;;  %v1840_v27 = vpop.permute.xlu1 %1839 }
 0x166   :  { %10163 = vmatpush3.xpose.msk.msra.mxu1 %vm53_vm0, %v1224_v17  ;;  %10208 = vmatpush3.xpose.msk.msra.mxu0 %vm53_vm0, %v1917_v20 }
 0x167   :  { %10164 = vmatprep.mubr.msk.f32.mxu1 %vm11053_vm1, %v13823_v3  ;;  %10209 = vmatprep.mubr.msk.f32.mxu0 %vm11053_vm1, %v13823_v3 }
 0x168   :  { %10167 = vmatprep.subr.mxu1 %v13823_v3  ;;  %10217 = vmatprep.subr.mxu0 %v13823_v3 }
 0x169   :  { %v2071_v21 = vpop.permute.xlu0 %2070  ;;  %10165 = vmatmul.mubr.msk.f32.vlgmr.msra.gmra.mxu1 %vm53_vm0, %v11366_v61  ;;  %10210 = vmatmul.mubr.msk.f32.vlgmr.msra.gmra.mxu0 %vm53_vm0, %v11409_v52  ;;  %v1994_v29 = vpop.permute.xlu1 %1993 }
 0x16a   :  { %10168 = vmatpush3.xpose.msk.msra.mxu1 %vm53_vm0, %v1301_v13  ;;  %10218 = vmatpush3.xpose.msk.msra.mxu0 %vm53_vm0, %v2071_v21 }
 0x16b   :  { %10169 = vmatprep.mubr.msk.f32.mxu1 %vm11053_vm1, %v13823_v3  ;;  %10219 = vmatprep.mubr.msk.f32.mxu0 %vm11053_vm1, %v13823_v3 }
 0x16c   :  { %10172 = vmatprep.subr.mxu1 %v13823_v3  ;;  %10227 = vmatprep.subr.mxu0 %v13823_v3 }
 0x16d   :  { %v2225_v23 = vpop.permute.xlu0 %2224  ;;  %10170 = vmatmul.mubr.msk.f32.vlgmr.msra.gmra.mxu1 %vm53_vm0, %v11369_v62  ;;  %10220 = vmatmul.mubr.msk.f32.vlgmr.msra.gmra.mxu0 %vm53_vm0, %v11419_v60  ;;  %v2148_v34 = vpop.permute.xlu1 %2147 }
 0x16e   :  { %10173 = vmatpush3.xpose.msk.msra.mxu1 %vm53_vm0, %v1378_v19  ;;  %10228 = vmatpush3.xpose.msk.msra.mxu0 %vm53_vm0, %v2225_v23 }
 0x16f   :  { %10174 = vmatprep.mubr.msk.f32.mxu1 %vm11053_vm1, %v13823_v3  ;;  %10229 = vmatprep.mubr.msk.f32.mxu0 %vm11053_vm1, %v13823_v3 }
 0x170   :  { %10177 = vmatprep.subr.mxu1 %v13823_v3  ;;  %10237 = vmatprep.subr.mxu0 %v13823_v3 }
 0x171   :  { %v2379_v25 = vpop.permute.xlu0 %2378  ;;  %10175 = vmatmul.mubr.msk.f32.vlgmr.msra.gmra.mxu1 %vm53_vm0, %v11376_v1  ;;  %10230 = vmatmul.mubr.msk.f32.vlgmr.msra.gmra.mxu0 %vm53_vm0, %v11429_v33  ;;  %v2302_v35 = vpop.permute.xlu1 %2301 }
 0x172   :  { %10178 = vmatpush3.xpose.msk.msra.mxu1 %vm53_vm0, %v1455_v15  ;;  %10238 = vmatpush3.xpose.msk.msra.mxu0 %vm53_vm0, %v2379_v25 }
 0x173   :  { %10179 = vmatprep.mubr.msk.f32.mxu1 %vm11053_vm1, %v13823_v3  ;;  %10239 = vmatprep.mubr.msk.f32.mxu0 %vm11053_vm1, %v13823_v3 }
 0x174   :  { %10182 = vmatprep.subr.mxu1 %v13823_v3  ;;  %10247 = vmatprep.subr.mxu0 %v13823_v3 }
 0x175   :  { %v2533_v26 = vpop.permute.xlu0 %2532  ;;  %10180 = vmatmul.mubr.msk.f32.vlgmr.msra.gmra.mxu1 %vm53_vm0, %v11379_v31  ;;  %10240 = vmatmul.mubr.msk.f32.vlgmr.msra.gmra.mxu0 %vm53_vm0, %v11439_v48  ;;  %v2456_v37 = vpop.permute.xlu1 %2455 }
 0x176   :  { %10183 = vmatpush3.xpose.msk.msra.mxu1 %vm53_vm0, %v1532_v22  ;;  %10248 = vmatpush3.xpose.msk.msra.mxu0 %vm53_vm0, %v2533_v26 }
 0x177   :  { %10184 = vmatprep.mubr.msk.f32.mxu1 %vm11053_vm1, %v13823_v3  ;;  %10249 = vmatprep.mubr.msk.f32.mxu0 %vm11053_vm1, %v13823_v3 }
 0x178   :  { %10192 = vmatprep.subr.mxu1 %v13823_v3  ;;  %10257 = vmatprep.subr.mxu0 %v13823_v3 }
 0x179   :  { %v2687_v28 = vpop.permute.xlu0 %2686  ;;  %10185 = vmatmul.mubr.msk.f32.vlgmr.msra.gmra.mxu1 %vm53_vm0, %v11386_v36  ;;  %10250 = vmatmul.mubr.msk.f32.vlgmr.msra.gmra.mxu0 %vm53_vm0, %v11449_v32  ;;  %v2610_v42 = vpop.permute.xlu1 %2609 }
 0x17a   :  { %10193 = vmatpush3.xpose.msk.msra.mxu1 %vm53_vm0, %v1686_v24  ;;  %10258 = vmatpush3.xpose.msk.msra.mxu0 %vm53_vm0, %v2687_v28 }
 0x17b   :  { %10194 = vmatprep.mubr.msk.f32.mxu1 %vm11053_vm1, %v13823_v3  ;;  %10259 = vmatprep.mubr.msk.f32.mxu0 %vm11053_vm1, %v13823_v3 }
 0x17c   :  { %10202 = vmatprep.subr.mxu1 %v13823_v3  ;;  %10267 = vmatprep.subr.mxu0 %v13823_v3 }
 0x17d   :  { %10195 = vmatmul.mubr.msk.f32.vlgmr.msra.gmra.mxu1 %vm53_vm0, %v11396_v43  ;;  %10260 = vmatmul.mubr.msk.f32.vlgmr.msra.gmra.mxu0 %vm53_vm0, %v11459_v47  ;;  %v2764_v45 = vpop.permute.xlu1 %2763  ;;  %v3269_v49 = vpop.permute.xlu0 %3268 }
 0x17e   :  { %10203 = vmatpush3.xpose.msk.msra.mxu1 %vm53_vm0, %v1840_v27  ;;  %10204 = vmatprep.mubr.msk.f32.mxu1 %vm11053_vm1, %v13823_v3 }
 0x17f   :  { %10212 = vmatprep.subr.mxu1 %v13823_v3  ;;  %10269 = vmatprep.mubr.msk.f32.mxu0 %vm11053_vm1, %v13823_v3 }
 0x181   :  { %10205 = vmatmul.mubr.msk.f32.vlgmr.msra.gmra.mxu1 %vm53_vm0, %v11406_v51  ;;  %v3193_v46 = vpop.permute.xlu1 %3192 }
 0x182   :  { %10213 = vmatpush3.xpose.msk.msra.mxu1 %vm53_vm0, %v1994_v29  ;;  %10214 = vmatprep.mubr.msk.f32.mxu1 %vm11053_vm1, %v13823_v3 }
 0x183   :  { %10222 = vmatprep.subr.mxu1 %v13823_v3  ;;  %10268 = vmatpush3.msra.mxu0 %v3193_v46 }
 0x184   :  { %10277 = vmatprep.subr.mxu0 %v13823_v3 }
 0x185   :  { %10215 = vmatmul.mubr.msk.f32.vlgmr.msra.gmra.mxu1 %vm53_vm0, %v11416_v59  ;;  %v11792_v28 = vpop.permute.xlu1 %3420 }
 0x186   :  { %10223 = vmatpush3.xpose.msk.msra.mxu1 %vm53_vm0, %v2148_v34  ;;  %10224 = vmatprep.mubr.msk.f32.mxu1 %vm11053_vm1, %v13823_v3 }
 0x187   :  { %10232 = vmatprep.subr.mxu1 %v13823_v3 }
 0x189   :  { %10225 = vmatmul.mubr.msk.f32.vlgmr.msra.gmra.mxu1 %vm53_vm0, %v11422_v0  ;;  %v11800_v46 = vpop.permute.xlu1 %3648 }
 0x18a   :  { %10233 = vmatpush3.xpose.msk.msra.mxu1 %vm53_vm0, %v2302_v35  ;;  %10234 = vmatprep.mubr.msk.f32.mxu1 %vm11053_vm1, %v13823_v3 }
 0x18b   :  { %10242 = vmatprep.subr.mxu1 %v13823_v3 }
 0x18d   :  { %10235 = vmatmul.mubr.msk.f32.vlgmr.msra.gmra.mxu1 %vm53_vm0, %v13824_v40 }
 0x18e   :  { %10243 = vmatpush3.xpose.msk.msra.mxu1 %vm53_vm0, %v2456_v37  ;;  %10244 = vmatprep.mubr.msk.f32.mxu1 %vm11053_vm1, %v13823_v3 }
 0x18f   :  { %10252 = vmatprep.subr.mxu1 %v13823_v3 }
 0x191   :  { %10245 = vmatmul.mubr.msk.f32.vlgmr.msra.gmra.mxu1 %vm53_vm0, %v11442_v56 }
 0x192   :  { %10253 = vmatpush3.xpose.msk.msra.mxu1 %vm53_vm0, %v2610_v42  ;;  %10254 = vmatprep.mubr.msk.f32.mxu1 %vm11053_vm1, %v13823_v3 }
 0x193   :  { %10262 = vmatprep.subr.mxu1 %v13823_v3 }
 0x195   :  { %10255 = vmatmul.mubr.msk.f32.vlgmr.msra.gmra.mxu1 %vm53_vm0, %v11452_v30 }
 0x196   :  { %10263 = vmatpush3.xpose.msk.msra.mxu1 %vm53_vm0, %v2764_v45  ;;  %10264 = vmatprep.mubr.msk.f32.mxu1 %vm11053_vm1, %v13823_v3 }
 0x197   :  { %10272 = vmatprep.subr.mxu1 %v13823_v3 }
 0x199   :  { %10265 = vmatmul.mubr.msk.f32.vlgmr.msra.gmra.mxu1 %vm53_vm0, %v11462_v41 }
 0x19a   :  { %10274 = vmatprep.mubr.msk.f32.mxu1 %vm11053_vm1, %v13823_v3  ;;  %10273 = vmatpush3.msra.mxu1 %v3269_v49 }
 0x19b   :  { %10282 = vmatprep.subr.mxu1 %v13823_v3 }
 0x1ff   :  { %v11720_v30 = vpop.f32.mrf.mxu1 }
 0x200   :  { %v2843_v50 = vsel %vm2839_vm2, %v11720_v30, -inf }
 0x201   :  { %v10116_v53 = vpop.f32.mrf.mxu1  ;;  %2844 = vmax.xlane.f32.xlu1 %v2843_v50 }
 0x205   :  { %v11724_v54 = vpop.f32.mrf.mxu1 }
 0x206   :  { %v2846_v60 = vsel %vm2839_vm2, %v11724_v54, -inf }
 0x207   :  { %v10121_v57 = vpop.f32.mrf.mxu1 }
 0x209   :  { %v11726_v58 = vpop.f32.mrf.mxu1 }
 0x20a   :  { %v2849_v41 = vsel %vm2839_vm2, %v11726_v58, -inf }
 0x20b   :  { %v10126_v61 = vpop.f32.mrf.mxu1 }
 0x20d   :  { %v11728_v62 = vpop.f32.mrf.mxu1 }
 0x20e   :  { %v2852_v1 = vsel %vm2839_vm2, %v11728_v62, -inf }
 0x20f   :  { %v10131_v31 = vpop.f32.mrf.mxu1  ;;  %2853 = vmax.xlane.f32.xlu1 %v2852_v1 }
 0x211   :  { %v11732_v36 = vpop.f32.mrf.mxu0  ;;  %v11734_v38 = vpop.f32.mrf.mxu1 }
 0x212   :  { %v2840_v43 = vsel %vm2839_vm2, %v11732_v36, -inf  ;;  %v2855_v63 = vsel %vm2839_vm2, %v11734_v38, -inf }
 0x213   :  { %v10136_v44 = vpop.f32.mrf.mxu1  ;;  %2841 = vmax.xlane.f32.xlu0 %v2840_v43  ;;  %v10111_v51 = vpop.f32.mrf.mxu0 }
 0x215   :  { %v11738_v52 = vpop.f32.mrf.mxu1 }
 0x216   :  { %v2858_v59 = vsel %vm2839_vm2, %v11738_v52, -inf }
 0x217   :  { %v10141_v0 = vpop.f32.mrf.mxu1  ;;  %2859 = vmax.xlane.f32.xlu1 %v2858_v59  ;;  %2847 = vmax.xlane.f32.xlu0 %v2846_v60  ;;  %v11818_v59 = vpop.permute.xlu1 %3800 }
 0x219   :  { %v11744_v33 = vpop.f32.mrf.mxu1 }
 0x21a   :  { %v2861_v2 = vsel %vm2839_vm2, %v11744_v33, -inf }
 0x21b   :  { %v10146_v48 = vpop.f32.mrf.mxu1  ;;  %2850 = vmax.xlane.f32.xlu0 %v2849_v41 }
 0x21d   :  { %v11748_v55 = vpop.f32.mrf.mxu1 }
 0x21e   :  { %v2864_v56 = vsel %vm2839_vm2, %v11748_v55, -inf }
 0x21f   :  { %v10151_v32 = vpop.f32.mrf.mxu1  ;;  %2865 = vmax.xlane.f32.xlu1 %v2864_v56  ;;  %2856 = vmax.xlane.f32.xlu0 %v2855_v63 }
 0x220   :  { %v11826_v32 = vpop.permute.xlu1 %3952 }
 0x221   :  { %v11754_v39 = vpop.f32.mrf.mxu1  ;;  %v11756_v47 = vpop.f32.mrf.mxu0 }
 0x222   :  { %v2888_v4 = vsel %vm2839_vm2, %v11756_v47, -inf  ;;  %v2867_v9 = vsel %vm2839_vm2, %v11754_v39, -inf }
 0x223   :  { %2862 = vmax.xlane.f32.xlu0 %v2861_v2  ;;  %2889 = vmax.xlane.f32.xlu1 %v2888_v4  ;;  %v10156_v5 = vpop.f32.mrf.mxu1  ;;  %v10191_v6 = vpop.f32.mrf.mxu0 }
 0x225   :  { %v11762_v7 = vpop.f32.mrf.mxu1  ;;  %v11764_v8 = vpop.f32.mrf.mxu0 }
 0x226   :  { %v2870_v10 = vsel %vm2839_vm2, %v11762_v7, -inf  ;;  %v2894_v15 = vsel %vm2839_vm2, %v11764_v8, -inf }
 0x227   :  { %v10201_v11 = vpop.f32.mrf.mxu0  ;;  %2868 = vmax.xlane.f32.xlu0 %v2867_v9  ;;  %2871 = vmax.xlane.f32.xlu1 %v2870_v10  ;;  %v10161_v12 = vpop.f32.mrf.mxu1 }
 0x228   :  { %v11840_v12 = vpop.permute.xlu1 %4104 }
 0x229   :  { %v11770_v13 = vpop.f32.mrf.mxu1  ;;  %v11772_v14 = vpop.f32.mrf.mxu0 }
 0x22a   :  { %v2873_v16 = vsel %vm2839_vm2, %v11770_v13, -inf  ;;  %v2900_v21 = vsel %vm2839_vm2, %v11772_v14, -inf }
 0x22b   :  { %v10211_v17 = vpop.f32.mrf.mxu0  ;;  %2895 = vmax.xlane.f32.xlu1 %v2894_v15  ;;  %2874 = vmax.xlane.f32.xlu0 %v2873_v16  ;;  %v10166_v18 = vpop.f32.mrf.mxu1 }
 0x22d   :  { %v11778_v19 = vpop.f32.mrf.mxu1  ;;  %v11780_v20 = vpop.f32.mrf.mxu0 }
 0x22e   :  { %v2876_v26 = vsel %vm2839_vm2, %v11778_v19, -inf  ;;  %v2906_v40 = vsel %vm2839_vm2, %v11780_v20, -inf }
 0x22f   :  { %v10221_v22 = vpop.f32.mrf.mxu0  ;;  %2901 = vmax.xlane.f32.xlu1 %v2900_v21  ;;  %v10171_v23 = vpop.f32.mrf.mxu1 }
 0x230   :  { %v11846_v21 = vpop.permute.xlu1 %4256 }
 0x231   :  { %v11784_v24 = vpop.f32.mrf.mxu1  ;;  %v11786_v25 = vpop.f32.mrf.mxu0 }
 0x232   :  { %v2879_v27 = vsel %vm2839_vm2, %v11784_v24, -inf  ;;  %v2912_v53 = vsel %vm2839_vm2, %v11786_v25, -inf }
 0x233   :  { %v10231_v29 = vpop.f32.mrf.mxu0  ;;  %2877 = vmax.xlane.f32.xlu1 %v2876_v26  ;;  %2880 = vmax.xlane.f32.xlu0 %v2879_v27  ;;  %v10176_v34 = vpop.f32.mrf.mxu1 }
 0x234   :  { %v11856_v34 = vpop.permute.xlu1 %4408 }
 0x235   :  { %v11794_v35 = vpop.f32.mrf.mxu1  ;;  %v11796_v37 = vpop.f32.mrf.mxu0 }
 0x236   :  { %v2882_v44 = vsel %vm2839_vm2, %v11794_v35, -inf  ;;  %v2918_v48 = vsel %vm2839_vm2, %v11796_v37, -inf }
 0x237   :  { %v10241_v42 = vpop.f32.mrf.mxu0  ;;  %2907 = vmax.xlane.f32.xlu1 %v2906_v40  ;;  %v10181_v45 = vpop.f32.mrf.mxu1 }
 0x239   :  { %v11802_v49 = vpop.f32.mrf.mxu1  ;;  %v11804_v50 = vpop.f32.mrf.mxu0 }
 0x23a   :  { %v2885_v57 = vsel %vm2839_vm2, %v11802_v49, -inf  ;;  %v2924_v4 = vsel %vm2839_vm2, %v11804_v50, -inf }
 0x23b   :  { %v10251_v61 = vpop.f32.mrf.mxu0  ;;  %2913 = vmax.xlane.f32.xlu1 %v2912_v53  ;;  %2886 = vmax.xlane.f32.xlu0 %v2885_v57  ;;  %v10186_v1 = vpop.f32.mrf.mxu1 }
 0x23c   :  { %v11862_v57 = vpop.permute.xlu1 %4560  ;;  %v11864_v61 = vpop.permute.xlu0 %3344 }
 0x23d   :  { %v11810_v31 = vpop.f32.mrf.mxu1  ;;  %v11812_v43 = vpop.f32.mrf.mxu0 }
 0x23e   :  { %v2891_v51 = vsel %vm2839_vm2, %v11810_v31, -inf  ;;  %v2930_v10 = vsel %vm2839_vm2, %v11812_v43, -inf }
 0x23f   :  { %v10261_v60 = vpop.f32.mrf.mxu0  ;;  %2883 = vmax.xlane.f32.xlu1 %v2882_v44  ;;  %2892 = vmax.xlane.f32.xlu0 %v2891_v51  ;;  %v10196_v0 = vpop.f32.mrf.mxu1 }
 0x240   :  { %v11866_v1 = vpop.permute.xlu1 %4636  ;;  %v11868_v44 = vpop.permute.xlu0 %3496 }
 0x241   :  { %v11820_v41 = vpop.f32.mrf.mxu1  ;;  %13825 = vst [vmem:[#allocation4_spill] sm:$0xff] %v11866_v1 }
 0x242   :  { %v2897_v56 = vsel %vm2839_vm2, %v11820_v41, -inf }
 0x243   :  { %2919 = vmax.xlane.f32.xlu1 %v2918_v48  ;;  %2898 = vmax.xlane.f32.xlu0 %v2897_v56  ;;  %v10206_v63 = vpop.f32.mrf.mxu1  ;;  %v13828_v56 = vld [vmem:[#allocation3_spill] sm:$0xff] }
 0x244   :  { %v11870_v51 = vpop.permute.xlu1 %4788  ;;  %v11872_v60 = vpop.permute.xlu0 %3572 }
 0x245   :  { %v11828_v2 = vpop.f32.mrf.mxu1  ;;  %13826 = vst [vmem:[#allocation5_spill] sm:$0xff] %v11870_v51 }
 0x246   :  { %v2903_v5 = vsel %vm2839_vm2, %v11828_v2, -inf }
 0x247   :  { %2925 = vmax.xlane.f32.xlu1 %v2924_v4  ;;  %2904 = vmax.xlane.f32.xlu0 %v2903_v5  ;;  %v10216_v6 = vpop.f32.mrf.mxu1 }
 0x248   :  { %v11874_v0 = vpop.permute.xlu1 %4864  ;;  %v11876_v48 = vpop.permute.xlu0 %3724 }
 0x249   :  { %v11834_v9 = vpop.f32.mrf.mxu1  ;;  %13827 = vst [vmem:[#allocation6_spill] sm:$0xff] %v11874_v0 }
 0x24a   :  { %v2909_v11 = vsel %vm2839_vm2, %v11834_v9, -inf }
 0x24b   :  { %2931 = vmax.xlane.f32.xlu1 %v2930_v10  ;;  %2910 = vmax.xlane.f32.xlu0 %v2909_v11  ;;  %v10226_v15 = vpop.f32.mrf.mxu1 }
 0x24c   :  { %v11880_v63 = vpop.permute.xlu1 %4940  ;;  %v11882_v4 = vpop.permute.xlu0 %3876 }
 0x24d   :  { %v11842_v16 = vpop.f32.mrf.mxu1  ;;  %13829 = vst [vmem:[#allocation3_spill] sm:$0xff] %v11880_v63 }
 0x24e   :  { %v2915_v17 = vsel %vm2839_vm2, %v11842_v16, -inf }
 0x24f   :  { %2916 = vmax.xlane.f32.xlu0 %v2915_v17  ;;  %v10236_v18 = vpop.f32.mrf.mxu1 }
 0x250   :  { %v11884_v5 = vpop.permute.xlu1 %5016  ;;  %v11886_v6 = vpop.permute.xlu0 %4028 }
 0x251   :  { %v11848_v22 = vpop.f32.mrf.mxu1  ;;  %13830 = vst [vmem:[#allocation7_spill] sm:$0xff] %v11884_v5 }
 0x252   :  { %v2921_v23 = vsel %vm2839_vm2, %v11848_v22, -inf }
 0x253   :  { %2922 = vmax.xlane.f32.xlu0 %v2921_v23  ;;  %v10246_v26 = vpop.f32.mrf.mxu1 }
 0x254   :  { %v11888_v10 = vpop.permute.xlu1 %5092  ;;  %v11890_v11 = vpop.permute.xlu0 %4180 }
 0x255   :  { %v11852_v27 = vpop.f32.mrf.mxu1  ;;  %13831 = vst [vmem:[#allocation8_spill] sm:$0xff] %v11888_v10 }
 0x256   :  { %v2927_v29 = vsel %vm2839_vm2, %v11852_v27, -inf }
 0x257   :  { %2928 = vmax.xlane.f32.xlu0 %v2927_v29  ;;  %v10256_v40 = vpop.f32.mrf.mxu1 }
 0x258   :  { %v11892_v15 = vpop.permute.xlu1 %5244  ;;  %v11894_v17 = vpop.permute.xlu0 %4332 }
 0x259   :  { %v11858_v42 = vpop.f32.mrf.mxu1  ;;  %13832 = vst [vmem:[#allocation9_spill] sm:$0xff] %v11892_v15 }
 0x25a   :  { %v2933_v45 = vsel %vm2839_vm2, %v11858_v42, -inf }
 0x25b   :  { %2934 = vmax.xlane.f32.xlu0 %v2933_v45  ;;  %v10266_v53 = vpop.f32.mrf.mxu1 }
 0x25c   :  { %v11897_v26 = vpop.permute.xlu0 %4484 }
 0x25d   :  { %13833 = vst [vmem:[#allocation10_spill] sm:$0xff] %v11897_v26 }
 0x260   :  { %v11899_v40 = vpop.permute.xlu0 %4712 }
 0x261   :  { %13834 = vst [vmem:[#allocation11_spill] sm:$0xff] %v11899_v40 }
 0x264   :  { %v11901_v45 = vpop.permute.xlu0 %5168 }
 0x265   :  { %13835 = vst [vmem:[#allocation12_spill] sm:$0xff] %v11901_v45 }
 0x271   :  { %5320 = vrot.lane.b32.xlu0 %v13828_v56, %s11054_s28 }
 0x28a   :  { %v2845_v18 = vpop.xlane.xlu1 %2844 }
 0x28b   :  { %v2937_v23 = vsub.f32 %v11720_v30, %v2845_v18 }
 0x28d   :  { %v2970_v29 = vmul.f32 1.442695, %v2937_v23 }
 0x28f   :  { %10721 = vpow2.f32 %v2970_v29 }
 0x298   :  { %v2854_v53 = vpop.xlane.xlu1 %2853 }
 0x299   :  { %v2940_v51 = vsub.f32 %v11728_v62, %v2854_v53 }
 0x29b   :  { %v2976_v5 = vmul.f32 1.442695, %v2940_v51 }
 0x29c   :  { %v11903_v56 = vpop.eup %10721  ;;  %v2842_v10 = vpop.xlane.xlu0 %2841 }
 0x29d   :  { %v2936_v63 = vsub.f32 %v11732_v36, %v2842_v10  ;;  %v3035_v15 = vsel %vm2839_vm2, %v11903_v56, 0.0 }
 0x29e   :  { %3036 = vadd.xlane.f32.xlu0 %v3035_v15 }
 0x29f   :  { %v2968_v30 = vmul.f32 1.442695, %v2936_v63 }
 0x2a0   :  { %v2848_v18 = vpop.xlane.xlu0 %2847  ;;  %v2860_v23 = vpop.xlane.xlu1 %2859 }
 0x2a1   :  { %10723 = vpow2.f32 %v2968_v30  ;;  %v2938_v29 = vsub.f32 %v11724_v54, %v2848_v18  ;;  %v2942_v1 = vsub.f32 %v11738_v52, %v2860_v23 }
 0x2a3   :  { %v2972_v45 = vmul.f32 1.442695, %v2938_v29  ;;  %v2980_v10 = vmul.f32 1.442695, %v2942_v1 }
 0x2a4   :  { %v2851_v0 = vpop.xlane.xlu0 %2850 }
 0x2a5   :  { %10725 = vpow2.f32 %v2972_v45  ;;  %v2939_v36 = vsub.f32 %v11726_v58, %v2851_v0 }
 0x2a6   :  { %10727 = vpow2.f32 %v2976_v5 }
 0x2a7   :  { %v2974_v26 = vmul.f32 1.442695, %v2939_v36 }
 0x2a8   :  { %v2857_v40 = vpop.xlane.xlu0 %2856  ;;  %v2866_v62 = vpop.xlane.xlu1 %2865 }
 0x2a9   :  { %10729 = vpow2.f32 %v2974_v26  ;;  %v2941_v63 = vsub.f32 %v11734_v38, %v2857_v40  ;;  %v2944_v15 = vsub.f32 %v11748_v55, %v2866_v62 }
 0x2aa   :  { %10731 = vpow2.f32 %v2980_v10 }
 0x2ab   :  { %v2978_v54 = vmul.f32 1.442695, %v2941_v63  ;;  %v2984_v51 = vmul.f32 1.442695, %v2944_v15 }
 0x2ac   :  { %v2863_v53 = vpop.xlane.xlu0 %2862  ;;  %v2890_v30 = vpop.xlane.xlu1 %2889 }
 0x2ad   :  { %10733 = vpow2.f32 %v2978_v54  ;;  %v2943_v52 = vsub.f32 %v11744_v33, %v2863_v53  ;;  %v2952_v58 = vsub.f32 %v11756_v47, %v2890_v30 }
 0x2ae   :  { %v11915_v45 = vpop.eup %10723  ;;  %10735 = vpow2.f32 %v2984_v51 }
 0x2af   :  { %v2982_v1 = vmul.f32 1.442695, %v2943_v52  ;;  %v3032_v0 = vsel %vm2839_vm2, %v11915_v45, 0.0  ;;  %v3000_v33 = vmul.f32 1.442695, %v2952_v58 }
 0x2b0   :  { %v2869_v38 = vpop.xlane.xlu0 %2868  ;;  %3033 = vadd.xlane.f32.xlu1 %v3032_v0  ;;  %v2872_v55 = vpop.xlane.xlu1 %2871 }
 0x2b1   :  { %10737 = vpow2.f32 %v2982_v1  ;;  %v2945_v5 = vsub.f32 %v11754_v39, %v2869_v38  ;;  %v2946_v26 = vsub.f32 %v11762_v7, %v2872_v55 }
 0x2b2   :  { %v11922_v40 = vpop.eup %10725 }
 0x2b3   :  { %v11924_v18 = vpop.eup %10727  ;;  %v2986_v23 = vmul.f32 1.442695, %v2945_v5  ;;  %v2988_v47 = vmul.f32 1.442695, %v2946_v26  ;;  %v3038_v29 = vsel %vm2839_vm2, %v11922_v40, 0.0 }
 0x2b4   :  { %v2875_v36 = vpop.xlane.xlu0 %2874  ;;  %3039 = vadd.xlane.f32.xlu1 %v3038_v29  ;;  %v2896_v10 = vpop.xlane.xlu1 %2895  ;;  %v3044_v7 = vsel %vm2839_vm2, %v11924_v18, 0.0 }
 0x2b5   :  { %10739 = vpow2.f32 %v2986_v23  ;;  %v2947_v62 = vsub.f32 %v11770_v13, %v2875_v36  ;;  %v2954_v39 = vsub.f32 %v11764_v8, %v2896_v10 }
 0x2b6   :  { %v11930_v63 = vpop.eup %10729  ;;  %10741 = vpow2.f32 %v2988_v47 }
 0x2b7   :  { %10743 = vpow2.f32 %v3000_v33  ;;  %v2990_v15 = vmul.f32 1.442695, %v2947_v62  ;;  %v3004_v54 = vmul.f32 1.442695, %v2954_v39  ;;  %v3041_v51 = vsel %vm2839_vm2, %v11930_v63, 0.0  ;;  %v11936_v53 = vpop.eup %10731 }
 0x2b8   :  { %3042 = vadd.xlane.f32.xlu0 %v3041_v51  ;;  %3045 = vadd.xlane.f32.xlu1 %v3044_v7  ;;  %v2902_v30 = vpop.xlane.xlu1 %2901  ;;  %v3050_v1 = vsel %vm2839_vm2, %v11936_v53, 0.0 }
 0x2b9   :  { %v2956_v13 = vsub.f32 %v11772_v14, %v2902_v30  ;;  %10745 = vpow2.f32 %v3004_v54 }
 0x2ba   :  { %v11939_v8 = vpop.eup %10733  ;;  %10747 = vpow2.f32 %v2990_v15 }
 0x2bb   :  { %v3008_v52 = vmul.f32 1.442695, %v2956_v13  ;;  %v3047_v58 = vsel %vm2839_vm2, %v11939_v8, 0.0  ;;  %v11945_v0 = vpop.eup %10735 }
 0x2bc   :  { %v2881_v38 = vpop.xlane.xlu0 %2880  ;;  %3048 = vadd.xlane.f32.xlu0 %v3047_v58  ;;  %3051 = vadd.xlane.f32.xlu1 %v3050_v1  ;;  %v2878_v55 = vpop.xlane.xlu1 %2877  ;;  %v3056_v29 = vsel %vm2839_vm2, %v11945_v0, 0.0 }
 0x2bd   :  { %10749 = vpow2.f32 %v3008_v52  ;;  %v2949_v14 = vsub.f32 %v11784_v24, %v2881_v38  ;;  %v2948_v5 = vsub.f32 %v11778_v19, %v2878_v55 }
 0x2be   :  { %v11949_v26 = vpop.eup %10737 }
 0x2bf   :  { %v2994_v33 = vmul.f32 1.442695, %v2949_v14  ;;  %v2992_v23 = vmul.f32 1.442695, %v2948_v5  ;;  %v3053_v47 = vsel %vm2839_vm2, %v11949_v26, 0.0 }
 0x2c0   :  { %3054 = vadd.xlane.f32.xlu0 %v3053_v47  ;;  %3057 = vadd.xlane.f32.xlu1 %v3056_v29  ;;  %v2908_v36 = vpop.xlane.xlu1 %2907 }
 0x2c1   :  { %10751 = vpow2.f32 %v2994_v33  ;;  %v2958_v10 = vsub.f32 %v11780_v20, %v2908_v36 }
 0x2c2   :  { %v11956_v62 = vpop.eup %10739  ;;  %10753 = vpow2.f32 %v2992_v23 }
 0x2c3   :  { %v11958_v19 = vpop.eup %10741  ;;  %v3012_v24 = vmul.f32 1.442695, %v2958_v10  ;;  %v3059_v39 = vsel %vm2839_vm2, %v11956_v62, 0.0 }
 0x2c4   :  { %v11962_v7 = vpop.eup %10743  ;;  %v2887_v15 = vpop.xlane.xlu0 %2886  ;;  %3060 = vadd.xlane.f32.xlu0 %v3059_v39  ;;  %v3062_v54 = vsel %vm2839_vm2, %v11958_v19, 0.0 }
 0x2c5   :  { %v2914_v51 = vpop.xlane.xlu1 %2913  ;;  %10755 = vpow2.f32 %v3012_v24  ;;  %3063 = vadd.xlane.f32.xlu1 %v3062_v54  ;;  %v3080_v52 = vsel %vm2839_vm2, %v11962_v7, 0.0  ;;  %v2951_v33 = vsub.f32 %v11802_v49, %v2887_v15 }
 0x2c6   :  { %v2960_v20 = vsub.f32 %v11786_v25, %v2914_v51  ;;  %v11967_v30 = vpop.eup %10745 }
 0x2c7   :  { %v11971_v58 = vpop.eup %10747  ;;  %v3086_v38 = vsel %vm2839_vm2, %v11967_v30, 0.0  ;;  %v2998_v15 = vmul.f32 1.442695, %v2951_v33 }
 0x2c8   :  { %v3016_v13 = vmul.f32 1.442695, %v2960_v20  ;;  %v2893_v1 = vpop.xlane.xlu0 %2892  ;;  %3081 = vadd.xlane.f32.xlu0 %v3080_v52  ;;  %v3065_v47 = vsel %vm2839_vm2, %v11971_v58, 0.0 }
 0x2c9   :  { %v2884_v55 = vpop.xlane.xlu1 %2883  ;;  %v2953_v14 = vsub.f32 %v11810_v31, %v2893_v1  ;;  %3087 = vadd.xlane.f32.xlu1 %v3086_v38 }
 0x2ca   :  { %v2950_v5 = vsub.f32 %v11794_v35, %v2884_v55  ;;  %v11977_v25 = vpop.eup %10749  ;;  %10757 = vpow2.f32 %v3016_v13 }
 0x2cb   :  { %v3092_v29 = vsel %vm2839_vm2, %v11977_v25, 0.0  ;;  %v3002_v36 = vmul.f32 1.442695, %v2953_v14 }
 0x2cc   :  { %v2996_v23 = vmul.f32 1.442695, %v2950_v5  ;;  %v2899_v10 = vpop.xlane.xlu0 %2898  ;;  %3066 = vadd.xlane.f32.xlu0 %v3065_v47 }
 0x2cd   :  { %v2920_v24 = vpop.xlane.xlu1 %2919  ;;  %v2955_v31 = vsub.f32 %v11820_v41, %v2899_v10  ;;  %3093 = vadd.xlane.f32.xlu1 %v3092_v29 }
 0x2ce   :  { %v2962_v35 = vsub.f32 %v11796_v37, %v2920_v24  ;;  %v11986_v39 = vpop.eup %10751  ;;  %10759 = vpow2.f32 %v2996_v23 }
 0x2cf   :  { %v11988_v49 = vpop.eup %10753  ;;  %v3071_v51 = vsel %vm2839_vm2, %v11986_v39, 0.0  ;;  %10761 = vpow2.f32 %v3002_v36  ;;  %v3006_v20 = vmul.f32 1.442695, %v2955_v31 }
 0x2d0   :  { %v3020_v54 = vmul.f32 1.442695, %v2962_v35  ;;  %v2905_v13 = vpop.xlane.xlu0 %2904  ;;  %3072 = vadd.xlane.f32.xlu0 %v3071_v51  ;;  %v3068_v41 = vsel %vm2839_vm2, %v11988_v49, 0.0 }
 0x2d1   :  { %v2957_v52 = vsub.f32 %v11828_v2, %v2905_v13  ;;  %3069 = vadd.xlane.f32.xlu1 %v3068_v41 }
 0x2d2   :  { %v11995_v37 = vpop.eup %10755  ;;  %10763 = vpow2.f32 %v3020_v54 }
 0x2d3   :  { %10765 = vpow2.f32 %v2998_v15  ;;  %v3098_v1 = vsel %vm2839_vm2, %v11995_v37, 0.0  ;;  %v3010_v38 = vmul.f32 1.442695, %v2957_v52 }
 0x2d4   :  { %10767 = vpow2.f32 %v3006_v20  ;;  %v2911_v55 = vpop.xlane.xlu0 %2910 }
 0x2d5   :  { %v2959_v14 = vsub.f32 %v11834_v9, %v2911_v55  ;;  %3099 = vadd.xlane.f32.xlu1 %v3098_v1  ;;  %10769 = vpow2.f32 %v3010_v38 }
 0x2d7   :  { %v12000_v5 = vpop.eup %10757  ;;  %v3014_v33 = vmul.f32 1.442695, %v2959_v14 }
 0x2d8   :  { %v2917_v23 = vpop.xlane.xlu0 %2916  ;;  %v3104_v2 = vsel %vm2839_vm2, %v12000_v5, 0.0 }
 0x2d9   :  { %v2961_v47 = vsub.f32 %v11842_v16, %v2917_v23  ;;  %3105 = vadd.xlane.f32.xlu1 %v3104_v2  ;;  %10771 = vpow2.f32 %v3014_v33 }
 0x2db   :  { %v12005_v29 = vpop.eup %10759  ;;  %v3018_v36 = vmul.f32 1.442695, %v2961_v47 }
 0x2dc   :  { %v2923_v10 = vpop.xlane.xlu0 %2922  ;;  %v3074_v9 = vsel %vm2839_vm2, %v12005_v29, 0.0  ;;  %v12009_v24 = vpop.eup %10761 }
 0x2dd   :  { %v2963_v31 = vsub.f32 %v11848_v22, %v2923_v10  ;;  %3075 = vadd.xlane.f32.xlu0 %v3074_v9  ;;  %10773 = vpow2.f32 %v3018_v36  ;;  %v3083_v51 = vsel %vm2839_vm2, %v12009_v24, 0.0 }
 0x2df   :  { %v12012_v35 = vpop.eup %10763  ;;  %v3022_v16 = vmul.f32 1.442695, %v2963_v31  ;;  %v11041_v31 = vld [vmem:[%s13784_s0 + $0xe8] sm:$0xff] }
 0x2e0   :  { %v12014_v15 = vpop.eup %10765  ;;  %v2929_v54 = vpop.xlane.xlu0 %2928  ;;  %v3110_v20 = vsel %vm2839_vm2, %v12012_v35, 0.0 }
 0x2e1   :  { %v12020_v13 = vpop.eup %10767  ;;  %v2965_v41 = vsub.f32 %v11852_v27, %v2929_v54  ;;  %3084 = vadd.xlane.f32.xlu0 %v3083_v51  ;;  %3111 = vadd.xlane.f32.xlu1 %v3110_v20  ;;  %10775 = vpow2.f32 %v3022_v16  ;;  %v3077_v38 = vsel %vm2839_vm2, %v12014_v15, 0.0  ;;  %v2926_v51 = vpop.xlane.xlu1 %2925 }
 0x2e2   :  { %v3089_v1 = vsel %vm2839_vm2, %v12020_v13, 0.0  ;;  %v12027_v55 = vpop.eup %10769 }
 0x2e3   :  { %v3026_v22 = vmul.f32 1.442695, %v2965_v41  ;;  %v3095_v27 = vsel %vm2839_vm2, %v12027_v55, 0.0  ;;  %v2964_v41 = vsub.f32 %v11804_v50, %v2926_v51 }
 0x2e4   :  { %v2935_v52 = vpop.xlane.xlu0 %2934 }
 0x2e5   :  { %v2967_v14 = vsub.f32 %v11858_v42, %v2935_v52  ;;  %3090 = vadd.xlane.f32.xlu0 %v3089_v1  ;;  %3078 = vadd.xlane.f32.xlu1 %v3077_v38  ;;  %10777 = vpow2.f32 %v3026_v22  ;;  %v2932_v22 = vpop.xlane.xlu1 %2931  ;;  %v3024_v52 = vmul.f32 1.442695, %v2964_v41 }
 0x2e6   :  { %v12032_v23 = vpop.eup %10771  ;;  %v2966_v1 = vsub.f32 %v11812_v43, %v2932_v22 }
 0x2e7   :  { %v3030_v33 = vmul.f32 1.442695, %v2967_v14  ;;  %v3101_v2 = vsel %vm2839_vm2, %v12032_v23, 0.0  ;;  %v11042_v14 = vld [vmem:[%s13784_s0 + $0xf0] sm:$0xff] }
 0x2e8   :  { %v3028_v38 = vmul.f32 1.442695, %v2966_v1  ;;  %v12070_v43 = vpop.permute.xlu0 %5320 }
 0x2e9   :  { %3096 = vadd.xlane.f32.xlu0 %v3095_v27  ;;  %10779 = vpow2.f32 %v3030_v33 }
 0x2ea   :  { %v12036_v47 = vpop.eup %10773  ;;  %10781 = vpow2.f32 %v3024_v52 }
 0x2eb   :  { %v3107_v42 = vsel %vm2839_vm2, %v12036_v47, 0.0  ;;  %10783 = vpow2.f32 %v3028_v38 }
 0x2ed   :  { %3102 = vadd.xlane.f32.xlu0 %v3101_v2 }
 0x2ee   :  { %v12040_v36 = vpop.eup %10775 }
 0x2ef   :  { %v3113_v10 = vsel %vm2839_vm2, %v12040_v36, 0.0 }
 0x2f1   :  { %3108 = vadd.xlane.f32.xlu0 %v3107_v42 }
 0x2f2   :  { %v12044_v9 = vpop.eup %10777 }
 0x2f3   :  { %v3119_v16 = vsel %vm2839_vm2, %v12044_v9, 0.0 }
 0x2f5   :  { %3114 = vadd.xlane.f32.xlu0 %v3113_v10  ;;  %v11043_v10 = vld [vmem:[%s13784_s0 + $0xf8] sm:$0xff] }
 0x2f6   :  { %5396 = vrot.lane.b32.xlu1 %v11041_v31, %s11054_s28  ;;  %v12052_v54 = vpop.eup %10779 }
 0x2f7   :  { %v3125_v20 = vsel %vm2839_vm2, %v12052_v54, 0.0  ;;  %v12062_v33 = vpop.eup %10781 }
 0x2f8   :  { %v3116_v27 = vsel %vm2839_vm2, %v12062_v33, 0.0  ;;  %v12066_v2 = vpop.eup %10783 }
 0x2f9   :  { %3120 = vadd.xlane.f32.xlu0 %v3119_v16  ;;  %v3122_v50 = vsel %vm2839_vm2, %v12066_v2, 0.0 }
 0x2fd   :  { %3126 = vadd.xlane.f32.xlu0 %v3125_v20 }
 0x313   :  { %5472 = vrot.lane.b32.xlu0 %v11042_v14, %s11054_s28 }
 0x31a   :  { %3117 = vadd.xlane.f32.xlu1 %v3116_v27 }
 0x31e   :  { %3123 = vadd.xlane.f32.xlu1 %v3122_v50 }
 0x327   :  { %v3037_v42 = vpop.xlane.xlu0 %3036 }
 0x328   :  { %10785 = vrcp.f32 %v3037_v42 }
 0x32f   :  { %5548 = vrot.lane.b32.xlu1 %v11043_v10, %s11054_s28  ;;  %s11056_s28 = smov 32  }
 0x335   :  { %v10786_v31 = vpop.eup %10785 }
 0x336   :  { %v3131_v16 = vmul.f32 %v10786_v31, %v11903_v56 }
 0x338   :  { %10275 = vmatmul.mubr.msk.f32.vlgmr.msra.gmra.mxu1 %vm2839_vm2, %v3131_v16 }
 0x339   :  { %10283 = vmatpush3.msra.mxu1 %v11792_v28  ;;  %v3034_v51 = vpop.xlane.xlu1 %3033  ;;  %10284 = vmatprep.mubr.msk.f32.mxu1 %vm11053_vm1, %v13823_v3 }
 0x33a   :  { %10787 = vrcp.f32 %v3034_v51  ;;  %10292 = vmatprep.subr.mxu1 %v13823_v3 }
 0x33d   :  { %v3040_v20 = vpop.xlane.xlu1 %3039 }
 0x33e   :  { %10789 = vrcp.f32 %v3040_v20 }
 0x341   :  { %v3043_v41 = vpop.xlane.xlu0 %3042  ;;  %v3046_v22 = vpop.xlane.xlu1 %3045 }
 0x342   :  { %10791 = vrcp.f32 %v3043_v41 }
 0x343   :  { %10793 = vrcp.f32 %v3046_v22 }
 0x345   :  { %v3049_v52 = vpop.xlane.xlu0 %3048  ;;  %v3052_v1 = vpop.xlane.xlu1 %3051 }
 0x346   :  { %10795 = vrcp.f32 %v3049_v52 }
 0x347   :  { %v10788_v56 = vpop.eup %10787  ;;  %10797 = vrcp.f32 %v3052_v1 }
 0x348   :  { %v3129_v28 = vmul.f32 %v10788_v56, %v11915_v45 }
 0x349   :  { %v3055_v38 = vpop.xlane.xlu0 %3054  ;;  %v3058_v14 = vpop.xlane.xlu1 %3057 }
 0x34a   :  { %10799 = vrcp.f32 %v3055_v38  ;;  %10270 = vmatmul.mubr.msk.f32.vlgmr.msra.gmra.mxu0 %vm2839_vm2, %v3129_v28 }
 0x34b   :  { %v10790_v27 = vpop.eup %10789  ;;  %10801 = vrcp.f32 %v3058_v14  ;;  %10278 = vmatpush3.msra.mxu0 %v11864_v61  ;;  %10279 = vmatprep.mubr.msk.f32.mxu0 %vm11053_vm1, %v13823_v3 }
 0x34c   :  { %10287 = vmatprep.subr.mxu0 %v13823_v3  ;;  %v3133_v50 = vmul.f32 %v10790_v27, %v11922_v40 }
 0x34d   :  { %v3061_v42 = vpop.xlane.xlu0 %3060 }
 0x34e   :  { %10803 = vrcp.f32 %v3061_v42  ;;  %v3064_v10 = vpop.xlane.xlu1 %3063  ;;  %10280 = vmatmul.mubr.msk.f32.vlgmr.msra.gmra.mxu0 %vm2839_vm2, %v3133_v50 }
 0x34f   :  { %v10792_v45 = vpop.eup %10791  ;;  %10805 = vrcp.f32 %v3064_v10  ;;  %10288 = vmatpush3.msra.mxu0 %v11868_v44  ;;  %10289 = vmatprep.mubr.msk.f32.mxu0 %vm11053_vm1, %v13823_v3 }
 0x350   :  { %v10794_v61 = vpop.eup %10793  ;;  %10297 = vmatprep.subr.mxu0 %v13823_v3  ;;  %v3135_v31 = vmul.f32 %v10792_v45, %v11930_v63 }
 0x351   :  { %v12095_v16 = vpop.xlane.xlu0 %3081  ;;  %v3137_v40 = vmul.f32 %v10794_v61, %v11924_v18 }
 0x352   :  { %v12098_v51 = vpop.xlane.xlu1 %3087  ;;  %10285 = vmatmul.mubr.msk.f32.vlgmr.msra.gmra.mxu1 %vm2839_vm2, %v3135_v31 }
 0x353   :  { %v10796_v20 = vpop.eup %10795  ;;  %10290 = vmatmul.mubr.msk.f32.vlgmr.msra.gmra.mxu0 %vm2839_vm2, %v3137_v40  ;;  %10293 = vmatpush3.msra.mxu1 %v11872_v60  ;;  %v13837_v40 = vld [vmem:[#allocation10_spill] sm:$0xff] }
 0x354   :  { %v10798_v44 = vpop.eup %10797  ;;  %10298 = vmatpush3.msra.mxu0 %v11800_v46  ;;  %10294 = vmatprep.mubr.msk.f32.mxu1 %vm11053_vm1, %v13823_v3  ;;  %v3139_v63 = vmul.f32 %v10796_v20, %v11939_v8 }
 0x355   :  { %10302 = vmatprep.subr.mxu1 %v13823_v3  ;;  %v3067_v18 = vpop.xlane.xlu0 %3066  ;;  %10299 = vmatprep.mubr.msk.f32.mxu0 %vm11053_vm1, %v13823_v3  ;;  %v3141_v41 = vmul.f32 %v10798_v44, %v11936_v53  ;;  %v13838_v44 = vld [vmem:[#allocation6_spill] sm:$0xff] }
 0x356   :  { %10807 = vrcp.f32 %v3067_v18  ;;  %10307 = vmatprep.subr.mxu0 %v13823_v3  ;;  %v12112_v60 = vpop.xlane.xlu1 %3093  ;;  %10295 = vmatmul.mubr.msk.f32.vlgmr.msra.gmra.mxu1 %vm2839_vm2, %v3139_v63  ;;  %v13839_v63 = vld [vmem:[#allocation4_spill] sm:$0xff] }
 0x357   :  { %v10800_v46 = vpop.eup %10799  ;;  %10300 = vmatmul.mubr.msk.f32.vlgmr.msra.gmra.mxu0 %vm2839_vm2, %v3141_v41  ;;  %10303 = vmatpush3.msra.mxu1 %v11876_v48 }
 0x358   :  { %v10802_v8 = vpop.eup %10801  ;;  %10308 = vmatpush3.msra.mxu0 %v11818_v59  ;;  %10304 = vmatprep.mubr.msk.f32.mxu1 %vm11053_vm1, %v13823_v3  ;;  %v3143_v53 = vmul.f32 %v10800_v46, %v11949_v26  ;;  %v13840_v46 = vld [vmem:[#allocation7_spill] sm:$0xff] }
 0x359   :  { %10312 = vmatprep.subr.mxu1 %v13823_v3  ;;  %v3073_v22 = vpop.xlane.xlu0 %3072  ;;  %10309 = vmatprep.mubr.msk.f32.mxu0 %vm11053_vm1, %v13823_v3  ;;  %v3145_v52 = vmul.f32 %v10802_v8, %v11945_v0 }
 0x35a   :  { %10809 = vrcp.f32 %v3073_v22  ;;  %10317 = vmatprep.subr.mxu0 %v13823_v3  ;;  %v3070_v48 = vpop.xlane.xlu1 %3069  ;;  %10305 = vmatmul.mubr.msk.f32.vlgmr.msra.gmra.mxu1 %vm2839_vm2, %v3143_v53 }
 0x35b   :  { %v10804_v59 = vpop.eup %10803  ;;  %10811 = vrcp.f32 %v3070_v48  ;;  %10310 = vmatmul.mubr.msk.f32.vlgmr.msra.gmra.mxu0 %vm2839_vm2, %v3145_v52  ;;  %10313 = vmatpush3.msra.mxu1 %v11882_v4  ;;  %v13842_v52 = vld [vmem:[#allocation12_spill] sm:$0xff]  ;;  %v13843_v48 = vld [vmem:[#allocation3_spill] sm:$0xff] }
 0x35c   :  { %v10806_v26 = vpop.eup %10805  ;;  %10318 = vmatpush3.msra.mxu0 %v11826_v32  ;;  %10314 = vmatprep.mubr.msk.f32.mxu1 %vm11053_vm1, %v13823_v3  ;;  %v3147_v0 = vmul.f32 %v10804_v59, %v11956_v62 }
 0x35d   :  { %10319 = vmatprep.mubr.msk.f32.mxu0 %vm11053_vm1, %v13823_v3  ;;  %10322 = vmatprep.subr.mxu1 %v13823_v3  ;;  %v3149_v1 = vmul.f32 %v10806_v26, %v11958_v19  ;;  %v13844_v26 = vld [vmem:[#allocation8_spill] sm:$0xff] }
 0x35e   :  { %10327 = vmatprep.subr.mxu0 %v13823_v3  ;;  %10315 = vmatmul.mubr.msk.f32.vlgmr.msra.gmra.mxu1 %vm2839_vm2, %v3147_v0  ;;  %v3100_v32 = vpop.xlane.xlu1 %3099  ;;  %v13845_v0 = vld [vmem:[#allocation9_spill] sm:$0xff] }
 0x35f   :  { %10320 = vmatmul.mubr.msk.f32.vlgmr.msra.gmra.mxu0 %vm2839_vm2, %v3149_v1  ;;  %10323 = vmatpush3.msra.mxu1 %v11886_v6 }
 0x360   :  { %10328 = vmatpush3.msra.mxu0 %v11840_v12  ;;  %10324 = vmatprep.mubr.msk.f32.mxu1 %vm11053_vm1, %v13823_v3 }
 0x361   :  { %10332 = vmatprep.subr.mxu1 %v13823_v3  ;;  %10329 = vmatprep.mubr.msk.f32.mxu0 %vm11053_vm1, %v13823_v3 }
 0x362   :  { %10337 = vmatprep.subr.mxu0 %v13823_v3  ;;  %v3106_v19 = vpop.xlane.xlu1 %3105 }
 0x363   :  { %v10808_v4 = vpop.eup %10807 }
 0x364   :  { %v3151_v62 = vmul.f32 %v10808_v4, %v11971_v58 }
 0x366   :  { %v3076_v56 = vpop.xlane.xlu0 %3075  ;;  %10325 = vmatmul.mubr.msk.f32.vlgmr.msra.gmra.mxu1 %vm2839_vm2, %v3151_v62 }
 0x367   :  { %v10810_v6 = vpop.eup %10809  ;;  %10813 = vrcp.f32 %v3076_v56  ;;  %10333 = vmatpush3.msra.mxu1 %v11890_v11  ;;  %10334 = vmatprep.mubr.msk.f32.mxu1 %vm11053_vm1, %v13823_v3 }
 0x368   :  { %v10812_v12 = vpop.eup %10811  ;;  %10342 = vmatprep.subr.mxu1 %v13823_v3  ;;  %v3155_v28 = vmul.f32 %v10810_v6, %v11986_v39  ;;  %10815 = vrcp.f32 %v12095_v16  ;;  %v13836_v16 = vld [vmem:[#allocation11_spill] sm:$0xff] }
 0x369   :  { %v3153_v58 = vmul.f32 %v10812_v12, %v11988_v49  ;;  %10817 = vrcp.f32 %v12098_v51 }
 0x36a   :  { %v3085_v38 = vpop.xlane.xlu0 %3084  ;;  %v3112_v14 = vpop.xlane.xlu1 %3111  ;;  %10335 = vmatmul.mubr.msk.f32.vlgmr.msra.gmra.mxu1 %vm2839_vm2, %v3155_v28 }
 0x36b   :  { %10330 = vmatmul.mubr.msk.f32.vlgmr.msra.gmra.mxu0 %vm2839_vm2, %v3153_v58  ;;  %10343 = vmatpush3.msra.mxu1 %v11894_v17  ;;  %v5624_v58 = vld [vmem:[%s13783_s1 + $0x10] sm:$0xf] }
 0x36c   :  { %10338 = vmatpush3.msra.mxu0 %v11846_v21  ;;  %10339 = vmatprep.mubr.msk.f32.mxu0 %vm11053_vm1, %v13823_v3 }
 0x36d   :  { %10347 = vmatprep.subr.mxu0 %v13823_v3  ;;  %10344 = vmatprep.mubr.msk.f32.mxu1 %vm11053_vm1, %v13823_v3 }
 0x36e   :  { %v3091_v11 = vpop.xlane.xlu0 %3090  ;;  %v3079_v39 = vpop.xlane.xlu1 %3078  ;;  %10352 = vmatprep.subr.mxu1 %v13823_v3 }
 0x36f   :  { %10819 = vrcp.f32 %v3079_v39 }
 0x370   :  { %10821 = vrcp.f32 %v12112_v60 }
 0x371   :  { %10823 = vrcp.f32 %v3085_v38 }
 0x372   :  { %v3097_v17 = vpop.xlane.xlu0 %3096  ;;  %10825 = vrcp.f32 %v3100_v32 }
 0x373   :  { %10827 = vrcp.f32 %v3091_v11  ;;  %v12270_v11 = vld [vmem:[%s13783_s1 + $0x40] sm:$0xff] }
 0x374   :  { %v10814_v21 = vpop.eup %10813  ;;  %10829 = vrcp.f32 %v3106_v19 }
 0x375   :  { %v3157_v49 = vmul.f32 %v10814_v21, %v12005_v29  ;;  %v10816_v27 = vpop.eup %10815  ;;  %10831 = vrcp.f32 %v3097_v17  ;;  %v12284_v21 = vld [vmem:[%s13783_s1 + $0x30] sm:$0xff] }
 0x376   :  { %v3103_v50 = vpop.xlane.xlu0 %3102  ;;  %v3161_v42 = vmul.f32 %v10816_v27, %v11962_v7  ;;  %v10818_v10 = vpop.eup %10817  ;;  %10833 = vrcp.f32 %v3112_v14  ;;  %v12292_v27 = vld [vmem:[%s13783_s1 + $0x28] sm:$0xff] }
 0x377   :  { %10340 = vmatmul.mubr.msk.f32.vlgmr.msra.gmra.mxu0 %vm2839_vm2, %v3157_v49  ;;  %10835 = vrcp.f32 %v3103_v50 }
 0x378   :  { %10348 = vmatpush3.msra.mxu0 %v11856_v34  ;;  %10349 = vmatprep.mubr.msk.f32.mxu0 %vm11053_vm1, %v13823_v3  ;;  %v3165_v34 = vmul.f32 %v10818_v10, %v11967_v30 }
 0x379   :  { %10357 = vmatprep.subr.mxu0 %v13823_v3 }
 0x37a   :  { %v3109_v45 = vpop.xlane.xlu0 %3108 }
 0x37b   :  { %10350 = vmatmul.mubr.msk.f32.vlgmr.msra.gmra.mxu0 %vm2839_vm2, %v3161_v42  ;;  %10837 = vrcp.f32 %v3109_v45 }
 0x37c   :  { %10358 = vmatpush3.msra.mxu0 %v11862_v57  ;;  %10359 = vmatprep.mubr.msk.f32.mxu0 %vm11053_vm1, %v13823_v3  ;;  %v10820_v29 = vpop.eup %10819 }
 0x37d   :  { %10367 = vmatprep.subr.mxu0 %v13823_v3  ;;  %v10822_v61 = vpop.eup %10821  ;;  %v3159_v7 = vmul.f32 %v10820_v29, %v12014_v15 }
 0x37e   :  { %v10824_v31 = vpop.eup %10823  ;;  %v3115_v57 = vpop.xlane.xlu0 %3114  ;;  %v3169_v51 = vmul.f32 %v10822_v61, %v11977_v25 }
 0x37f   :  { %10360 = vmatmul.mubr.msk.f32.vlgmr.msra.gmra.mxu0 %vm2839_vm2, %v3165_v34  ;;  %10345 = vmatmul.mubr.msk.f32.vlgmr.msra.gmra.mxu1 %vm2839_vm2, %v3159_v7  ;;  %v10826_v30 = vpop.eup %10825  ;;  %v3163_v15 = vmul.f32 %v10824_v31, %v12009_v24  ;;  %10839 = vrcp.f32 %v3115_v57 }
 0x380   :  { %10368 = vmatpush3.msra.mxu0 %v13836_v16  ;;  %10353 = vmatpush3.msra.mxu1 %v13837_v40  ;;  %v10828_v20 = vpop.eup %10827  ;;  %v3173_v25 = vmul.f32 %v10826_v30, %v11995_v37  ;;  %v13841_v37 = vld [vmem:[#allocation5_spill] sm:$0xff] }
 0x381   :  { %10354 = vmatprep.mubr.msk.f32.mxu1 %vm11053_vm1, %v13823_v3  ;;  %10362 = vmatprep.subr.mxu1 %v13823_v3  ;;  %v10830_v18 = vpop.eup %10829  ;;  %v3167_v24 = vmul.f32 %v10828_v20, %v12020_v13 }
 0x382   :  { %10369 = vmatprep.mubr.msk.f32.mxu0 %vm11053_vm1, %v13823_v3  ;;  %10377 = vmatprep.subr.mxu0 %v13823_v3  ;;  %v10832_v41 = vpop.eup %10831  ;;  %v3121_v60 = vpop.xlane.xlu0 %3120  ;;  %v3177_v8 = vmul.f32 %v10830_v18, %v12000_v5 }
 0x383   :  { %10370 = vmatmul.mubr.msk.f32.vlgmr.msra.gmra.mxu0 %vm2839_vm2, %v3169_v51  ;;  %10355 = vmatmul.mubr.msk.f32.vlgmr.msra.gmra.mxu1 %vm2839_vm2, %v3163_v15  ;;  %v10834_v53 = vpop.eup %10833  ;;  %10841 = vrcp.f32 %v3121_v60  ;;  %v3171_v13 = vmul.f32 %v10832_v41, %v12027_v55 }
 0x384   :  { %10378 = vmatpush3.msra.mxu0 %v13838_v44  ;;  %10363 = vmatpush3.msra.mxu1 %v13839_v63  ;;  %v10836_v22 = vpop.eup %10835  ;;  %v3181_v5 = vmul.f32 %v10834_v53, %v12012_v35 }
 0x385   :  { %10364 = vmatprep.mubr.msk.f32.mxu1 %vm11053_vm1, %v13823_v3  ;;  %10372 = vmatprep.subr.mxu1 %v13823_v3  ;;  %v3175_v55 = vmul.f32 %v10836_v22, %v12032_v23 }
 0x386   :  { %10379 = vmatprep.mubr.msk.f32.mxu0 %vm11053_vm1, %v13823_v3  ;;  %10387 = vmatprep.subr.mxu0 %v13823_v3  ;;  %v3127_v32 = vpop.xlane.xlu0 %3126 }
 0x387   :  { %10380 = vmatmul.mubr.msk.f32.vlgmr.msra.gmra.mxu0 %vm2839_vm2, %v3173_v25  ;;  %10365 = vmatmul.mubr.msk.f32.vlgmr.msra.gmra.mxu1 %vm2839_vm2, %v3167_v24  ;;  %10843 = vrcp.f32 %v3127_v32 }
 0x388   :  { %10388 = vmatpush3.msra.mxu0 %v13840_v46  ;;  %10373 = vmatpush3.msra.mxu1 %v13841_v37  ;;  %v10838_v59 = vpop.eup %10837 }
 0x389   :  { %10374 = vmatprep.mubr.msk.f32.mxu1 %vm11053_vm1, %v13823_v3  ;;  %10382 = vmatprep.subr.mxu1 %v13823_v3  ;;  %v3179_v35 = vmul.f32 %v10838_v59, %v12036_v47  ;;  %v5397_v47 = vpop.permute.xlu1 %5396 }
 0x38a   :  { %10389 = vmatprep.mubr.msk.f32.mxu0 %vm11053_vm1, %v13823_v3  ;;  %10397 = vmatprep.subr.mxu0 %v13823_v3  ;;  %v5473_v28 = vpop.permute.xlu0 %5472 }
 0x38b   :  { %10390 = vmatmul.mubr.msk.f32.vlgmr.msra.gmra.mxu0 %vm2839_vm2, %v3177_v8  ;;  %10375 = vmatmul.mubr.msk.f32.vlgmr.msra.gmra.mxu1 %vm2839_vm2, %v3171_v13 }
 0x38c   :  { %10398 = vmatpush3.msra.mxu0 %v13842_v52  ;;  %10383 = vmatpush3.msra.mxu1 %v13843_v48  ;;  %v10840_v23 = vpop.eup %10839 }
 0x38d   :  { %10384 = vmatprep.mubr.msk.f32.mxu1 %vm11053_vm1, %v13823_v3  ;;  %10392 = vmatprep.subr.mxu1 %v13823_v3 }
 0x38e   :  { %10399 = vmatprep.mubr.msk.f32.mxu0 %vm11053_vm1, %v13823_v3  ;;  %10407 = vmatprep.subr.mxu0 %v13823_v3 }
 0x38f   :  { %10400 = vmatmul.mubr.msk.f32.vlgmr.msra.gmra.mxu0 %vm2839_vm2, %v3181_v5  ;;  %10385 = vmatmul.mubr.msk.f32.vlgmr.msra.gmra.mxu1 %vm2839_vm2, %v3175_v55 }
 0x390   :  { %10408 = vmatpush3.msra.mxu0 %v12070_v43  ;;  %10393 = vmatpush3.msra.mxu1 %v13844_v26  ;;  %v3183_v43 = vmul.f32 %v10840_v23, %v12040_v36  ;;  %v10842_v1 = vpop.eup %10841 }
 0x391   :  { %10394 = vmatprep.mubr.msk.f32.mxu1 %vm11053_vm1, %v13823_v3  ;;  %10402 = vmatprep.subr.mxu1 %v13823_v3  ;;  %v3187_v4 = vmul.f32 %v10842_v1, %v12044_v9 }
 0x392   :  { %10409 = vmatprep.mubr.msk.f32.mxu0 %vm11053_vm1, %v13823_v3  ;;  %10417 = vmatprep.subr.mxu0 %v13823_v3 }
 0x393   :  { %10395 = vmatmul.mubr.msk.f32.vlgmr.msra.gmra.mxu1 %vm2839_vm2, %v3179_v35 }
 0x394   :  { %10403 = vmatpush3.msra.mxu1 %v13845_v0  ;;  %10404 = vmatprep.mubr.msk.f32.mxu1 %vm11053_vm1, %v13823_v3  ;;  %v10844_v19 = vpop.eup %10843 }
 0x395   :  { %10412 = vmatprep.subr.mxu1 %v13823_v3  ;;  %v3191_v6 = vmul.f32 %v10844_v19, %v12052_v54  ;;  %v5956_v19 = vld [vmem:[%s13783_s1 + $0x18] sm:$0xff] }
 0x397   :  { %10405 = vmatmul.mubr.msk.f32.vlgmr.msra.gmra.mxu1 %vm2839_vm2, %v3183_v43 }
 0x398   :  { %10413 = vmatpush3.msra.mxu1 %v5397_v47  ;;  %10414 = vmatprep.mubr.msk.f32.mxu1 %vm11053_vm1, %v13823_v3 }
 0x399   :  { %10422 = vmatprep.subr.mxu1 %v13823_v3 }
 0x39b   :  { %10415 = vmatmul.mubr.msk.f32.vlgmr.msra.gmra.mxu1 %vm2839_vm2, %v3187_v4 }
 0x39c   :  { %10424 = vmatprep.mubr.msk.f32.mxu1 %vm11053_vm1, %v13823_v3 }
 0x3a3   :  { %v3118_v36 = vpop.xlane.xlu1 %3117 }
 0x3a4   :  { %10845 = vrcp.f32 %v3118_v36 }
 0x3a7   :  { %v3124_v62 = vpop.xlane.xlu1 %3123 }
 0x3a8   :  { %10847 = vrcp.f32 %v3124_v62  ;;  %v5957_v62 = vld [vmem:[%s13783_s1 + $0x20] sm:$0xff] }
 0x3ab   :  { %v5549_v56 = vpop.permute.xlu1 %5548 }
 0x3ac   :  { %10423 = vmatpush3.msra.mxu1 %v5549_v56 }
 0x3ad   :  { %10425 = vmatmul.mubr.msk.f32.vlgmr.msra.gmra.mxu1 %vm2839_vm2, %v3191_v6  ;;  %10477 = vmatprep.subr.mxu1 %v5957_v62 }
 0x3ae   :  { %10478 = vmatpush3.msra.mxu1 %v5957_v62 }
 0x3af   :  { %10479 = vmatprep.subr.mxu1 %v5956_v19 }
 0x3b0   :  { %10480 = vmatpush3.msra.mxu1 %v5956_v19 }
 0x3b1   :  { %v10846_v9 = vpop.eup %10845  ;;  %10543 = vmatprep.subr.mxu1 %v12270_v11 }
 0x3b2   :  { %v3185_v12 = vmul.f32 %v10846_v9, %v12062_v33 }
 0x3b4   :  { %10410 = vmatmul.mubr.msk.f32.vlgmr.msra.gmra.mxu0 %vm2839_vm2, %v3185_v12 }
 0x3b5   :  { %v10848_v38 = vpop.eup %10847  ;;  %10418 = vmatpush3.msra.mxu0 %v5473_v28  ;;  %10419 = vmatprep.mubr.msk.f32.mxu0 %vm11053_vm1, %v13823_v3 }
 0x3b6   :  { %v3189_v54 = vmul.f32 %v10848_v38, %v12066_v2  ;;  %10427 = vmatprep.subr.msk.mxu0 %vm5727_vm3, %v5624_v58  ;;  %v12277_v2 = vld [vmem:[%s13783_s1 + $0x38] sm:$0xff] }
 0x3b8   :  { %10420 = vmatmul.mubr.msk.f32.vlgmr.msra.gmra.mxu0 %vm2839_vm2, %v3189_v54 }
 0x3b9   :  { %10428 = vmatpush3.msk.msra.mxu0 %vm5727_vm3, %v5624_v58 }
 0x3ba   :  { %10529 = vmatprep.subr.mxu0 %v12270_v11 }
 0x3f8   :  { %v3340_v33 = vpop.f32.mrf.mxu1 }
 0x3fa   :  { %v10276_v14 = vpop.f32.mrf.mxu1 }
 0x40a   :  { %v3264_v39 = vpop.f32.mrf.mxu0 }
 0x40b   :  { %10429 = vmatprep.mubr.msk.f32.mxu0 %vm5630_vm4, %v3264_v39 }
 0x40c   :  { %v10271_v17 = vpop.f32.mrf.mxu0  ;;  %10430 = vmatmul.mubr.msk.f32.vlgmr.msra.gmra.mxu0 %vm5630_vm4, %v3340_v33 }
 0x40d   :  { %10530 = vmatpush3.msra.mxu0 %v12270_v11  ;;  %v9650_v17 = vld [vmem:[%s13785_s2 + $0x3] ss:$0 sm:$0xff] }
 0x40e   :  { %v3416_v49 = vpop.f32.mrf.mxu0  ;;  %10531 = vmatprep.subr.mxu0 %v12277_v2  ;;  %6740 = vrot.lane.b32.xlu0 %v9650_v17, %s11055_s23 }
 0x40f   :  { %10432 = vmatprep.mubr.msk.f32.mxu0 %vm5630_vm4, %v3416_v49  ;;  %10532 = vmatpush3.msra.mxu0 %v12277_v2 }
 0x410   :  { %v10281_v50 = vpop.f32.mrf.mxu0  ;;  %10533 = vmatprep.subr.mxu0 %v12284_v21 }
 0x411   :  { %10534 = vmatpush3.msra.mxu0 %v12284_v21 }
 0x412   :  { %v3492_v42 = vpop.f32.mrf.mxu1  ;;  %10535 = vmatprep.subr.mxu0 %v12292_v27 }
 0x413   :  { %v3568_v10 = vpop.f32.mrf.mxu0  ;;  %10433 = vmatmul.mubr.msk.f32.gmra.mxu0 %vm5630_vm4, %v3492_v42 }
 0x414   :  { %v10286_v45 = vpop.f32.mrf.mxu1  ;;  %10435 = vmatprep.mubr.msk.f32.mxu0 %vm5630_vm4, %v3568_v10  ;;  %10536 = vmatpush3.msra.mxu0 %v12292_v27 }
 0x415   :  { %v10291_v29 = vpop.f32.mrf.mxu0  ;;  %10557 = vmatprep.subr.mxu0 %v12270_v11 }
 0x416   :  { %v3644_v34 = vpop.f32.mrf.mxu1  ;;  %v12354_v29 = vld [vmem:[%s13785_s2 + $0x1] ss:$0 sm:$0xff] }
 0x417   :  { %v3720_v61 = vpop.f32.mrf.mxu0  ;;  %10436 = vmatmul.mubr.msk.f32.gmra.mxu0 %vm5630_vm4, %v3644_v34 }
 0x418   :  { %v10296_v7 = vpop.f32.mrf.mxu1  ;;  %10438 = vmatprep.mubr.msk.f32.mxu0 %vm5630_vm4, %v3720_v61 }
 0x419   :  { %v10301_v31 = vpop.f32.mrf.mxu0 }
 0x41a   :  { %v3796_v16 = vpop.f32.mrf.mxu1 }
 0x41b   :  { %v3872_v57 = vpop.f32.mrf.mxu0  ;;  %10439 = vmatmul.mubr.msk.f32.gmra.mxu0 %vm5630_vm4, %v3796_v16 }
 0x41c   :  { %v10306_v40 = vpop.f32.mrf.mxu1  ;;  %10441 = vmatprep.mubr.msk.f32.mxu0 %vm5630_vm4, %v3872_v57 }
 0x41d   :  { %v10311_v51 = vpop.f32.mrf.mxu0 }
 0x41e   :  { %v3948_v30 = vpop.f32.mrf.mxu1 }
 0x41f   :  { %v4024_v15 = vpop.f32.mrf.mxu0  ;;  %10442 = vmatmul.mubr.msk.f32.gmra.mxu0 %vm5630_vm4, %v3948_v30 }
 0x420   :  { %v10316_v20 = vpop.f32.mrf.mxu1  ;;  %10444 = vmatprep.mubr.msk.f32.mxu0 %vm5630_vm4, %v4024_v15 }
 0x421   :  { %v10321_v44 = vpop.f32.mrf.mxu0 }
 0x426   :  { %v4100_v63 = vpop.f32.mrf.mxu1 }
 0x427   :  { %10445 = vmatmul.mubr.msk.f32.gmra.mxu0 %vm5630_vm4, %v4100_v63 }
 0x428   :  { %v10326_v25 = vpop.f32.mrf.mxu1 }
 0x42a   :  { %v4252_v18 = vpop.f32.mrf.mxu1 }
 0x42b   :  { %v4176_v24 = vpop.f32.mrf.mxu0 }
 0x42c   :  { %10447 = vmatprep.mubr.msk.f32.mxu0 %vm5630_vm4, %v4176_v24  ;;  %v10336_v41 = vpop.f32.mrf.mxu1 }
 0x42d   :  { %v10331_v60 = vpop.f32.mrf.mxu0  ;;  %10448 = vmatmul.mubr.msk.f32.gmra.mxu0 %vm5630_vm4, %v4252_v18 }
 0x437   :  { %v4328_v46 = vpop.f32.mrf.mxu0 }
 0x438   :  { %10450 = vmatprep.mubr.msk.f32.mxu0 %vm5630_vm4, %v4328_v46 }
 0x439   :  { %v10341_v37 = vpop.f32.mrf.mxu0 }
 0x43b   :  { %v4480_v8 = vpop.f32.mrf.mxu0 }
 0x43d   :  { %v10351_v53 = vpop.f32.mrf.mxu0 }
 0x43f   :  { %v4632_v13 = vpop.f32.mrf.mxu0  ;;  %v4404_v22 = vpop.f32.mrf.mxu1 }
 0x440   :  { %10451 = vmatmul.mubr.msk.f32.gmra.mxu0 %vm5630_vm4, %v4404_v22 }
 0x441   :  { %v10361_v52 = vpop.f32.mrf.mxu0  ;;  %v10346_v48 = vpop.f32.mrf.mxu1  ;;  %10453 = vmatprep.mubr.msk.f32.mxu0 %vm5630_vm4, %v4480_v8 }
 0x443   :  { %v4784_v5 = vpop.f32.mrf.mxu0  ;;  %v4556_v55 = vpop.f32.mrf.mxu1 }
 0x444   :  { %10454 = vmatmul.mubr.msk.f32.gmra.mxu0 %vm5630_vm4, %v4556_v55 }
 0x445   :  { %v10371_v59 = vpop.f32.mrf.mxu0  ;;  %v10356_v26 = vpop.f32.mrf.mxu1  ;;  %10456 = vmatprep.mubr.msk.f32.mxu0 %vm5630_vm4, %v4632_v13 }
 0x447   :  { %v4936_v35 = vpop.f32.mrf.mxu0  ;;  %v4708_v23 = vpop.f32.mrf.mxu1 }
 0x448   :  { %10457 = vmatmul.mubr.msk.f32.gmra.mxu0 %vm5630_vm4, %v4708_v23 }
 0x449   :  { %v10381_v0 = vpop.f32.mrf.mxu0  ;;  %v10366_v43 = vpop.f32.mrf.mxu1  ;;  %10459 = vmatprep.mubr.msk.f32.mxu0 %vm5630_vm4, %v4784_v5 }
 0x44b   :  { %v5088_v1 = vpop.f32.mrf.mxu0  ;;  %v4860_v32 = vpop.f32.mrf.mxu1 }
 0x44c   :  { %10460 = vmatmul.mubr.msk.f32.gmra.mxu0 %vm5630_vm4, %v4860_v32 }
 0x44d   :  { %v10391_v47 = vpop.f32.mrf.mxu0  ;;  %v10376_v4 = vpop.f32.mrf.mxu1  ;;  %10462 = vmatprep.mubr.msk.f32.mxu0 %vm5630_vm4, %v4936_v35 }
 0x44f   :  { %v5240_v36 = vpop.f32.mrf.mxu0  ;;  %v5012_v56 = vpop.f32.mrf.mxu1 }
 0x450   :  { %10463 = vmatmul.mubr.msk.f32.gmra.mxu0 %vm5630_vm4, %v5012_v56 }
 0x451   :  { %v10401_v6 = vpop.f32.mrf.mxu0  ;;  %v10386_v9 = vpop.f32.mrf.mxu1  ;;  %10465 = vmatprep.mubr.msk.f32.mxu0 %vm5630_vm4, %v5088_v1 }
 0x453   :  { %v5164_v12 = vpop.f32.mrf.mxu1 }
 0x454   :  { %10466 = vmatmul.mubr.msk.f32.gmra.mxu0 %vm5630_vm4, %v5164_v12 }
 0x455   :  { %v10396_v28 = vpop.f32.mrf.mxu1  ;;  %10468 = vmatprep.mubr.msk.f32.mxu0 %vm5630_vm4, %v5240_v36 }
 0x457   :  { %v5316_v58 = vpop.f32.mrf.mxu1 }
 0x458   :  { %10469 = vmatmul.mubr.msk.f32.gmra.mxu0 %vm5630_vm4, %v5316_v58 }
 0x459   :  { %v10406_v38 = vpop.f32.mrf.mxu1 }
 0x45b   :  { %v5468_v54 = vpop.f32.mrf.mxu1 }
 0x45d   :  { %v10416_v33 = vpop.f32.mrf.mxu1 }
 0x46d   :  { %v5620_v14 = vpop.f32.mrf.mxu1 }
 0x46f   :  { %v10426_v39 = vpop.f32.mrf.mxu1 }
 0x474   :  { %v5392_v49 = vpop.f32.mrf.mxu0 }
 0x475   :  { %10471 = vmatprep.mubr.msk.f32.mxu0 %vm5630_vm4, %v5392_v49 }
 0x476   :  { %v10411_v50 = vpop.f32.mrf.mxu0  ;;  %10472 = vmatmul.mubr.msk.f32.gmra.mxu0 %vm5630_vm4, %v5468_v54 }
 0x478   :  { %v5544_v42 = vpop.f32.mrf.mxu0 }
 0x479   :  { %10474 = vmatprep.mubr.msk.f32.mxu0 %vm5630_vm4, %v5544_v42 }
 0x47a   :  { %v10421_v10 = vpop.f32.mrf.mxu0  ;;  %10475 = vmatmul.mubr.msk.f32.gmra.mxu0 %vm5630_vm4, %v5620_v14 }
 0x47b   :  { %10537 = vmatprep.mubr.f32.mxu0 %v13823_v3 }
 0x47e   :  { %10538 = vmatmul.mubr.f32.vlgmr.msra.gmra.mxu0 %v13823_v3 }
 0x47f   :  { %10540 = vmatprep.mubr.f32.mxu0 %v13823_v3  ;;  %10558 = vmatpush3.msra.mxu0 %v12270_v11 }
 0x480   :  { %10559 = vmatprep.subr.mxu0 %v12277_v2 }
 0x481   :  { %10560 = vmatpush3.msra.mxu0 %v12277_v2 }
 0x482   :  { %10541 = vmatmul.mubr.f32.gmra.mxu0 %v13823_v3  ;;  %10561 = vmatprep.subr.mxu0 %v12284_v21 }
 0x483   :  { %10562 = vmatpush3.msra.mxu0 %v12284_v21 }
 0x484   :  { %10563 = vmatprep.subr.mxu0 %v12292_v27 }
 0x485   :  { %10564 = vmatpush3.msra.mxu0 %v12292_v27 }
 0x486   :  { %10585 = vmatprep.subr.mxu0 %v12270_v11 }
 0x4cc   :  { %v10431_v45 = vpop.f32.mrf.mxu0 }
 0x4cd   :  { %v5803_v3 = vadd.f32 %v10431_v45, %v12354_v29 }
 0x4ce   :  { %v5797_v34 = vpop.f32.mrf.mxu0 }
 0x4cf   :  { %v5798_v61 = vadd.f32 %v12354_v29, %v5797_v34 }
 0x4d1   :  { %10481 = vmatprep.mubr.msk.f32.mxu1 %vm53_vm0, %v5798_v61  ;;  %v12428_v61 = vpop.permute.xlu0 %6740 }
 0x4d2   :  { %10482 = vmatmul.mubr.msk.f32.vlgmr.msra.gmra.mxu1 %vm53_vm0, %v5803_v3 }
 0x4d3   :  { %v10434_v7 = vpop.f32.mrf.mxu0  ;;  %10544 = vmatpush3.msra.mxu1 %v12270_v11 }
 0x4d4   :  { %10545 = vmatprep.subr.mxu1 %v12277_v2  ;;  %v5813_v57 = vadd.f32 %v10434_v7, %v12354_v29 }
 0x4d5   :  { %v5807_v31 = vpop.f32.mrf.mxu0  ;;  %10546 = vmatpush3.msra.mxu1 %v12277_v2 }
 0x4d6   :  { %v5808_v16 = vadd.f32 %v12354_v29, %v5807_v31  ;;  %10547 = vmatprep.subr.mxu1 %v12284_v21 }
 0x4d7   :  { %v10437_v40 = vpop.f32.mrf.mxu0  ;;  %10548 = vmatpush3.msra.mxu1 %v12284_v21 }
 0x4d8   :  { %10484 = vmatprep.mubr.msk.f32.mxu1 %vm53_vm0, %v5808_v16  ;;  %10549 = vmatprep.subr.mxu1 %v12292_v27  ;;  %v5823_v2 = vadd.f32 %v10437_v40, %v12354_v29 }
 0x4d9   :  { %v5817_v51 = vpop.f32.mrf.mxu0  ;;  %10485 = vmatmul.mubr.msk.f32.gmra.mxu1 %vm53_vm0, %v5813_v57 }
 0x4da   :  { %v5818_v30 = vadd.f32 %v12354_v29, %v5817_v51  ;;  %10550 = vmatpush3.msra.mxu1 %v12292_v27  ;;  %v12453_v51 = vld [vmem:[%s13785_s2 + $0x2] ss:$0 sm:$0xff] }
 0x4db   :  { %v10440_v15 = vpop.f32.mrf.mxu0  ;;  %10571 = vmatprep.subr.mxu1 %v12270_v11 }
 0x4dc   :  { %10487 = vmatprep.mubr.msk.f32.mxu1 %vm53_vm0, %v5818_v30  ;;  %v5833_v44 = vadd.f32 %v10440_v15, %v12354_v29 }
 0x4dd   :  { %v5827_v20 = vpop.f32.mrf.mxu0  ;;  %10488 = vmatmul.mubr.msk.f32.gmra.mxu1 %vm53_vm0, %v5823_v2 }
 0x4de   :  { %v5828_v21 = vadd.f32 %v12354_v29, %v5827_v20 }
 0x4df   :  { %v10443_v63 = vpop.f32.mrf.mxu0 }
 0x4e0   :  { %10490 = vmatprep.mubr.msk.f32.mxu1 %vm53_vm0, %v5828_v21  ;;  %v5843_v18 = vadd.f32 %v10443_v63, %v12354_v29 }
 0x4e1   :  { %v5837_v25 = vpop.f32.mrf.mxu0  ;;  %10491 = vmatmul.mubr.msk.f32.gmra.mxu1 %vm53_vm0, %v5833_v44 }
 0x4e2   :  { %v5838_v27 = vadd.f32 %v12354_v29, %v5837_v25 }
 0x4e4   :  { %10493 = vmatprep.mubr.msk.f32.mxu1 %vm53_vm0, %v5838_v27 }
 0x4e5   :  { %10494 = vmatmul.mubr.msk.f32.gmra.mxu1 %vm53_vm0, %v5843_v18 }
 0x4e7   :  { %v10446_v11 = vpop.f32.mrf.mxu0 }
 0x4e8   :  { %v5853_v60 = vadd.f32 %v10446_v11, %v12354_v29 }
 0x4e9   :  { %v5847_v24 = vpop.f32.mrf.mxu0 }
 0x4ea   :  { %v5848_v41 = vadd.f32 %v12354_v29, %v5847_v24 }
 0x4ec   :  { %10496 = vmatprep.mubr.msk.f32.mxu1 %vm53_vm0, %v5848_v41 }
 0x4ed   :  { %v10449_v46 = vpop.f32.mrf.mxu0  ;;  %10497 = vmatmul.mubr.msk.f32.gmra.mxu1 %vm53_vm0, %v5853_v60 }
 0x4ee   :  { %v5863_v53 = vadd.f32 %v10449_v46, %v12354_v29 }
 0x4ef   :  { %v5857_v37 = vpop.f32.mrf.mxu0 }
 0x4f0   :  { %v5858_v8 = vadd.f32 %v12354_v29, %v5857_v37 }
 0x4f2   :  { %10499 = vmatprep.mubr.msk.f32.mxu1 %vm53_vm0, %v5858_v8 }
 0x4f3   :  { %10500 = vmatmul.mubr.msk.f32.gmra.mxu1 %vm53_vm0, %v5863_v53 }
 0x500   :  { %v10452_v13 = vpop.f32.mrf.mxu0 }
 0x501   :  { %v5873_v48 = vadd.f32 %v10452_v13, %v12354_v29 }
 0x502   :  { %v5867_v22 = vpop.f32.mrf.mxu0 }
 0x503   :  { %v5868_v52 = vadd.f32 %v12354_v29, %v5867_v22 }
 0x504   :  { %v10455_v5 = vpop.f32.mrf.mxu0 }
 0x505   :  { %10502 = vmatprep.mubr.msk.f32.mxu1 %vm53_vm0, %v5868_v52  ;;  %v5883_v26 = vadd.f32 %v10455_v5, %v12354_v29 }
 0x506   :  { %v5877_v55 = vpop.f32.mrf.mxu0  ;;  %10503 = vmatmul.mubr.msk.f32.gmra.mxu1 %vm53_vm0, %v5873_v48 }
 0x507   :  { %v5878_v59 = vadd.f32 %v12354_v29, %v5877_v55 }
 0x508   :  { %v10458_v35 = vpop.f32.mrf.mxu0 }
 0x509   :  { %10505 = vmatprep.mubr.msk.f32.mxu1 %vm53_vm0, %v5878_v59  ;;  %v5893_v43 = vadd.f32 %v10458_v35, %v12354_v29 }
 0x50a   :  { %v5887_v23 = vpop.f32.mrf.mxu0  ;;  %10506 = vmatmul.mubr.msk.f32.gmra.mxu1 %vm53_vm0, %v5883_v26 }
 0x50b   :  { %v5888_v0 = vadd.f32 %v12354_v29, %v5887_v23 }
 0x50c   :  { %v10461_v1 = vpop.f32.mrf.mxu0 }
 0x50d   :  { %10508 = vmatprep.mubr.msk.f32.mxu1 %vm53_vm0, %v5888_v0  ;;  %v5903_v4 = vadd.f32 %v10461_v1, %v12354_v29 }
 0x50e   :  { %v5897_v32 = vpop.f32.mrf.mxu0  ;;  %10509 = vmatmul.mubr.msk.f32.gmra.mxu1 %vm53_vm0, %v5893_v43 }
 0x50f   :  { %v5898_v47 = vadd.f32 %v12354_v29, %v5897_v32 }
 0x510   :  { %v10464_v36 = vpop.f32.mrf.mxu0 }
 0x511   :  { %10511 = vmatprep.mubr.msk.f32.mxu1 %vm53_vm0, %v5898_v47  ;;  %v5913_v56 = vadd.f32 %v10464_v36, %v12354_v29 }
 0x512   :  { %v5907_v62 = vpop.f32.mrf.mxu0  ;;  %10512 = vmatmul.mubr.msk.f32.gmra.mxu1 %vm53_vm0, %v5903_v4 }
 0x513   :  { %v5908_v19 = vadd.f32 %v12354_v29, %v5907_v62 }
 0x514   :  { %v10467_v6 = vpop.f32.mrf.mxu0 }
 0x515   :  { %10514 = vmatprep.mubr.msk.f32.mxu1 %vm53_vm0, %v5908_v19  ;;  %v5923_v28 = vadd.f32 %v10467_v6, %v12354_v29 }
 0x516   :  { %v5917_v9 = vpop.f32.mrf.mxu0  ;;  %10515 = vmatmul.mubr.msk.f32.gmra.mxu1 %vm53_vm0, %v5913_v56 }
 0x517   :  { %v5918_v12 = vadd.f32 %v12354_v29, %v5917_v9 }
 0x518   :  { %v10470_v58 = vpop.f32.mrf.mxu0 }
 0x519   :  { %10517 = vmatprep.mubr.msk.f32.mxu1 %vm53_vm0, %v5918_v12  ;;  %v5933_v33 = vadd.f32 %v10470_v58, %v12354_v29 }
 0x51a   :  { %v5927_v38 = vpop.f32.mrf.mxu0  ;;  %10518 = vmatmul.mubr.msk.f32.gmra.mxu1 %vm53_vm0, %v5923_v28 }
 0x51b   :  { %v5928_v54 = vadd.f32 %v12354_v29, %v5927_v38 }
 0x51d   :  { %10520 = vmatprep.mubr.msk.f32.mxu1 %vm53_vm0, %v5928_v54 }
 0x51e   :  { %10521 = vmatmul.mubr.msk.f32.gmra.mxu1 %vm53_vm0, %v5933_v33 }
 0x536   :  { %v10473_v14 = vpop.f32.mrf.mxu0 }
 0x537   :  { %v5943_v49 = vadd.f32 %v10473_v14, %v12354_v29 }
 0x538   :  { %v5937_v39 = vpop.f32.mrf.mxu0 }
 0x539   :  { %v5938_v17 = vadd.f32 %v12354_v29, %v5937_v39 }
 0x53a   :  { %v10476_v50 = vpop.f32.mrf.mxu0 }
 0x53b   :  { %10523 = vmatprep.mubr.msk.f32.mxu1 %vm53_vm0, %v5938_v17  ;;  %v5953_v45 = vadd.f32 %v10476_v50, %v12354_v29 }
 0x53c   :  { %v5947_v42 = vpop.f32.mrf.mxu0  ;;  %10524 = vmatmul.mubr.msk.f32.gmra.mxu1 %vm53_vm0, %v5943_v49 }
 0x53d   :  { %v5948_v10 = vadd.f32 %v12354_v29, %v5947_v42 }
 0x53e   :  { %v12426_v34 = vpop.f32.mrf.mxu0 }
 0x53f   :  { %10526 = vmatprep.mubr.msk.f32.mxu1 %vm53_vm0, %v5948_v10  ;;  %v6744_v3 = vadd.f32 %v12426_v34, %v12428_v61 }
 0x540   :  { %10527 = vmatmul.mubr.msk.f32.gmra.mxu1 %vm53_vm0, %v5953_v45  ;;  %v12434_v7 = vpop.f32.mrf.mxu0 }
 0x541   :  { %v6743_v31 = vadd.f32 %v12428_v61, %v12434_v7  ;;  %6753 = vrot.lane.b32.xlu0 %v6744_v3, %s11055_s23 }
 0x542   :  { %v12439_v16 = vpop.f32.mrf.mxu0 }
 0x543   :  { %6751 = vrot.lane.b32.xlu1 %v6743_v31, %s11055_s23  ;;  %v6746_v29 = vadd.f32 %v12439_v16, %v12428_v61 }
 0x544   :  { %v12444_v57 = vpop.f32.mrf.mxu0 }
 0x545   :  { %v6745_v40 = vadd.f32 %v12428_v61, %v12444_v57  ;;  %6757 = vrot.lane.b32.xlu0 %v6746_v29, %s11055_s23 }
 0x547   :  { %6755 = vrot.lane.b32.xlu1 %v6745_v40, %s11055_s23 }
 0x592   :  { %v10483_v30 = vpop.f32.mrf.mxu1 }
 0x593   :  { %v6131_v2 = vadd.f32 %v10483_v30, %v12453_v51 }
 0x594   :  { %v6125_v15 = vpop.f32.mrf.mxu1 }
 0x595   :  { %6286 = vst.msk [vmem:[#allocation2 + $0x8] sm:$0xff] %vm6284_vm5, %v6131_v2  ;;  %v6126_v20 = vadd.f32 %v12453_v51, %v6125_v15 }
 0x597   :  { %6285 = vst.msk [vmem:[#allocation2] sm:$0xff] %vm6284_vm5, %v6126_v20 }
 0x599   :  { %v10486_v21 = vpop.f32.mrf.mxu1 }
 0x59a   :  { %v6141_v44 = vadd.f32 %v10486_v21, %v12453_v51 }
 0x59b   :  { %v6135_v63 = vpop.f32.mrf.mxu1 }
 0x59c   :  { %6288 = vst.msk [vmem:[#allocation2 + $0x18] sm:$0xff] %vm6284_vm5, %v6141_v44  ;;  %v6136_v25 = vadd.f32 %v12453_v51, %v6135_v63  ;;  %v6359_v41 = vld [vmem:[#allocation2 + $0xf] sm:$0x1]  ;;  %v6327_v60 = vld [vmem:[#allocation2 + $0x8] sm:$0x1] }
 0x59d   :  { %v10489_v27 = vpop.f32.mrf.mxu1  ;;  %v6610_v53 = vrot.slane %v6359_v41, 7  ;;  %v6511_v13 = vrot.slane %v6327_v60, 7 }
 0x59e   :  { %6287 = vst.msk [vmem:[#allocation2 + $0x10] sm:$0xff] %vm6284_vm5, %v6136_v25  ;;  %v6151_v18 = vadd.f32 %v10489_v27, %v12453_v51  ;;  %v6358_v52 = vld [vmem:[#allocation2 + $0x7] sm:$0x1]  ;;  %v6326_v48 = vld [vmem:[#allocation2] sm:$0x1] }
 0x59f   :  { %v6145_v11 = vpop.f32.mrf.mxu1  ;;  %v6611_v32 = vsel %vm6512_vm6, %v6610_v53, %v6358_v52  ;;  %v6513_v47 = vsel %vm6512_vm6, %v6511_v13, %v6326_v48 }
 0x5a0   :  { %6290 = vst.msk [vmem:[#allocation2 + $0x28] sm:$0xff] %vm6284_vm5, %v6151_v18  ;;  %v6146_v24 = vadd.f32 %v12453_v51, %v6145_v11 }
 0x5a1   :  { %v10492_v46 = vpop.f32.mrf.mxu1 }
 0x5a2   :  { %6289 = vst.msk [vmem:[#allocation2 + $0x20] sm:$0xff] %vm6284_vm5, %v6146_v24  ;;  %v6161_v37 = vadd.f32 %v10492_v46, %v12453_v51 }
 0x5a3   :  { %v6155_v8 = vpop.f32.mrf.mxu1  ;;  %v6361_v35 = vld [vmem:[#allocation2 + $0x1f] sm:$0x1]  ;;  %v6329_v0 = vld [vmem:[#allocation2 + $0x18] sm:$0x1] }
 0x5a4   :  { %6292 = vst.msk [vmem:[#allocation2 + $0x38] sm:$0xff] %vm6284_vm5, %v6161_v37  ;;  %v6156_v22 = vadd.f32 %v12453_v51, %v6155_v8  ;;  %v6614_v56 = vrot.slane %v6361_v35, 5  ;;  %v6517_v9 = vrot.slane %v6329_v0, 5 }
 0x5a5   :  { %v10495_v5 = vpop.f32.mrf.mxu1  ;;  %v6360_v55 = vld [vmem:[#allocation2 + $0x17] sm:$0x1]  ;;  %v6328_v59 = vld [vmem:[#allocation2 + $0x10] sm:$0x1] }
 0x5a6   :  { %6291 = vst.msk [vmem:[#allocation2 + $0x30] sm:$0xff] %vm6284_vm5, %v6156_v22  ;;  %v6171_v26 = vadd.f32 %v10495_v5, %v12453_v51  ;;  %v6612_v23 = vrot.slane %v6360_v55, 6  ;;  %v6514_v43 = vrot.slane %v6328_v59, 6 }
 0x5a7   :  { %v6165_v1 = vpop.f32.mrf.mxu1  ;;  %v6363_v12 = vld [vmem:[#allocation2 + $0x2f] sm:$0x1]  ;;  %v6331_v58 = vld [vmem:[#allocation2 + $0x28] sm:$0x1] }
 0x5a8   :  { %6294 = vst.msk [vmem:[#allocation2 + $0x48] sm:$0xff] %vm6284_vm5, %v6171_v26  ;;  %v6166_v4 = vadd.f32 %v12453_v51, %v6165_v1  ;;  %v6613_v36 = vsel %vm6515_vm7, %v6612_v23, %v6611_v32  ;;  %v6516_v62 = vsel %vm6515_vm7, %v6514_v43, %v6513_v47  ;;  %v6618_v10 = vrot.slane %v6363_v12, 3 }
 0x5a9   :  { %v6362_v19 = vld [vmem:[#allocation2 + $0x27] sm:$0x1]  ;;  %v6330_v6 = vld [vmem:[#allocation2 + $0x20] sm:$0x1]  ;;  %v6615_v54 = vsel %vm6518_vm8, %v6614_v56, %v6613_v36  ;;  %v6519_v33 = vsel %vm6518_vm8, %v6517_v9, %v6516_v62  ;;  %v6523_v3 = vrot.slane %v6331_v58, 3 }
 0x5aa   :  { %6293 = vst.msk [vmem:[#allocation2 + $0x40] sm:$0xff] %vm6284_vm5, %v6166_v4  ;;  %v6616_v28 = vrot.slane %v6362_v19, 4  ;;  %v6520_v38 = vrot.slane %v6330_v6, 4 }
 0x5ab   :  { %v6365_v14 = vld [vmem:[#allocation2 + $0x3f] sm:$0x1]  ;;  %v6333_v17 = vld [vmem:[#allocation2 + $0x38] sm:$0x1] }
 0x5ac   :  { %v6617_v39 = vsel %vm6521_vm9, %v6616_v28, %v6615_v54  ;;  %v6522_v49 = vsel %vm6521_vm9, %v6520_v38, %v6519_v33  ;;  %v6622_v15 = vrot.slane %v6365_v14, 1  ;;  %v6529_v21 = vrot.slane %v6333_v17, 1 }
 0x5ad   :  { %v10498_v50 = vpop.f32.mrf.mxu1  ;;  %v6364_v42 = vld [vmem:[#allocation2 + $0x37] sm:$0x1]  ;;  %v6332_v45 = vld [vmem:[#allocation2 + $0x30] sm:$0x1]  ;;  %v6619_v2 = vsel %vm6524_vm10, %v6618_v10, %v6617_v39  ;;  %v6525_v20 = vsel %vm6524_vm10, %v6523_v3, %v6522_v49 }
 0x5ae   :  { %v6181_v31 = vadd.f32 %v10498_v50, %v12453_v51  ;;  %v6620_v29 = vrot.slane %v6364_v42, 2  ;;  %v6526_v40 = vrot.slane %v6332_v45, 2 }
 0x5af   :  { %v6175_v30 = vpop.f32.mrf.mxu1  ;;  %v6335_v52 = vld [vmem:[#allocation2 + $0x48] sm:$0x1]  ;;  %v6367_v5 = vld [vmem:[#allocation2 + $0x4f] sm:$0x1] }
 0x5b0   :  { %6296 = vst.msk [vmem:[#allocation2 + $0x58] sm:$0xff] %vm6284_vm5, %v6181_v31  ;;  %v6176_v44 = vadd.f32 %v12453_v51, %v6175_v30  ;;  %v6621_v63 = vsel %vm6527_vm11, %v6620_v29, %v6619_v2  ;;  %v6528_v25 = vsel %vm6527_vm11, %v6526_v40, %v6525_v20  ;;  %v6532_v35 = vrot.slane %v6335_v52, 7 }
 0x5b1   :  { %v6623_v27 = vsel %vm6530_vm12, %v6622_v15, %v6621_v63  ;;  %v6531_v18 = vsel %vm6530_vm12, %v6529_v21, %v6528_v25  ;;  %v6334_v0 = vld [vmem:[#allocation2 + $0x40] sm:$0x1]  ;;  %v6624_v1 = vrot.slane %v6367_v5, 7  ;;  %v6366_v47 = vld [vmem:[#allocation2 + $0x47] sm:$0x1] }
 0x5b2   :  { %6295 = vst.msk [vmem:[#allocation2 + $0x50] sm:$0xff] %vm6284_vm5, %v6176_v44  ;;  %6723 = vrot.lane.b32.xlu1 %v6623_v27, %s11055_s23  ;;  %6711 = vrot.lane.b32.xlu0 %v6531_v18, %s11055_s23  ;;  %v6670_v11 = vsel %vm53_vm0, %v6531_v18, %v6623_v27  ;;  %v9006_v53 = vsel %vm53_vm0, %v6623_v27, %v6531_v18 }
 0x5b3   :  { %v10501_v24 = vpop.f32.mrf.mxu1  ;;  %v6674_v41 = vsel %vm6390_vm13, %v6670_v11, %v6531_v18  ;;  %v9010_v13 = vsel %vm6390_vm13, %v9006_v53, %v6623_v27  ;;  %v6533_v9 = vsel %vm6512_vm6, %v6532_v35, %v6334_v0  ;;  %v6625_v38 = vsel %vm6512_vm6, %v6624_v1, %v6366_v47 }
 0x5b4   :  { %v6191_v60 = vadd.f32 %v10501_v24, %v12453_v51  ;;  %v12499_v46 = vsel %vm6678_vm14, %v6674_v41, %v6623_v27  ;;  %v12507_v22 = vsel %vm6678_vm14, %v9010_v13, %v6531_v18 }
 0x5b5   :  { %v6185_v37 = vpop.f32.mrf.mxu1  ;;  %13846 = vst [vmem:[#allocation11_spill] sm:$0xff] %v12507_v22  ;;  %v7818_v22 = vld [vmem:[#allocation2 + $0x4c] sm:$0x1] }
 0x5b6   :  { %6298 = vst.msk [vmem:[#allocation2 + $0x68] sm:$0xff] %vm6284_vm5, %v6191_v60  ;;  %v6186_v8 = vadd.f32 %v12453_v51, %v6185_v37 }
 0x5b7   :  { %v6337_v6 = vld [vmem:[#allocation2 + $0x58] sm:$0x1]  ;;  %v6369_v12 = vld [vmem:[#allocation2 + $0x5f] sm:$0x1] }
 0x5b8   :  { %6297 = vst.msk [vmem:[#allocation2 + $0x60] sm:$0xff] %vm6284_vm5, %v6186_v8  ;;  %v6536_v49 = vrot.slane %v6337_v6, 5  ;;  %v6628_v50 = vrot.slane %v6369_v12, 5 }
 0x5b9   :  { %v6336_v48 = vld [vmem:[#allocation2 + $0x50] sm:$0x1]  ;;  %v6368_v59 = vld [vmem:[#allocation2 + $0x57] sm:$0x1] }
 0x5ba   :  { %v6534_v43 = vrot.slane %v6336_v48, 6  ;;  %v6626_v4 = vrot.slane %v6368_v59, 6 }
 0x5bc   :  { %v6535_v58 = vsel %vm6515_vm7, %v6534_v43, %v6533_v9  ;;  %v6627_v14 = vsel %vm6515_vm7, %v6626_v4, %v6625_v38 }
 0x5bd   :  { %v6339_v10 = vld [vmem:[#allocation2 + $0x68] sm:$0x1]  ;;  %v6371_v45 = vld [vmem:[#allocation2 + $0x6f] sm:$0x1]  ;;  %v6537_v31 = vsel %vm6518_vm8, %v6536_v49, %v6535_v58  ;;  %v6629_v29 = vsel %vm6518_vm8, %v6628_v50, %v6627_v14 }
 0x5be   :  { %v6540_v63 = vrot.slane %v6339_v10, 3  ;;  %v6632_v27 = vrot.slane %v6371_v45, 3 }
 0x5bf   :  { %v6338_v62 = vld [vmem:[#allocation2 + $0x60] sm:$0x1]  ;;  %v6370_v19 = vld [vmem:[#allocation2 + $0x67] sm:$0x1] }
 0x5c0   :  { %v6538_v33 = vrot.slane %v6338_v62, 4  ;;  %v6630_v39 = vrot.slane %v6370_v19, 4 }
 0x5c2   :  { %v6539_v2 = vsel %vm6521_vm9, %v6538_v33, %v6537_v31  ;;  %v6631_v20 = vsel %vm6521_vm9, %v6630_v39, %v6629_v29 }
 0x5c3   :  { %v6541_v60 = vsel %vm6524_vm10, %v6540_v63, %v6539_v2  ;;  %v6633_v8 = vsel %vm6524_vm10, %v6632_v27, %v6631_v20 }
 0x5c6   :  { %v10504_v55 = vpop.f32.mrf.mxu1 }
 0x5c7   :  { %v6201_v26 = vadd.f32 %v10504_v55, %v12453_v51 }
 0x5c8   :  { %v6195_v23 = vpop.f32.mrf.mxu1 }
 0x5c9   :  { %6300 = vst.msk [vmem:[#allocation2 + $0x78] sm:$0xff] %vm6284_vm5, %v6201_v26  ;;  %v6196_v32 = vadd.f32 %v12453_v51, %v6195_v23 }
 0x5ca   :  { %v10507_v36 = vpop.f32.mrf.mxu1 }
 0x5cb   :  { %6299 = vst.msk [vmem:[#allocation2 + $0x70] sm:$0xff] %vm6284_vm5, %v6196_v32  ;;  %v6211_v56 = vadd.f32 %v10507_v36, %v12453_v51 }
 0x5cc   :  { %v6205_v28 = vpop.f32.mrf.mxu1 }
 0x5cd   :  { %6302 = vst.msk [vmem:[#allocation2 + $0x88] sm:$0xff] %vm6284_vm5, %v6211_v56  ;;  %v6206_v54 = vadd.f32 %v12453_v51, %v6205_v28 }
 0x5ce   :  { %v10510_v17 = vpop.f32.mrf.mxu1 }
 0x5cf   :  { %6301 = vst.msk [vmem:[#allocation2 + $0x80] sm:$0xff] %vm6284_vm5, %v6206_v54  ;;  %v6221_v42 = vadd.f32 %v10510_v17, %v12453_v51 }
 0x5d0   :  { %v6215_v3 = vpop.f32.mrf.mxu1  ;;  %v6341_v30 = vld [vmem:[#allocation2 + $0x78] sm:$0x1]  ;;  %v6373_v15 = vld [vmem:[#allocation2 + $0x7f] sm:$0x1] }
 0x5d1   :  { %6304 = vst.msk [vmem:[#allocation2 + $0x98] sm:$0xff] %vm6284_vm5, %v6221_v42  ;;  %v6216_v40 = vadd.f32 %v12453_v51, %v6215_v3  ;;  %v6544_v37 = vrot.slane %v6341_v30, 1  ;;  %v6636_v53 = vrot.slane %v6373_v15, 1 }
 0x5d2   :  { %v10513_v21 = vpop.f32.mrf.mxu1  ;;  %v6340_v44 = vld [vmem:[#allocation2 + $0x70] sm:$0x1]  ;;  %v6372_v25 = vld [vmem:[#allocation2 + $0x77] sm:$0x1] }
 0x5d3   :  { %6303 = vst.msk [vmem:[#allocation2 + $0x90] sm:$0xff] %vm6284_vm5, %v6216_v40  ;;  %v6231_v18 = vadd.f32 %v10513_v21, %v12453_v51  ;;  %v6542_v11 = vrot.slane %v6340_v44, 2  ;;  %v6634_v24 = vrot.slane %v6372_v25, 2 }
 0x5d4   :  { %v6225_v41 = vpop.f32.mrf.mxu1  ;;  %v6375_v5 = vld [vmem:[#allocation2 + $0x8f] sm:$0x1]  ;;  %v6343_v55 = vld [vmem:[#allocation2 + $0x88] sm:$0x1] }
 0x5d5   :  { %6306 = vst.msk [vmem:[#allocation2 + $0xa8] sm:$0xff] %vm6284_vm5, %v6231_v18  ;;  %v6226_v13 = vadd.f32 %v12453_v51, %v6225_v41  ;;  %v6543_v52 = vsel %vm6527_vm11, %v6542_v11, %v6541_v60  ;;  %v6635_v48 = vsel %vm6527_vm11, %v6634_v24, %v6633_v8  ;;  %v6638_v32 = vrot.slane %v6375_v5, 7 }
 0x5d6   :  { %v10516_v59 = vpop.f32.mrf.mxu1  ;;  %v6545_v26 = vsel %vm6530_vm12, %v6544_v37, %v6543_v52  ;;  %v6637_v35 = vsel %vm6530_vm12, %v6636_v53, %v6635_v48  ;;  %v6546_v47 = vrot.slane %v6343_v55, 7  ;;  %v6374_v62 = vld [vmem:[#allocation2 + $0x87] sm:$0x1]  ;;  %v6342_v19 = vld [vmem:[#allocation2 + $0x80] sm:$0x1] }
 0x5d7   :  { %6305 = vst.msk [vmem:[#allocation2 + $0xa0] sm:$0xff] %vm6284_vm5, %v6226_v13  ;;  %v6241_v23 = vadd.f32 %v10516_v59, %v12453_v51  ;;  %6713 = vrot.lane.b32.xlu1 %v6545_v26, %s11055_s23  ;;  %v6671_v0 = vsel %vm53_vm0, %v6545_v26, %v6637_v35  ;;  %6725 = vrot.lane.b32.xlu0 %v6637_v35, %s11055_s23 }
 0x5d8   :  { %v6675_v43 = vsel %vm6390_vm13, %v6671_v0, %v6545_v26  ;;  %v6235_v1 = vpop.f32.mrf.mxu1  ;;  %v9007_v12 = vsel %vm53_vm0, %v6637_v35, %v6545_v26  ;;  %v6377_v58 = vld [vmem:[#allocation2 + $0x9f] sm:$0x1]  ;;  %v6345_v54 = vld [vmem:[#allocation2 + $0x98] sm:$0x1]  ;;  %v6639_v39 = vsel %vm6512_vm6, %v6638_v32, %v6374_v62  ;;  %v6547_v17 = vsel %vm6512_vm6, %v6546_v47, %v6342_v19 }
 0x5d9   :  { %6308 = vst.msk [vmem:[#allocation2 + $0xb8] sm:$0xff] %vm6284_vm5, %v6241_v23  ;;  %v12546_v4 = vsel %vm6678_vm14, %v6675_v43, %v6637_v35  ;;  %v6236_v36 = vadd.f32 %v12453_v51, %v6235_v1  ;;  %v9011_v49 = vsel %vm6390_vm13, %v9007_v12, %v6637_v35  ;;  %v6642_v31 = vrot.slane %v6377_v58, 5 }
 0x5da   :  { %v10519_v56 = vpop.f32.mrf.mxu1  ;;  %v6376_v6 = vld [vmem:[#allocation2 + $0x97] sm:$0x1]  ;;  %v6344_v9 = vld [vmem:[#allocation2 + $0x90] sm:$0x1]  ;;  %v6550_v40 = vrot.slane %v6345_v54, 5  ;;  %v12564_v27 = vsel %vm6678_vm14, %v9011_v49, %v6545_v26  ;;  %v6683_v1 = vadd.f32 %v12499_v46, %v12434_v7 }
 0x5db   :  { %6307 = vst.msk [vmem:[#allocation2 + $0xb0] sm:$0xff] %vm6284_vm5, %v6236_v36  ;;  %v6251_v28 = vadd.f32 %v10519_v56, %v12453_v51  ;;  %v6640_v38 = vrot.slane %v6376_v6, 6  ;;  %v6548_v33 = vrot.slane %v6344_v9, 6  ;;  %13847 = vst [vmem:[#allocation10_spill] sm:$0xff] %v12564_v27  ;;  %v7819_v27 = vld [vmem:[#allocation2 + $0x54] sm:$0x1] }
 0x5dc   :  { %v6245_v14 = vpop.f32.mrf.mxu1  ;;  %v6379_v2 = vld [vmem:[#allocation2 + $0xaf] sm:$0x1]  ;;  %v6347_v20 = vld [vmem:[#allocation2 + $0xa8] sm:$0x1]  ;;  %v9651_v32 = vmul.f32 -1.442695, %v6683_v1 }
 0x5dd   :  { %6310 = vst.msk [vmem:[#allocation2 + $0xc8] sm:$0xff] %vm6284_vm5, %v6251_v28  ;;  %v6246_v50 = vadd.f32 %v12453_v51, %v6245_v14  ;;  %v6641_v42 = vsel %vm6515_vm7, %v6640_v38, %v6639_v39  ;;  %v6549_v10 = vsel %vm6515_vm7, %v6548_v33, %v6547_v17  ;;  %v6646_v8 = vrot.slane %v6379_v2, 3 }
 0x5de   :  { %v10522_v45 = vpop.f32.mrf.mxu1  ;;  %v6378_v3 = vld [vmem:[#allocation2 + $0xa7] sm:$0x1]  ;;  %v6346_v29 = vld [vmem:[#allocation2 + $0xa0] sm:$0x1]  ;;  %v6643_v63 = vsel %vm6518_vm8, %v6642_v31, %v6641_v42  ;;  %v6551_v25 = vsel %vm6518_vm8, %v6550_v40, %v6549_v10  ;;  %v6554_v13 = vrot.slane %v6347_v20, 3  ;;  %10849 = vpow2.f32 %v9651_v32 }
 0x5df   :  { %6309 = vst.msk [vmem:[#allocation2 + $0xc0] sm:$0xff] %vm6284_vm5, %v6246_v50  ;;  %v6261_v30 = vadd.f32 %v10522_v45, %v12453_v51  ;;  %v6644_v15 = vrot.slane %v6378_v3, 4  ;;  %v6552_v21 = vrot.slane %v6346_v29, 4 }
 0x5e0   :  { %v6255_v44 = vpop.f32.mrf.mxu1  ;;  %v6381_v11 = vld [vmem:[#allocation2 + $0xbf] sm:$0x1]  ;;  %v6349_v41 = vld [vmem:[#allocation2 + $0xb8] sm:$0x1] }
 0x5e1   :  { %6312 = vst.msk [vmem:[#allocation2 + $0xd8] sm:$0xff] %vm6284_vm5, %v6261_v30  ;;  %v6256_v18 = vadd.f32 %v12453_v51, %v6255_v44  ;;  %v6645_v24 = vsel %vm6521_vm9, %v6644_v15, %v6643_v63  ;;  %v6553_v60 = vsel %vm6521_vm9, %v6552_v21, %v6551_v25  ;;  %v6650_v55 = vrot.slane %v6381_v11, 1 }
 0x5e2   :  { %v6380_v37 = vld [vmem:[#allocation2 + $0xb7] sm:$0x1]  ;;  %v6348_v53 = vld [vmem:[#allocation2 + $0xb0] sm:$0x1]  ;;  %v6647_v5 = vsel %vm6524_vm10, %v6646_v8, %v6645_v24  ;;  %v6555_v59 = vsel %vm6524_vm10, %v6554_v13, %v6553_v60  ;;  %v6558_v26 = vrot.slane %v6349_v41, 1 }
 0x5e3   :  { %6311 = vst.msk [vmem:[#allocation2 + $0xd0] sm:$0xff] %vm6284_vm5, %v6256_v18  ;;  %v6648_v52 = vrot.slane %v6380_v37, 2  ;;  %v6556_v48 = vrot.slane %v6348_v53, 2 }
 0x5e4   :  { %v6351_v56 = vld [vmem:[#allocation2 + $0xc8] sm:$0x1]  ;;  %v6383_v6 = vld [vmem:[#allocation2 + $0xcf] sm:$0x1] }
 0x5e5   :  { %v6649_v35 = vsel %vm6527_vm11, %v6648_v52, %v6647_v5  ;;  %v6557_v23 = vsel %vm6527_vm11, %v6556_v48, %v6555_v59  ;;  %v6560_v46 = vrot.slane %v6351_v56, 7  ;;  %v6652_v38 = vrot.slane %v6383_v6, 7 }
 0x5e6   :  { %v12576_v0 = vsel %vm6530_vm12, %v6650_v55, %v6649_v35  ;;  %v12579_v43 = vsel %vm6530_vm12, %v6558_v26, %v6557_v23  ;;  %v6350_v33 = vld [vmem:[#allocation2 + $0xc0] sm:$0x1]  ;;  %v6382_v39 = vld [vmem:[#allocation2 + $0xc7] sm:$0x1]  ;;  %v6684_v56 = vadd.f32 %v12426_v34, %v12546_v4 }
 0x5e7   :  { %13848 = vst [vmem:[#allocation6_spill] sm:$0xff] %v12576_v0  ;;  %13849 = vst [vmem:[#allocation4_spill] sm:$0xff] %v12579_v43  ;;  %6727 = vrot.lane.b32.xlu1 %v12576_v0, %s11055_s23  ;;  %6715 = vrot.lane.b32.xlu0 %v12579_v43, %s11055_s23  ;;  %v6561_v42 = vsel %vm6512_vm6, %v6560_v46, %v6350_v33  ;;  %v6653_v10 = vsel %vm6512_vm6, %v6652_v38, %v6382_v39 }
 0x5e8   :  { %v6353_v49 = vld [vmem:[#allocation2 + $0xd8] sm:$0x1]  ;;  %v6385_v50 = vld [vmem:[#allocation2 + $0xdf] sm:$0x1]  ;;  %v6672_v38 = vsel %vm53_vm0, %v12579_v43, %v12576_v0 }
 0x5e9   :  { %v6564_v29 = vrot.slane %v6353_v49, 5  ;;  %v6676_v4 = vsel %vm6390_vm13, %v6672_v38, %v12579_v43  ;;  %v6817_v38 = vld [vmem:[#allocation2 + $0x51] sm:$0x1]  ;;  %v7342_v43 = vld [vmem:[#allocation2 + $0x95] sm:$0x1] }
 0x5ea   :  { %v6352_v12 = vld [vmem:[#allocation2 + $0xd0] sm:$0x1]  ;;  %v6384_v28 = vld [vmem:[#allocation2 + $0xd7] sm:$0x1]  ;;  %v6681_v33 = vsel %vm6678_vm14, %v6676_v4, %v12576_v0 }
 0x5eb   :  { %v6562_v14 = vrot.slane %v6352_v12, 6  ;;  %v6654_v17 = vrot.slane %v6384_v28, 6  ;;  %v10850_v8 = vpop.eup %10849  ;;  %v9652_v28 = vmul.f32 -1.442695, %v6684_v56  ;;  %v6841_v56 = vld [vmem:[#allocation2 + $0x16] sm:$0x1] }
 0x5ec   :  { %v6699_v35 = vadd.f32 1.0, %v10850_v8 }
 0x5ed   :  { %v6563_v45 = vsel %vm6515_vm7, %v6562_v14, %v6561_v42  ;;  %v6655_v3 = vsel %vm6515_vm7, %v6654_v17, %v6653_v10  ;;  %v6685_v14 = vadd.f32 %v6681_v33, %v12444_v57  ;;  %v6844_v33 = vld [vmem:[#allocation2 + $0x2e] sm:$0x1] }
 0x5ee   :  { %v6565_v21 = vsel %vm6518_vm8, %v6564_v29, %v6563_v45  ;;  %10851 = vrcp.f32 %v6699_v35 }
 0x5ef   :  { %10853 = vpow2.f32 %v9652_v28  ;;  %v9653_v39 = vmul.f32 -1.442695, %v6685_v14  ;;  %v6816_v28 = vld [vmem:[#allocation2 + $0x49] sm:$0x1] }
 0x5f0   :  { %v7022_v4 = vrot.slane %v6816_v28, 7 }
 0x5fb   :  { %v12616_v12 = vpop.eup %10851 }
 0x5fc   :  { %v10525_v47 = vpop.f32.mrf.mxu1  ;;  %v10854_v17 = vpop.eup %10853 }
 0x5fd   :  { %v6271_v36 = vadd.f32 %v10525_v47, %v12453_v51 }
 0x5fe   :  { %v6265_v62 = vpop.f32.mrf.mxu1 }
 0x5ff   :  { %6314 = vst.msk [vmem:[#allocation2 + $0xe8] sm:$0xff] %vm6284_vm5, %v6271_v36  ;;  %v6266_v19 = vadd.f32 %v12453_v51, %v6265_v62  ;;  %v6754_v62 = vpop.permute.xlu0 %6753 }
 0x600   :  { %v10528_v9 = vpop.f32.mrf.mxu1 }
 0x601   :  { %6313 = vst.msk [vmem:[#allocation2 + $0xe0] sm:$0xff] %vm6284_vm5, %v6266_v19  ;;  %v6281_v58 = vadd.f32 %v10528_v9, %v12453_v51  ;;  %v6752_v19 = vpop.permute.xlu1 %6751 }
 0x602   :  { %v6275_v7 = vpop.f32.mrf.mxu1 }
 0x603   :  { %6316 = vst.msk [vmem:[#allocation2 + $0xf8] sm:$0xff] %vm6284_vm5, %v6281_v58  ;;  %v6276_v54 = vadd.f32 %v12453_v51, %v6275_v7  ;;  %v6656_v51 = vrot.slane %v6385_v50, 5  ;;  %v6758_v6 = vpop.permute.xlu0 %6757  ;;  %v6763_v58 = vmul.f32 %v12616_v12, %v6752_v19  ;;  %v6700_v50 = vadd.f32 1.0, %v10854_v17  ;;  %v6840_v19 = vld [vmem:[#allocation2 + $0xe] sm:$0x1] }
 0x604   :  { %v6815_v17 = vld [vmem:[#allocation2 + $0x41] sm:$0x1] }
 0x605   :  { %6315 = vst.msk [vmem:[#allocation2 + $0xf0] sm:$0xff] %vm6284_vm5, %v6276_v54  ;;  %v6657_v44 = vsel %vm6518_vm8, %v6656_v51, %v6655_v3  ;;  %v6756_v9 = vpop.permute.xlu1 %6755 }
 0x606   :  { %v6355_v30 = vld [vmem:[#allocation2 + $0xe8] sm:$0x1]  ;;  %v6387_v15 = vld [vmem:[#allocation2 + $0xef] sm:$0x1] }
 0x607   :  { %v6568_v41 = vrot.slane %v6355_v30, 3  ;;  %v6660_v37 = vrot.slane %v6387_v15, 3 }
 0x608   :  { %v6354_v31 = vld [vmem:[#allocation2 + $0xe0] sm:$0x1]  ;;  %v6386_v40 = vld [vmem:[#allocation2 + $0xe7] sm:$0x1] }
 0x609   :  { %v6566_v2 = vrot.slane %v6354_v31, 4  ;;  %v6658_v20 = vrot.slane %v6386_v40, 4 }
 0x60a   :  { %v6357_v63 = vld [vmem:[#allocation2 + $0xf8] sm:$0x1]  ;;  %v6389_v18 = vld [vmem:[#allocation2 + $0xff] sm:$0x1] }
 0x60b   :  { %v6567_v25 = vsel %vm6521_vm9, %v6566_v2, %v6565_v21  ;;  %v6659_v11 = vsel %vm6521_vm9, %v6658_v20, %v6657_v44  ;;  %v6572_v48 = vrot.slane %v6357_v63, 1  ;;  %v6664_v55 = vrot.slane %v6389_v18, 1 }
 0x60c   :  { %v6356_v24 = vld [vmem:[#allocation2 + $0xf0] sm:$0x1]  ;;  %v6388_v60 = vld [vmem:[#allocation2 + $0xf7] sm:$0x1]  ;;  %v6569_v52 = vsel %vm6524_vm10, %v6568_v41, %v6567_v25  ;;  %v6661_v5 = vsel %vm6524_vm10, %v6660_v37, %v6659_v11 }
 0x60d   :  { %v6570_v53 = vrot.slane %v6356_v24, 2  ;;  %v6662_v13 = vrot.slane %v6388_v60, 2 }
 0x60f   :  { %v6571_v59 = vsel %vm6527_vm11, %v6570_v53, %v6569_v52  ;;  %v6663_v26 = vsel %vm6527_vm11, %v6662_v13, %v6661_v5 }
 0x610   :  { %v6573_v23 = vsel %vm6530_vm12, %v6572_v48, %v6571_v59  ;;  %v6665_v1 = vsel %vm6530_vm12, %v6664_v55, %v6663_v26  ;;  %v6775_v55 = vsub.f32 1.0, %v12616_v12  ;;  %v6799_v26 = vmul.f32 0.0, %v12616_v12 }
 0x611   :  { %6717 = vrot.lane.b32.xlu1 %v6573_v23, %s11055_s23  ;;  %v6673_v32 = vsel %vm53_vm0, %v6573_v23, %v6665_v1  ;;  %6729 = vrot.lane.b32.xlu0 %v6665_v1, %s11055_s23  ;;  %v9009_v42 = vsel %vm53_vm0, %v6665_v1, %v6573_v23  ;;  %v7102_v12 = vrot.slane %v6841_v56, 6 }
 0x612   :  { %v6677_v47 = vsel %vm6390_vm13, %v6673_v32, %v6573_v23  ;;  %v9013_v10 = vsel %vm6390_vm13, %v9009_v42, %v6665_v1 }
 0x613   :  { %v6682_v36 = vsel %vm6678_vm14, %v6677_v47, %v6665_v1  ;;  %v12638_v45 = vsel %vm6678_vm14, %v9013_v10, %v6573_v23  ;;  %v6856_v10 = vld [vmem:[#allocation2 + $0x8e] sm:$0x1] }
 0x614   :  { %13852 = vst [vmem:[#allocation12_spill] sm:$0xff] %v12638_v45  ;;  %v6686_v20 = vadd.f32 %v12439_v16, %v6682_v36 }
 0x616   :  { %v9654_v18 = vmul.f32 -1.442695, %v6686_v20  ;;  %v7023_v20 = vsel %vm6512_vm6, %v7022_v4, %v6815_v17 }
 0x624   :  { %v12619_v7 = vpop.permute.xlu1 %6723  ;;  %v12621_v46 = vpop.permute.xlu0 %6711 }
 0x625   :  { %13850 = vst [vmem:[#allocation7_spill] sm:$0xff] %v12619_v7  ;;  %13851 = vst [vmem:[#allocation5_spill] sm:$0xff] %v12621_v46  ;;  %v6735_v54 = vsel %vm53_vm0, %v12621_v46, %v12619_v7  ;;  %v7310_v7 = vld [vmem:[#allocation2 + $0x92] sm:$0x1]  ;;  %v7305_v46 = vld [vmem:[#allocation2 + $0x6a] sm:$0x1] }
 0x626   :  { %v6767_v34 = vadd.f32 %v6763_v58, %v6735_v54  ;;  %v6843_v58 = vld [vmem:[#allocation2 + $0x26] sm:$0x1]  ;;  %v6842_v54 = vld [vmem:[#allocation2 + $0x1e] sm:$0x1] }
 0x627   :  { %v7104_v42 = vrot.slane %v6842_v54, 5  ;;  %v6822_v54 = vld [vmem:[#allocation2 + $0x79] sm:$0x1] }
 0x628   :  { %10855 = vtanh.f32 %v6767_v34 }
 0x629   :  { %10857 = vpow2.f32 %v9653_v39  ;;  %v7106_v39 = vrot.slane %v6843_v58, 4  ;;  %v6861_v58 = vld [vmem:[#allocation2 + $0xb6] sm:$0x1] }
 0x62a   :  { %10859 = vrcp.f32 %v6700_v50  ;;  %v6845_v50 = vld [vmem:[#allocation2 + $0x36] sm:$0x1] }
 0x635   :  { %v10856_v49 = vpop.eup %10855 }
 0x636   :  { %6783 = vrot.lane.b32.xlu1 %v10856_v49, %s11056_s28  ;;  %v10858_v3 = vpop.eup %10857  ;;  %v7024_v49 = vrot.slane %v6817_v38, 6 }
 0x637   :  { %v6701_v31 = vadd.f32 1.0, %v10858_v3  ;;  %v10860_v29 = vpop.eup %10859  ;;  %v6819_v3 = vld [vmem:[#allocation2 + $0x61] sm:$0x1] }
 0x638   :  { %v6764_v57 = vmul.f32 %v10860_v29, %v6754_v62  ;;  %v6776_v1 = vsub.f32 1.0, %v10860_v29  ;;  %v6800_v47 = vmul.f32 0.0, %v10860_v29 }
 0x639   :  { %10861 = vrcp.f32 %v6701_v31  ;;  %v6857_v31 = vld [vmem:[#allocation2 + $0x96] sm:$0x1] }
 0x646   :  { %v12647_v15 = vpop.eup %10861 }
 0x647   :  { %v6765_v21 = vmul.f32 %v12647_v15, %v6756_v9  ;;  %v6839_v9 = vld [vmem:[#allocation2 + $0x6] sm:$0x1]  ;;  %v6777_v29 = vsub.f32 1.0, %v12647_v15 }
 0x649   :  { %v12640_v40 = vpop.permute.xlu1 %6713  ;;  %v12642_v51 = vpop.permute.xlu0 %6725 }
 0x64a   :  { %13853 = vst [vmem:[#allocation3_spill] sm:$0xff] %v12640_v40  ;;  %13854 = vst [vmem:[#allocation8_spill] sm:$0xff] %v12642_v51  ;;  %v6736_v30 = vsel %vm53_vm0, %v12640_v40, %v12642_v51  ;;  %v7337_v51 = vld [vmem:[#allocation2 + $0x6d] sm:$0x1]  ;;  %v7788_v40 = vld [vmem:[#allocation2 + $0x5b] sm:$0x1] }
 0x64b   :  { %v6768_v2 = vadd.f32 %v6764_v57, %v6736_v30  ;;  %v7108_v30 = vrot.slane %v6844_v33, 3 }
 0x64d   :  { %10863 = vtanh.f32 %v6768_v2  ;;  %v6818_v2 = vld [vmem:[#allocation2 + $0x59] sm:$0x1] }
 0x659   :  { %v12651_v44 = vpop.permute.xlu1 %6727  ;;  %v12653_v63 = vpop.permute.xlu0 %6715 }
 0x65a   :  { %13855 = vst [vmem:[#allocation9_spill] sm:$0xff] %v12651_v44  ;;  %13856 = vst [vmem:[#allocation13_spill] sm:$0xff] %v12653_v63  ;;  %v10864_v25 = vpop.eup %10863  ;;  %v6737_v11 = vsel %vm53_vm0, %v12653_v63, %v12651_v44  ;;  %v7303_v63 = vld [vmem:[#allocation2 + $0x5a] sm:$0x1] }
 0x65b   :  { %v6769_v24 = vadd.f32 %v6765_v21, %v6737_v11  ;;  %6785 = vrot.lane.b32.xlu0 %v10864_v25, %s11056_s28  ;;  %v7025_v11 = vsel %vm6515_vm7, %v7024_v49, %v7023_v20  ;;  %v7138_v49 = vrot.slane %v6861_v58, 2  ;;  %v6809_v20 = vld [vmem:[#allocation2 + $0x11] sm:$0x1] }
 0x65d   :  { %10865 = vtanh.f32 %v6769_v24  ;;  %v7128_v24 = vrot.slane %v6856_v10, 7  ;;  %v6862_v10 = vld [vmem:[#allocation2 + $0xbe] sm:$0x1] }
 0x65e   :  { %10867 = vpow2.f32 %v9654_v18  ;;  %v7110_v18 = vrot.slane %v6845_v50, 2  ;;  %v7034_v50 = vrot.slane %v6822_v54, 1 }
 0x66a   :  { %v10866_v41 = vpop.eup %10865 }
 0x66b   :  { %v10868_v60 = vpop.eup %10867  ;;  %6787 = vrot.lane.b32.xlu1 %v10866_v41, %s11056_s28  ;;  %v6801_v41 = vmul.f32 0.0, %v12647_v15 }
 0x66c   :  { %v6702_v16 = vadd.f32 1.0, %v10868_v60 }
 0x66e   :  { %10869 = vrcp.f32 %v6702_v16  ;;  %v7028_v16 = vrot.slane %v6819_v3, 4 }
 0x67b   :  { %v12660_v37 = vpop.eup %10869 }
 0x67c   :  { %v6766_v8 = vmul.f32 %v12660_v37, %v6758_v6  ;;  %v7100_v6 = vrot.slane %v6840_v19, 7 }
 0x67e   :  { %v7101_v34 = vsel %vm6512_vm6, %v7100_v6, %v6839_v9 }
 0x67f   :  { %v7103_v14 = vsel %vm6515_vm7, %v7102_v12, %v7101_v34  ;;  %v6860_v34 = vld [vmem:[#allocation2 + $0xae] sm:$0x1] }
 0x680   :  { %v7105_v57 = vsel %vm6518_vm8, %v7104_v42, %v7103_v14  ;;  %v7136_v42 = vrot.slane %v6860_v34, 3  ;;  %v6802_v34 = vmul.f32 0.0, %v12660_v37 }
 0x681   :  { %v7107_v25 = vsel %vm6521_vm9, %v7106_v39, %v7105_v57  ;;  %v7140_v57 = vrot.slane %v6862_v10, 1 }
 0x683   :  { %v12663_v53 = vpop.permute.xlu1 %6717  ;;  %v12665_v13 = vpop.permute.xlu0 %6729 }
 0x684   :  { %13857 = vst [vmem:[#allocation14_spill] sm:$0xff] %v12663_v53  ;;  %13858 = vst [vmem:[#allocation15_spill] sm:$0xff] %v12665_v13  ;;  %v6738_v52 = vsel %vm53_vm0, %v12663_v53, %v12665_v13  ;;  %v7304_v13 = vld [vmem:[#allocation2 + $0x62] sm:$0x1]  ;;  %v7333_v53 = vld [vmem:[#allocation2 + $0x4d] sm:$0x1] }
 0x685   :  { %v6770_v48 = vadd.f32 %v6766_v8, %v6738_v52  ;;  %v6855_v8 = vld [vmem:[#allocation2 + $0x86] sm:$0x1]  ;;  %v7130_v52 = vrot.slane %v6857_v31, 6  ;;  %v7599_v0 = vrot.slane %v7333_v53, 7 }
 0x686   :  { %v7129_v15 = vsel %vm6512_vm6, %v7128_v24, %v6855_v8  ;;  %v6811_v24 = vld [vmem:[#allocation2 + $0x21] sm:$0x1] }
 0x687   :  { %10871 = vtanh.f32 %v6770_v48  ;;  %v6821_v48 = vld [vmem:[#allocation2 + $0x71] sm:$0x1]  ;;  %v7131_v6 = vsel %vm6515_vm7, %v7130_v52, %v7129_v15  ;;  %v6812_v52 = vld [vmem:[#allocation2 + $0x29] sm:$0x1]  ;;  %v6778_v15 = vsub.f32 1.0, %v12660_v37 }
 0x688   :  { %v7032_v56 = vrot.slane %v6821_v48, 2 }
 0x694   :  { %v10872_v5 = vpop.eup %10871 }
 0x695   :  { %6789 = vrot.lane.b32.xlu0 %v10872_v5, %s11056_s28  ;;  %v7026_v5 = vrot.slane %v6818_v2, 5  ;;  %v6808_v2 = vld [vmem:[#allocation2 + $0x9] sm:$0x1] }
 0x6a8   :  { %v6784_v59 = vpop.permute.xlu1 %6783 }
 0x6a9   :  { %v6795_v35 = vmul.f32 %v6784_v59, %v6775_v55  ;;  %v6859_v55 = vld [vmem:[#allocation2 + $0xa6] sm:$0x1] }
 0x6aa   :  { %v7134_v9 = vrot.slane %v6859_v55, 4  ;;  %v6847_v55 = vld [vmem:[#allocation2 + $0x46] sm:$0x1] }
 0x6ab   :  { %v12673_v23 = vadd.f32 %v6799_v26, %v6795_v35  ;;  %v6846_v26 = vld [vmem:[#allocation2 + $0x3e] sm:$0x1]  ;;  %v7109_v35 = vsel %vm6524_vm10, %v7108_v30, %v7107_v25  ;;  %v6807_v25 = vld [vmem:[#allocation2 + $0x1] sm:$0x1] }
 0x6ac   :  { %v7112_v12 = vrot.slane %v6846_v26, 1 }
 0x6ad   :  { %6875 = vrot.lane.b32.xlu1 %v12673_v23, %s11057_s29 }
 0x6cd   :  { %v6786_v32 = vpop.permute.xlu0 %6785 }
 0x6ce   :  { %v6796_v36 = vmul.f32 %v6786_v32, %v6776_v1  ;;  %v6820_v1 = vld [vmem:[#allocation2 + $0x69] sm:$0x1]  ;;  %v6858_v32 = vld [vmem:[#allocation2 + $0x9e] sm:$0x1] }
 0x6cf   :  { %v7030_v28 = vrot.slane %v6820_v1, 3  ;;  %v7132_v38 = vrot.slane %v6858_v32, 5  ;;  %v6824_v32 = vld [vmem:[#allocation2 + $0x89] sm:$0x1] }
 0x6d0   :  { %v12677_v62 = vadd.f32 %v6800_v47, %v6796_v36  ;;  %v7111_v47 = vsel %vm6527_vm11, %v7110_v18, %v7109_v35  ;;  %v7027_v36 = vsel %vm6518_vm8, %v7026_v5, %v7025_v11  ;;  %v7010_v18 = vrot.slane %v6809_v20, 6  ;;  %v6848_v11 = vld [vmem:[#allocation2 + $0x4e] sm:$0x1]  ;;  %v6813_v35 = vld [vmem:[#allocation2 + $0x31] sm:$0x1] }
 0x6d1   :  { %v7029_v19 = vsel %vm6521_vm9, %v7028_v16, %v7027_v36  ;;  %v12700_v4 = vsel %vm6530_vm12, %v7112_v12, %v7111_v47  ;;  %v7133_v14 = vsel %vm6518_vm8, %v7132_v38, %v7131_v6  ;;  %v7114_v8 = vrot.slane %v6848_v11, 7  ;;  %v6851_v47 = vld [vmem:[#allocation2 + $0x66] sm:$0x1]  ;;  %v6825_v36 = vld [vmem:[#allocation2 + $0x91] sm:$0x1] }
 0x6d2   :  { %6877 = vrot.lane.b32.xlu0 %v12677_v62, %s11057_s29  ;;  %13859 = vst [vmem:[#allocation16_spill] sm:$0xff] %v12700_v4  ;;  %v7031_v33 = vsel %vm6524_vm10, %v7030_v28, %v7029_v19  ;;  %v7135_v17 = vsel %vm6521_vm9, %v7134_v9, %v7133_v14  ;;  %v7014_v5 = vrot.slane %v6811_v24, 4  ;;  %v6850_v6 = vld [vmem:[#allocation2 + $0x5e] sm:$0x1]  ;;  %v7018_v58 = vrot.slane %v6813_v35, 2 }
 0x6d3   :  { %v7033_v39 = vsel %vm6527_vm11, %v7032_v56, %v7031_v33  ;;  %v7137_v31 = vsel %vm6524_vm10, %v7136_v42, %v7135_v17  ;;  %v7016_v56 = vrot.slane %v6812_v52, 3  ;;  %v7115_v9 = vsel %vm6512_vm6, %v7114_v8, %v6847_v55  ;;  %v6827_v42 = vld [vmem:[#allocation2 + $0xa1] sm:$0x1]  ;;  %v6854_v52 = vld [vmem:[#allocation2 + $0x7e] sm:$0x1] }
 0x6d4   :  { %v12709_v3 = vsel %vm6530_vm12, %v7034_v50, %v7033_v39  ;;  %v7036_v54 = vrot.slane %v6824_v32, 7  ;;  %v7120_v14 = vrot.slane %v6851_v47, 4  ;;  %v6823_v39 = vld [vmem:[#allocation2 + $0x81] sm:$0x1]  ;;  %v7038_v17 = vrot.slane %v6825_v36, 6 }
 0x6d5   :  { %v7118_v50 = vrot.slane %v6850_v6, 5  ;;  %v7042_v24 = vrot.slane %v6827_v42, 4  ;;  %v7126_v47 = vrot.slane %v6854_v52, 1 }
 0x6d6   :  { %v7037_v37 = vsel %vm6512_vm6, %v7036_v54, %v6823_v39  ;;  %v12770_v54 = vld [vmem:[%s13783_s1 + $0x38] sm:$0xff] }
 0x6d7   :  { %v7039_v11 = vsel %vm6515_vm7, %v7038_v17, %v7037_v37 }
 0x6dd   :  { %v6788_v21 = vpop.permute.xlu1 %6787 }
 0x6de   :  { %v6797_v60 = vmul.f32 %v6788_v21, %v6777_v29  ;;  %v7139_v29 = vsel %vm6527_vm11, %v7138_v49, %v7137_v31  ;;  %v7008_v21 = vrot.slane %v6808_v2, 7  ;;  %v6853_v49 = vld [vmem:[#allocation2 + $0x76] sm:$0x1]  ;;  %v6814_v31 = vld [vmem:[#allocation2 + $0x39] sm:$0x1] }
 0x6df   :  { %v12716_v30 = vsel %vm6530_vm12, %v7140_v57, %v7139_v29  ;;  %v6852_v57 = vld [vmem:[#allocation2 + $0x6e] sm:$0x1]  ;;  %v6826_v2 = vld [vmem:[#allocation2 + $0x99] sm:$0x1] }
 0x6e0   :  { %v12689_v59 = vadd.f32 %v6801_v41, %v6797_v60  ;;  %13860 = vst [vmem:[#allocation17_spill] sm:$0xff] %v12716_v30  ;;  %v6849_v41 = vld [vmem:[#allocation2 + $0x56] sm:$0x1]  ;;  %v6810_v60 = vld [vmem:[#allocation2 + $0x19] sm:$0x1]  ;;  %v7009_v16 = vsel %vm6512_vm6, %v7008_v21, %v6807_v25  ;;  %v7040_v8 = vrot.slane %v6826_v2, 5 }
 0x6e1   :  { %v7011_v48 = vsel %vm6515_vm7, %v7010_v18, %v7009_v16  ;;  %v7116_v26 = vrot.slane %v6849_v41, 6  ;;  %v7012_v1 = vrot.slane %v6810_v60, 5  ;;  %v7124_v18 = vrot.slane %v6853_v49, 2  ;;  %v6829_v16 = vld [vmem:[#allocation2 + $0xb1] sm:$0x1] }
 0x6e2   :  { %6879 = vrot.lane.b32.xlu1 %v12689_v59, %s11057_s29  ;;  %v7020_v41 = vrot.slane %v6814_v31, 1  ;;  %v7122_v60 = vrot.slane %v6852_v57, 3  ;;  %v7046_v32 = vrot.slane %v6829_v16, 2  ;;  %v6864_v31 = vld [vmem:[#allocation2 + $0xce] sm:$0x1] }
 0x6e3   :  { %v7013_v19 = vsel %vm6518_vm8, %v7012_v1, %v7011_v48  ;;  %v7117_v38 = vsel %vm6515_vm7, %v7116_v26, %v7115_v9  ;;  %v6828_v48 = vld [vmem:[#allocation2 + $0xa9] sm:$0x1]  ;;  %v7041_v26 = vsel %vm6518_vm8, %v7040_v8, %v7039_v11  ;;  %v6833_v2 = vld [vmem:[#allocation2 + $0xd1] sm:$0x1]  ;;  %v6831_v11 = vld [vmem:[#allocation2 + $0xc1] sm:$0x1] }
 0x6e4   :  { %v7015_v28 = vsel %vm6521_vm9, %v7014_v5, %v7013_v19  ;;  %v7119_v21 = vsel %vm6518_vm8, %v7118_v50, %v7117_v38  ;;  %v7043_v1 = vsel %vm6521_vm9, %v7042_v24, %v7041_v26  ;;  %v7044_v36 = vrot.slane %v6828_v48, 3  ;;  %v12764_v38 = vld [vmem:[%s13783_s1 + $0x40] sm:$0xff]  ;;  %v6832_v57 = vld [vmem:[#allocation2 + $0xc9] sm:$0x1]  ;;  %v6866_v24 = vld [vmem:[#allocation2 + $0xde] sm:$0x1] }
 0x6e5   :  { %v7017_v29 = vsel %vm6524_vm10, %v7016_v56, %v7015_v28  ;;  %v7121_v25 = vsel %vm6521_vm9, %v7120_v14, %v7119_v21  ;;  %v6863_v21 = vld [vmem:[#allocation2 + $0xc6] sm:$0x1]  ;;  %v6834_v8 = vld [vmem:[#allocation2 + $0xd9] sm:$0x1] }
 0x6e6   :  { %7212 = vrot.lane.b32.xlu1 %v12700_v4, %s11055_s23  ;;  %v7019_v20 = vsel %vm6527_vm11, %v7018_v58, %v7017_v29  ;;  %v7123_v55 = vsel %vm6524_vm10, %v7122_v60, %v7121_v25  ;;  %v7045_v56 = vsel %vm6524_vm10, %v7044_v36, %v7043_v1  ;;  %v6865_v29 = vld [vmem:[#allocation2 + $0xd6] sm:$0x1]  ;;  %v6867_v25 = vld [vmem:[#allocation2 + $0xe6] sm:$0x1]  ;;  %v6835_v60 = vld [vmem:[#allocation2 + $0xe1] sm:$0x1] }
 0x6e7   :  { %v12739_v5 = vsel %vm6530_vm12, %v7020_v41, %v7019_v20  ;;  %v7125_v35 = vsel %vm6527_vm11, %v7124_v18, %v7123_v55  ;;  %v7047_v6 = vsel %vm6527_vm11, %v7046_v32, %v7045_v56  ;;  %v7142_v20 = vrot.slane %v6864_v31, 7  ;;  %v6869_v55 = vld [vmem:[#allocation2 + $0xf6] sm:$0x1]  ;;  %v6868_v1 = vld [vmem:[#allocation2 + $0xee] sm:$0x1] }
 0x6e8   :  { %v12748_v19 = vsel %vm6530_vm12, %v7126_v47, %v7125_v35  ;;  %v7144_v37 = vrot.slane %v6865_v29, 6  ;;  %v7050_v18 = vrot.slane %v6832_v57, 7  ;;  %v7052_v41 = vrot.slane %v6833_v2, 6  ;;  %v6837_v36 = vld [vmem:[#allocation2 + $0xf1] sm:$0x1] }
 0x6e9   :  { %v7143_v16 = vsel %vm6512_vm6, %v7142_v20, %v6863_v21  ;;  %v7148_v48 = vrot.slane %v6867_v25, 4  ;;  %v7146_v35 = vrot.slane %v6866_v24, 5  ;;  %v7056_v47 = vrot.slane %v6835_v60, 4  ;;  %v6838_v21 = vld [vmem:[#allocation2 + $0xf9] sm:$0x1] }
 0x6ea   :  { %7202 = vrot.lane.b32.xlu1 %v12709_v3, %s11055_s23  ;;  %v7145_v52 = vsel %vm6515_vm7, %v7144_v37, %v7143_v16  ;;  %v7051_v26 = vsel %vm6512_vm6, %v7050_v18, %v6831_v11  ;;  %v7060_v31 = vrot.slane %v6837_v36, 2 }
 0x6eb   :  { %v7053_v32 = vsel %vm6515_vm7, %v7052_v41, %v7051_v26  ;;  %v7147_v56 = vsel %vm6518_vm8, %v7146_v35, %v7145_v52  ;;  %v7062_v41 = vrot.slane %v6838_v21, 1  ;;  %v7160_v52 = vsel %vm53_vm0, %v12739_v5, %v12700_v4 }
 0x6ee   :  { %7216 = vrot.lane.b32.xlu1 %v12716_v30, %s11055_s23 }
 0x707   :  { %v6790_v12 = vpop.permute.xlu0 %6789 }
 0x708   :  { %v6798_v33 = vmul.f32 %v6790_v12, %v6778_v15  ;;  %v6830_v15 = vld [vmem:[#allocation2 + $0xb9] sm:$0x1] }
 0x709   :  { %v7048_v9 = vrot.slane %v6830_v15, 1  ;;  %v7054_v15 = vrot.slane %v6834_v8, 5  ;;  %v7161_v8 = vsel %vm53_vm0, %v12709_v3, %v12748_v19 }
 0x70a   :  { %v12728_v10 = vadd.f32 %v6802_v34, %v6798_v33  ;;  %v12777_v34 = vld [vmem:[%s13783_s1 + $0x30] sm:$0xff]  ;;  %v12784_v33 = vld [vmem:[%s13783_s1 + $0x28] sm:$0xff] }
 0x70b   :  { %v12755_v12 = vsel %vm6530_vm12, %v7048_v9, %v7047_v6  ;;  %v6836_v6 = vld [vmem:[#allocation2 + $0xe9] sm:$0x1]  ;;  %v7149_v9 = vsel %vm6521_vm9, %v7148_v48, %v7147_v56  ;;  %v7165_v48 = vsel %vm6390_vm13, %v7161_v8, %v12709_v3 }
 0x70c   :  { %6881 = vrot.lane.b32.xlu0 %v12728_v10, %s11057_s29  ;;  %13861 = vst [vmem:[#allocation18_spill] sm:$0xff] %v12755_v12  ;;  %v7058_v57 = vrot.slane %v6836_v6, 3  ;;  %v7169_v26 = vsel %vm6678_vm14, %v7165_v48, %v12748_v19 }
 0x710   :  { %7200 = vrot.lane.b32.xlu0 %v12739_v5, %s11055_s23 }
 0x714   :  { %7214 = vrot.lane.b32.xlu0 %v12748_v19, %s11055_s23 }
 0x718   :  { %7204 = vrot.lane.b32.xlu0 %v12755_v12, %s11055_s23 }
 0x71f   :  { %v6876_v28 = vpop.permute.xlu1 %6875 }
 0x720   :  { %10551 = vmatprep.mubr.msk.f32.mxu1 %vm6390_vm13, %v6876_v28  ;;  %v7152_v28 = vrot.slane %v6869_v55, 2  ;;  %v7164_v55 = vsel %vm6390_vm13, %v7160_v52, %v12739_v5 }
 0x744   :  { %v6878_v58 = vpop.permute.xlu0 %6877 }
 0x745   :  { %10552 = vmatmul.mubr.msk.f32.vlgmr.msra.gmra.mxu1 %vm6390_vm13, %v6878_v58 }
 0x746   :  { %10572 = vmatpush3.msra.mxu1 %v12764_v38 }
 0x747   :  { %10573 = vmatprep.subr.mxu1 %v12770_v54 }
 0x748   :  { %10574 = vmatpush3.msra.mxu1 %v12770_v54 }
 0x749   :  { %10575 = vmatprep.subr.mxu1 %v12777_v34 }
 0x74a   :  { %10576 = vmatpush3.msra.mxu1 %v12777_v34 }
 0x74b   :  { %10577 = vmatprep.subr.mxu1 %v12784_v33 }
 0x74c   :  { %10578 = vmatpush3.msra.mxu1 %v12784_v33 }
 0x74d   :  { %10599 = vmatprep.subr.mxu1 %v12764_v38 }
 0x754   :  { %v6880_v14 = vpop.permute.xlu1 %6879 }
 0x755   :  { %10554 = vmatprep.mubr.msk.f32.mxu1 %vm6390_vm13, %v6880_v14  ;;  %v7055_v14 = vsel %vm6518_vm8, %v7054_v15, %v7053_v32 }
 0x77e   :  { %v6882_v39 = vpop.permute.xlu0 %6881 }
 0x77f   :  { %10555 = vmatmul.mubr.msk.f32.gmra.mxu1 %vm6390_vm13, %v6882_v39  ;;  %v7150_v39 = vrot.slane %v6868_v1, 3  ;;  %v7168_v1 = vsel %vm6678_vm14, %v7164_v55, %v12700_v4 }
 0x781   :  { %v7151_v2 = vsel %vm6524_vm10, %v7150_v39, %v7149_v9 }
 0x782   :  { %v7153_v37 = vsel %vm6527_vm11, %v7152_v28, %v7151_v2  ;;  %v12846_v9 = vpop.permute.xlu0 %7200 }
 0x783   :  { %13864 = vst [vmem:[#allocation21_spill] sm:$0xff] %v12846_v9 }
 0x805   :  { %v12791_v17 = vpop.f32.mrf.mxu1 }
 0x806   :  { %v7229_v49 = vadd.f32 %v12791_v17, %v12428_v61  ;;  %v7173_v35 = vadd.f32 %v12791_v17, %v7169_v26  ;;  %v12850_v17 = vpop.permute.xlu0 %7214 }
 0x807   :  { %v12795_v50 = vpop.f32.mrf.mxu1  ;;  %13866 = vst [vmem:[#allocation23_spill] sm:$0xff] %v12850_v17 }
 0x808   :  { %v7228_v42 = vadd.f32 %v12795_v50, %v12428_v61  ;;  %7238 = vrot.lane.b32.xlu0 %v7229_v49, %s11055_s23  ;;  %v6870_v49 = vld [vmem:[#allocation2 + $0xfe] sm:$0x1]  ;;  %v7172_v32 = vadd.f32 %v7168_v1, %v12795_v50 }
 0x809   :  { %v7154_v11 = vrot.slane %v6870_v49, 1 }
 0x80a   :  { %7236 = vrot.lane.b32.xlu1 %v7228_v42, %s11055_s23  ;;  %v7057_v42 = vsel %vm6521_vm9, %v7056_v47, %v7055_v14  ;;  %v9660_v47 = vmul.f32 -1.442695, %v7173_v35  ;;  %v9659_v36 = vmul.f32 -1.442695, %v7172_v32  ;;  %v12848_v14 = vpop.permute.xlu1 %7212  ;;  %v12854_v49 = vpop.permute.xlu0 %7204 }
 0x80b   :  { %v7059_v18 = vsel %vm6524_vm10, %v7058_v57, %v7057_v42  ;;  %v12821_v60 = vsel %vm6530_vm12, %v7154_v11, %v7153_v37  ;;  %13865 = vst [vmem:[#allocation22_spill] sm:$0xff] %v12848_v14  ;;  %13868 = vst [vmem:[#allocation25_spill] sm:$0xff] %v12854_v49 }
 0x80c   :  { %v7061_v24 = vsel %vm6527_vm11, %v7060_v31, %v7059_v18  ;;  %13862 = vst [vmem:[#allocation19_spill] sm:$0xff] %v12821_v60  ;;  %10873 = vpow2.f32 %v9660_v47  ;;  %v7224_v18 = vsel %vm53_vm0, %v12846_v9, %v12848_v14  ;;  %v7838_v9 = vld [vmem:[#allocation2 + $0xec] sm:$0x1] }
 0x80d   :  { %v12826_v16 = vsel %vm6530_vm12, %v7062_v41, %v7061_v24  ;;  %10875 = vpow2.f32 %v9659_v36  ;;  %v7162_v24 = vsel %vm53_vm0, %v12755_v12, %v12716_v30 }
 0x80e   :  { %13863 = vst [vmem:[#allocation20_spill] sm:$0xff] %v12826_v16  ;;  %v12852_v39 = vpop.permute.xlu1 %7202  ;;  %v7163_v41 = vsel %vm53_vm0, %v12826_v16, %v12821_v60  ;;  %v7166_v8 = vsel %vm6390_vm13, %v7162_v24, %v12755_v12 }
 0x80f   :  { %13867 = vst [vmem:[#allocation24_spill] sm:$0xff] %v12852_v39  ;;  %v7225_v2 = vsel %vm53_vm0, %v12852_v39, %v12850_v17  ;;  %v7167_v52 = vsel %vm6390_vm13, %v7163_v41, %v12826_v16  ;;  %v7170_v48 = vsel %vm6678_vm14, %v7166_v8, %v12716_v30  ;;  %v7825_v30 = vld [vmem:[#allocation2 + $0x84] sm:$0x1]  ;;  %v7807_v17 = vld [vmem:[#allocation2 + $0xf3] sm:$0x1] }
 0x810   :  { %v7171_v1 = vsel %vm6678_vm14, %v7167_v52, %v12821_v60 }
 0x812   :  { %v12856_v50 = vpop.permute.xlu1 %7216 }
 0x813   :  { %13869 = vst [vmem:[#allocation26_spill] sm:$0xff] %v12856_v50 }
 0x819   :  { %v10874_v15 = vpop.eup %10873 }
 0x81a   :  { %v10876_v56 = vpop.eup %10875  ;;  %v7189_v6 = vadd.f32 1.0, %v10874_v15 }
 0x81b   :  { %v7188_v28 = vadd.f32 1.0, %v10876_v56 }
 0x81c   :  { %10877 = vrcp.f32 %v7189_v6 }
 0x81d   :  { %10879 = vrcp.f32 %v7188_v28 }
 0x829   :  { %v10878_v42 = vpop.eup %10877 }
 0x82a   :  { %v10880_v57 = vpop.eup %10879 }
 0x83f   :  { %v12807_v58 = vpop.f32.mrf.mxu1 }
 0x840   :  { %v7231_v29 = vadd.f32 %v12807_v58, %v12428_v61  ;;  %v7175_v32 = vadd.f32 %v12807_v58, %v7171_v1  ;;  %v7226_v58 = vsel %vm53_vm0, %v12854_v49, %v12856_v50  ;;  %v7260_v1 = vsub.f32 1.0, %v10880_v57 }
 0x841   :  { %v6967_v20 = vpop.f32.mrf.mxu1 }
 0x842   :  { %v7230_v25 = vadd.f32 %v6967_v20, %v12428_v61  ;;  %7242 = vrot.lane.b32.xlu0 %v7231_v29, %s11055_s23  ;;  %v7174_v26 = vadd.f32 %v7170_v48, %v6967_v20  ;;  %v9662_v36 = vmul.f32 -1.442695, %v7175_v32  ;;  %v7261_v48 = vsub.f32 1.0, %v10878_v42 }
 0x844   :  { %7240 = vrot.lane.b32.xlu1 %v7230_v25, %s11055_s23  ;;  %v9661_v47 = vmul.f32 -1.442695, %v7174_v26  ;;  %v7285_v26 = vmul.f32 %v10878_v42, %v12677_v62  ;;  %v7324_v62 = vld [vmem:[#allocation2 + $0x5] sm:$0x1] }
 0x846   :  { %7218 = vrot.lane.b32.xlu0 %v12821_v60, %s11055_s23 }
 0x848   :  { %7206 = vrot.lane.b32.xlu1 %v12826_v16, %s11055_s23 }
 0x87a   :  { %v7239_v31 = vpop.permute.xlu0 %7238 }
 0x87b   :  { %v7249_v29 = vmul.f32 %v10878_v42, %v7239_v31 }
 0x87c   :  { %v7237_v21 = vpop.permute.xlu1 %7236 }
 0x87d   :  { %v7253_v37 = vadd.f32 %v7249_v29, %v7225_v2  ;;  %v7248_v25 = vmul.f32 %v10880_v57, %v7237_v21 }
 0x87f   :  { %10881 = vtanh.f32 %v7253_v37  ;;  %v7252_v11 = vadd.f32 %v7248_v25, %v7224_v18 }
 0x881   :  { %10883 = vtanh.f32 %v7252_v11 }
 0x882   :  { %10885 = vpow2.f32 %v9661_v47 }
 0x883   :  { %10887 = vpow2.f32 %v9662_v36  ;;  %v7284_v36 = vmul.f32 %v10880_v57, %v12673_v23  ;;  %v7292_v57 = vld [vmem:[#allocation2 + $0x2] sm:$0x1] }
 0x88c   :  { %v10882_v55 = vpop.eup %10881 }
 0x88d   :  { %7270 = vrot.lane.b32.xlu0 %v10882_v55, %s11056_s28 }
 0x88e   :  { %v10884_v35 = vpop.eup %10883 }
 0x88f   :  { %7268 = vrot.lane.b32.xlu1 %v10884_v35, %s11056_s28  ;;  %v10886_v15 = vpop.eup %10885 }
 0x890   :  { %v10888_v56 = vpop.eup %10887  ;;  %v7190_v6 = vadd.f32 1.0, %v10886_v15 }
 0x891   :  { %v7191_v28 = vadd.f32 1.0, %v10888_v56 }
 0x892   :  { %10889 = vrcp.f32 %v7190_v6  ;;  %v7325_v6 = vld [vmem:[#allocation2 + $0xd] sm:$0x1] }
 0x893   :  { %10891 = vrcp.f32 %v7191_v28  ;;  %v7326_v28 = vld [vmem:[#allocation2 + $0x15] sm:$0x1] }
 0x894   :  { %v7587_v42 = vrot.slane %v7326_v28, 6 }
 0x89f   :  { %v12881_v31 = vpop.eup %10889 }
 0x8a0   :  { %v12887_v21 = vpop.eup %10891  ;;  %v7286_v53 = vmul.f32 %v12881_v31, %v12689_v59 }
 0x8b4   :  { %v7243_v20 = vpop.permute.xlu0 %7242 }
 0x8b5   :  { %v7251_v25 = vmul.f32 %v12887_v21, %v7243_v20  ;;  %v7585_v20 = vrot.slane %v7325_v6, 7 }
 0x8b6   :  { %v7241_v29 = vpop.permute.xlu1 %7240 }
 0x8b7   :  { %v7250_v2 = vmul.f32 %v12881_v31, %v7241_v29  ;;  %v7293_v29 = vld [vmem:[#allocation2 + $0xa] sm:$0x1]  ;;  %v7586_v23 = vsel %vm6512_vm6, %v7585_v20, %v7324_v62 }
 0x8b8   :  { %v12890_v18 = vpop.permute.xlu0 %7218 }
 0x8b9   :  { %v7254_v37 = vadd.f32 %v7250_v2, %v7226_v58  ;;  %13870 = vst [vmem:[#allocation27_spill] sm:$0xff] %v12890_v18  ;;  %v7328_v2 = vld [vmem:[#allocation2 + $0x25] sm:$0x1]  ;;  %v7294_v58 = vld [vmem:[#allocation2 + $0x12] sm:$0x1] }
 0x8ba   :  { %v12892_v11 = vpop.permute.xlu1 %7206 }
 0x8bb   :  { %13871 = vst [vmem:[#allocation28_spill] sm:$0xff] %v12892_v11  ;;  %10893 = vtanh.f32 %v7254_v37  ;;  %v7227_v24 = vsel %vm53_vm0, %v12892_v11, %v12890_v18  ;;  %v7327_v37 = vld [vmem:[#allocation2 + $0x1d] sm:$0x1]  ;;  %v7996_v18 = vrot.slane %v7788_v40, 5 }
 0x8bc   :  { %v7255_v41 = vadd.f32 %v7251_v25, %v7227_v24  ;;  %v7493_v25 = vrot.slane %v7293_v29, 7  ;;  %v7330_v24 = vld [vmem:[#allocation2 + $0x35] sm:$0x1] }
 0x8be   :  { %10895 = vtanh.f32 %v7255_v41  ;;  %v7588_v41 = vsel %vm6515_vm7, %v7587_v42, %v7586_v23  ;;  %v7494_v6 = vsel %vm6512_vm6, %v7493_v25, %v7292_v57  ;;  %v7300_v42 = vld [vmem:[#allocation2 + $0x42] sm:$0x1] }
 0x8c8   :  { %v10894_v8 = vpop.eup %10893 }
 0x8c9   :  { %7272 = vrot.lane.b32.xlu1 %v10894_v8, %s11056_s28  ;;  %v7591_v8 = vrot.slane %v7328_v2, 4 }
 0x8cb   :  { %v10896_v52 = vpop.eup %10895 }
 0x8cc   :  { %7274 = vrot.lane.b32.xlu0 %v10896_v52, %s11056_s28  ;;  %v7495_v52 = vrot.slane %v7294_v58, 6  ;;  %v7331_v58 = vld [vmem:[#allocation2 + $0x3d] sm:$0x1] }
 0x8ce   :  { %v7496_v62 = vsel %vm6515_vm7, %v7495_v52, %v7494_v6 }
 0x8ff   :  { %v7271_v55 = vpop.permute.xlu0 %7270 }
 0x900   :  { %v7281_v35 = vmul.f32 %v7271_v55, %v7261_v48  ;;  %v7301_v48 = vld [vmem:[#allocation2 + $0x4a] sm:$0x1]  ;;  %v7589_v55 = vrot.slane %v7327_v37, 5 }
 0x901   :  { %v7269_v32 = vpop.permute.xlu1 %7268  ;;  %v7507_v28 = vrot.slane %v7301_v48, 7  ;;  %v7297_v37 = vld [vmem:[#allocation2 + $0x2a] sm:$0x1]  ;;  %v7597_v48 = vrot.slane %v7331_v58, 1 }
 0x902   :  { %v12900_v47 = vadd.f32 %v7285_v26, %v7281_v35  ;;  %v7280_v15 = vmul.f32 %v7269_v32, %v7260_v1  ;;  %v7296_v26 = vld [vmem:[#allocation2 + $0x22] sm:$0x1]  ;;  %v7302_v35 = vld [vmem:[#allocation2 + $0x52] sm:$0x1]  ;;  %v7329_v1 = vld [vmem:[#allocation2 + $0x2d] sm:$0x1] }
 0x903   :  { %v7295_v32 = vld [vmem:[#allocation2 + $0x1a] sm:$0x1]  ;;  %v7499_v29 = vrot.slane %v7296_v26, 4  ;;  %v7509_v2 = vrot.slane %v7302_v35, 6  ;;  %v7593_v23 = vrot.slane %v7329_v1, 3  ;;  %v7508_v25 = vsel %vm6512_vm6, %v7507_v28, %v7300_v42 }
 0x904   :  { %v12903_v56 = vadd.f32 %v7284_v36, %v7280_v15  ;;  %7362 = vrot.lane.b32.xlu0 %v12900_v47, %s11057_s29  ;;  %v7590_v36 = vsel %vm6518_vm8, %v7589_v55, %v7588_v41  ;;  %v7595_v15 = vrot.slane %v7330_v24, 2  ;;  %v7497_v44 = vrot.slane %v7295_v32, 5  ;;  %v7298_v24 = vld [vmem:[#allocation2 + $0x32] sm:$0x1]  ;;  %v12916_v55 = vld [vmem:[#allocation2 + $0x3a] sm:$0x1] }
 0x905   :  { %v7592_v20 = vsel %vm6521_vm9, %v7591_v8, %v7590_v36  ;;  %v7334_v8 = vld [vmem:[#allocation2 + $0x55] sm:$0x1]  ;;  %v7510_v35 = vsel %vm6515_vm7, %v7509_v2, %v7508_v25  ;;  %v7332_v1 = vld [vmem:[#allocation2 + $0x45] sm:$0x1]  ;;  %v7335_v32 = vld [vmem:[#allocation2 + $0x5d] sm:$0x1] }
 0x906   :  { %7360 = vrot.lane.b32.xlu1 %v12903_v56, %s11057_s29  ;;  %v7594_v41 = vsel %vm6524_vm10, %v7593_v23, %v7592_v20  ;;  %v7498_v57 = vsel %vm6518_vm8, %v7497_v44, %v7496_v62  ;;  %v7341_v36 = vld [vmem:[#allocation2 + $0x8d] sm:$0x1]  ;;  %v7501_v6 = vrot.slane %v7297_v37, 3  ;;  %v7511_v20 = vrot.slane %v7303_v63, 5  ;;  %v7336_v42 = vld [vmem:[#allocation2 + $0x65] sm:$0x1] }
 0x907   :  { %v7596_v52 = vsel %vm6527_vm11, %v7595_v15, %v7594_v41  ;;  %v7500_v26 = vsel %vm6521_vm9, %v7499_v29, %v7498_v57  ;;  %v7513_v23 = vrot.slane %v7304_v13, 4  ;;  %v7262_v44 = vsub.f32 1.0, %v12881_v31  ;;  %v7306_v41 = vld [vmem:[#allocation2 + $0x72] sm:$0x1]  ;;  %v7309_v13 = vld [vmem:[#allocation2 + $0x8a] sm:$0x1] }
 0x908   :  { %v7503_v62 = vrot.slane %v7298_v24, 2  ;;  %v7601_v15 = vrot.slane %v7334_v8, 6  ;;  %v12926_v29 = vsel %vm6530_vm12, %v7597_v48, %v7596_v52  ;;  %v7502_v2 = vsel %vm6524_vm10, %v7501_v6, %v7500_v26  ;;  %v7340_v25 = vld [vmem:[#allocation2 + $0x85] sm:$0x1]  ;;  %v7343_v31 = vld [vmem:[#allocation2 + $0x9d] sm:$0x1] }
 0x909   :  { %v7512_v37 = vsel %vm6518_vm8, %v7511_v20, %v7510_v35  ;;  %v7613_v63 = vrot.slane %v7341_v36, 7  ;;  %v7603_v24 = vrot.slane %v7335_v32, 5  ;;  %v7615_v28 = vrot.slane %v7342_v43, 6  ;;  %v7344_v6 = vld [vmem:[#allocation2 + $0xa5] sm:$0x1] }
 0x90a   :  { %v7263_v8 = vsub.f32 1.0, %v12887_v21  ;;  %v7514_v52 = vsel %vm6521_vm9, %v7513_v23, %v7512_v37  ;;  %v7600_v48 = vsel %vm6512_vm6, %v7599_v0, %v7332_v1  ;;  %v7605_v26 = vrot.slane %v7336_v42, 4  ;;  %v7308_v37 = vld [vmem:[#allocation2 + $0x82] sm:$0x1]  ;;  %v7307_v42 = vld [vmem:[#allocation2 + $0x7a] sm:$0x1] }
 0x90b   :  { %v7517_v20 = vrot.slane %v7306_v41, 2  ;;  %v7602_v59 = vsel %vm6515_vm7, %v7601_v15, %v7600_v48  ;;  %v7521_v32 = vrot.slane %v7309_v13, 7  ;;  %v7287_v43 = vmul.f32 %v12887_v21, %v12728_v10  ;;  %v7312_v13 = vld [vmem:[#allocation2 + $0xa2] sm:$0x1] }
 0x90c   :  { %v7614_v23 = vsel %vm6512_vm6, %v7613_v63, %v7340_v25  ;;  %v7523_v0 = vrot.slane %v7310_v7, 6  ;;  %v7504_v1 = vsel %vm6527_vm11, %v7503_v62, %v7502_v2  ;;  %v7515_v41 = vrot.slane %v7305_v46, 3  ;;  %v7311_v25 = vld [vmem:[#allocation2 + $0x9a] sm:$0x1]  ;;  %v7345_v62 = vld [vmem:[#allocation2 + $0xad] sm:$0x1] }
 0x90d   :  { %v7616_v15 = vsel %vm6515_vm7, %v7615_v28, %v7614_v23  ;;  %v7604_v10 = vsel %vm6518_vm8, %v7603_v24, %v7602_v59  ;;  %v7607_v21 = vrot.slane %v7337_v51, 3  ;;  %v7617_v63 = vrot.slane %v7343_v31, 5  ;;  %v7314_v59 = vld [vmem:[#allocation2 + $0xb2] sm:$0x1] }
 0x90e   :  { %v7516_v7 = vsel %vm6524_vm10, %v7515_v41, %v7514_v52  ;;  %v7606_v48 = vsel %vm6521_vm9, %v7605_v26, %v7604_v10  ;;  %v7522_v46 = vsel %vm6512_vm6, %v7521_v32, %v7308_v37  ;;  %v7527_v24 = vrot.slane %v7312_v13, 4  ;;  %v7339_v32 = vld [vmem:[#allocation2 + $0x7d] sm:$0x1] }
 0x90f   :  { %v7518_v28 = vsel %vm6527_vm11, %v7517_v20, %v7516_v7  ;;  %v7618_v2 = vsel %vm6518_vm8, %v7617_v63, %v7616_v15  ;;  %v7524_v51 = vsel %vm6515_vm7, %v7523_v0, %v7522_v46  ;;  %v7519_v52 = vrot.slane %v7307_v42, 1  ;;  %v7347_v0 = vld [vmem:[#allocation2 + $0xbd] sm:$0x1] }
 0x910   :  { %v7525_v31 = vrot.slane %v7311_v25, 5  ;;  %v7608_v37 = vsel %vm6524_vm10, %v7607_v21, %v7606_v48  ;;  %v7625_v21 = vrot.slane %v7347_v0, 1  ;;  %v7348_v0 = vld [vmem:[#allocation2 + $0xc5] sm:$0x1] }
 0x911   :  { %v12965_v23 = vsel %vm6530_vm12, %v7519_v52, %v7518_v28 }
 0x912   :  { %v7526_v42 = vsel %vm6518_vm8, %v7525_v31, %v7524_v51 }
 0x93b   :  { %v7273_v58 = vpop.permute.xlu1 %7272 }
 0x93c   :  { %v7282_v57 = vmul.f32 %v7273_v58, %v7262_v44  ;;  %v7338_v58 = vld [vmem:[#allocation2 + $0x75] sm:$0x1] }
 0x93e   :  { %v12935_v35 = vadd.f32 %v7286_v53, %v7282_v57  ;;  %v7275_v36 = vpop.permute.xlu0 %7274  ;;  %v7619_v53 = vrot.slane %v7344_v6, 4 }
 0x93f   :  { %v7283_v44 = vmul.f32 %v7275_v36, %v7263_v8  ;;  %v7346_v8 = vld [vmem:[#allocation2 + $0xb5] sm:$0x1]  ;;  %v7609_v36 = vrot.slane %v7338_v58, 2  ;;  %v13872_v58 = vrot.slane %v12916_v55, 1  ;;  %v7528_v55 = vsel %vm6521_vm9, %v7527_v24, %v7526_v42 }
 0x940   :  { %7364 = vrot.lane.b32.xlu1 %v12935_v35, %s11057_s29  ;;  %v7620_v26 = vsel %vm6521_vm9, %v7619_v53, %v7618_v2  ;;  %v7623_v6 = vrot.slane %v7346_v8, 2  ;;  %v7531_v53 = vrot.slane %v7314_v59, 2  ;;  %v7315_v8 = vld [vmem:[#allocation2 + $0xba] sm:$0x1] }
 0x941   :  { %v12945_v57 = vadd.f32 %v7287_v43, %v7283_v44  ;;  %v7621_v43 = vrot.slane %v7345_v62, 3  ;;  %v7313_v44 = vld [vmem:[#allocation2 + $0xaa] sm:$0x1]  ;;  %v12962_v20 = vsel %vm6530_vm12, %v13872_v58, %v7504_v1  ;;  %v7610_v41 = vsel %vm6527_vm11, %v7609_v36, %v7608_v37  ;;  %v7318_v58 = vld [vmem:[#allocation2 + $0xd2] sm:$0x1] }
 0x942   :  { %v7611_v1 = vrot.slane %v7339_v32, 1  ;;  %v7529_v10 = vrot.slane %v7313_v44, 3  ;;  %v7533_v36 = vrot.slane %v7315_v8, 1  ;;  %v7349_v32 = vld [vmem:[#allocation2 + $0xcd] sm:$0x1] }
 0x943   :  { %7366 = vrot.lane.b32.xlu0 %v12945_v57, %s11057_s29  ;;  %v7622_v15 = vsel %vm6524_vm10, %v7621_v43, %v7620_v26  ;;  %v7350_v43 = vld [vmem:[#allocation2 + $0xd5] sm:$0x1]  ;;  %v7317_v44 = vld [vmem:[#allocation2 + $0xca] sm:$0x1]  ;;  %v7627_v37 = vrot.slane %v7349_v32, 7 }
 0x944   :  { %7697 = vrot.lane.b32.xlu1 %v12926_v29, %s11055_s23  ;;  %v7624_v13 = vsel %vm6527_vm11, %v7623_v6, %v7622_v15  ;;  %v12978_v63 = vsel %vm6530_vm12, %v7611_v1, %v7610_v41  ;;  %v7530_v25 = vsel %vm6524_vm10, %v7529_v10, %v7528_v55  ;;  %v7629_v42 = vrot.slane %v7350_v43, 6  ;;  %v7352_v41 = vld [vmem:[#allocation2 + $0xe5] sm:$0x1]  ;;  %v7316_v55 = vld [vmem:[#allocation2 + $0xc2] sm:$0x1] }
 0x945   :  { %v12984_v7 = vsel %vm6530_vm12, %v7625_v21, %v7624_v13  ;;  %v7532_v48 = vsel %vm6527_vm11, %v7531_v53, %v7530_v25  ;;  %v7535_v15 = vrot.slane %v7317_v44, 7  ;;  %v7351_v53 = vld [vmem:[#allocation2 + $0xdd] sm:$0x1]  ;;  %v7537_v1 = vrot.slane %v7318_v58, 6  ;;  %v7320_v13 = vld [vmem:[#allocation2 + $0xe2] sm:$0x1] }
 0x946   :  { %v12990_v62 = vsel %vm6530_vm12, %v7533_v36, %v7532_v48  ;;  %v7628_v10 = vsel %vm6512_vm6, %v7627_v37, %v7348_v0  ;;  %v7319_v21 = vld [vmem:[#allocation2 + $0xda] sm:$0x1]  ;;  %v7633_v25 = vrot.slane %v7352_v41, 4  ;;  %v7354_v48 = vld [vmem:[#allocation2 + $0xf5] sm:$0x1] }
 0x947   :  { %7685 = vrot.lane.b32.xlu0 %v12962_v20, %s11055_s23  ;;  %v7630_v8 = vsel %vm6515_vm7, %v7629_v42, %v7628_v10  ;;  %v7536_v36 = vsel %vm6512_vm6, %v7535_v15, %v7316_v55  ;;  %v7321_v43 = vld [vmem:[#allocation2 + $0xea] sm:$0x1]  ;;  %v7637_v58 = vrot.slane %v7354_v48, 2  ;;  %v7355_v41 = vld [vmem:[#allocation2 + $0xfd] sm:$0x1] }
 0x948   :  { %7687 = vrot.lane.b32.xlu1 %v12965_v23, %s11055_s23 }
 0x94b   :  { %7699 = vrot.lane.b32.xlu0 %v12978_v63, %s11055_s23 }
 0x94c   :  { %7701 = vrot.lane.b32.xlu1 %v12984_v7, %s11055_s23 }
 0x94f   :  { %7689 = vrot.lane.b32.xlu0 %v12990_v62, %s11055_s23 }
 0x976   :  { %v7363_v28 = vpop.permute.xlu0 %7362 }
 0x978   :  { %v7361_v46 = vpop.permute.xlu1 %7360 }
 0x979   :  { %10565 = vmatprep.mubr.msk.f32.mxu0 %vm6390_vm13, %v7361_v46  ;;  %v7631_v46 = vrot.slane %v7351_v53, 5 }
 0x97a   :  { %10566 = vmatmul.mubr.msk.f32.vlgmr.msra.gmra.mxu0 %vm6390_vm13, %v7363_v28  ;;  %v7353_v28 = vld [vmem:[#allocation2 + $0xed] sm:$0x1] }
 0x97b   :  { %10586 = vmatpush3.msra.mxu0 %v12764_v38  ;;  %v7632_v32 = vsel %vm6518_vm8, %v7631_v46, %v7630_v8  ;;  %v7635_v42 = vrot.slane %v7353_v28, 3 }
 0x97c   :  { %10587 = vmatprep.subr.mxu0 %v12770_v54  ;;  %v7634_v44 = vsel %vm6521_vm9, %v7633_v25, %v7632_v32 }
 0x97d   :  { %10588 = vmatpush3.msra.mxu0 %v12770_v54 }
 0x97e   :  { %10589 = vmatprep.subr.mxu0 %v12777_v34 }
 0x97f   :  { %10590 = vmatpush3.msra.mxu0 %v12777_v34 }
 0x980   :  { %10591 = vmatprep.subr.mxu0 %v12784_v33 }
 0x981   :  { %10592 = vmatpush3.msra.mxu0 %v12784_v33 }
 0x982   :  { %10613 = vmatprep.subr.mxu0 %v12764_v38 }
 0x9b2   :  { %v7365_v2 = vpop.permute.xlu1 %7364 }
 0x9b3   :  { %10568 = vmatprep.mubr.msk.f32.mxu0 %vm6390_vm13, %v7365_v2  ;;  %v7538_v2 = vsel %vm6515_vm7, %v7537_v1, %v7536_v36  ;;  %v7543_v1 = vrot.slane %v7321_v43, 3  ;;  %v7639_v36 = vrot.slane %v7355_v41, 1 }
 0x9b5   :  { %v7367_v51 = vpop.permute.xlu0 %7366 }
 0x9b6   :  { %10569 = vmatmul.mubr.msk.f32.gmra.mxu0 %vm6390_vm13, %v7367_v51  ;;  %v13006_v24 = vpop.permute.xlu1 %7697  ;;  %v7541_v51 = vrot.slane %v7320_v13, 4  ;;  %v7636_v13 = vsel %vm6524_vm10, %v7635_v42, %v7634_v44 }
 0x9b7   :  { %v7638_v8 = vsel %vm6527_vm11, %v7637_v58, %v7636_v13 }
 0x9b9   :  { %v13008_v52 = vpop.permute.xlu0 %7685 }
 0x9ba   :  { %v13013_v54 = vsel %vm53_vm0, %v13006_v24, %v13008_v52  ;;  %v13015_v34 = vpop.permute.xlu1 %7687 }
 0x9bd   :  { %v13017_v33 = vpop.permute.xlu0 %7699 }
 0x9be   :  { %v13022_v38 = vsel %vm53_vm0, %v13017_v33, %v13015_v34 }
 0xa3a   :  { %v13024_v26 = vpop.f32.mrf.mxu0 }
 0xa3b   :  { %v7714_v6 = vadd.f32 %v13024_v26, %v12428_v61 }
 0xa3c   :  { %v13028_v59 = vpop.f32.mrf.mxu0 }
 0xa3d   :  { %v7713_v31 = vadd.f32 %v13028_v59, %v12428_v61  ;;  %7723 = vrot.lane.b32.xlu0 %v7714_v6, %s11055_s23  ;;  %v7322_v6 = vld [vmem:[#allocation2 + $0xf2] sm:$0x1] }
 0xa3e   :  { %v7545_v55 = vrot.slane %v7322_v6, 2  ;;  %v7646_v6 = vsel %vm53_vm0, %v12965_v23, %v12978_v63 }
 0xa3f   :  { %7721 = vrot.lane.b32.xlu1 %v7713_v31, %s11055_s23  ;;  %v7539_v31 = vrot.slane %v7319_v21, 5  ;;  %v7323_v21 = vld [vmem:[#allocation2 + $0xfa] sm:$0x1]  ;;  %v7650_v32 = vsel %vm6390_vm13, %v7646_v6, %v12965_v23 }
 0xa40   :  { %v7547_v28 = vrot.slane %v7323_v21, 1  ;;  %v7654_v44 = vsel %vm6678_vm14, %v7650_v32, %v12978_v63  ;;  %v13079_v21 = vpop.permute.xlu0 %7689 }
 0xa41   :  { %v7540_v0 = vsel %vm6518_vm8, %v7539_v31, %v7538_v2  ;;  %v13054_v2 = vsel %vm6530_vm12, %v7639_v36, %v7638_v8  ;;  %v7645_v31 = vsel %vm53_vm0, %v12962_v20, %v12926_v29  ;;  %v7658_v58 = vadd.f32 %v13024_v26, %v7654_v44  ;;  %v13081_v8 = vpop.permute.xlu1 %7701 }
 0xa42   :  { %v7542_v15 = vsel %vm6521_vm9, %v7541_v51, %v7540_v0  ;;  %v7649_v43 = vsel %vm6390_vm13, %v7645_v31, %v12962_v20  ;;  %v7709_v31 = vsel %vm53_vm0, %v13008_v52, %v13006_v24 }
 0xa43   :  { %v7544_v48 = vsel %vm6524_vm10, %v7543_v1, %v7542_v15  ;;  %v7653_v0 = vsel %vm6678_vm14, %v7649_v43, %v12926_v29  ;;  %v9668_v41 = vmul.f32 -1.442695, %v7658_v58  ;;  %v7647_v43 = vsel %vm53_vm0, %v12990_v62, %v12984_v7 }
 0xa44   :  { %v7546_v46 = vsel %vm6527_vm11, %v7545_v55, %v7544_v48  ;;  %v7657_v42 = vadd.f32 %v7653_v0, %v13028_v59  ;;  %v7710_v59 = vsel %vm53_vm0, %v13015_v34, %v13017_v33  ;;  %v7651_v34 = vsel %vm6390_vm13, %v7647_v43, %v12990_v62 }
 0xa45   :  { %v13059_v51 = vsel %vm6530_vm12, %v7547_v28, %v7546_v46  ;;  %10897 = vpow2.f32 %v9668_v41  ;;  %v7655_v24 = vsel %vm6678_vm14, %v7651_v34, %v12984_v7 }
 0xa46   :  { %v9667_v15 = vmul.f32 -1.442695, %v7657_v42  ;;  %v7648_v44 = vsel %vm53_vm0, %v13059_v51, %v13054_v2 }
 0xa47   :  { %v7652_v58 = vsel %vm6390_vm13, %v7648_v44, %v13059_v51 }
 0xa48   :  { %10899 = vpow2.f32 %v9667_v15  ;;  %v7656_v42 = vsel %vm6678_vm14, %v7652_v58, %v13054_v2 }
 0xa52   :  { %v10898_v55 = vpop.eup %10897 }
 0xa53   :  { %v7674_v1 = vadd.f32 1.0, %v10898_v55 }
 0xa55   :  { %10901 = vrcp.f32 %v7674_v1 }
 0xa76   :  { %v13040_v37 = vpop.f32.mrf.mxu0 }
 0xa77   :  { %v7716_v53 = vadd.f32 %v13040_v37, %v12428_v61  ;;  %v7660_v41 = vadd.f32 %v13040_v37, %v7656_v42  ;;  %v7711_v37 = vsel %vm53_vm0, %v13079_v21, %v13081_v8 }
 0xa78   :  { %v7452_v10 = vpop.f32.mrf.mxu0 }
 0xa79   :  { %v7715_v25 = vadd.f32 %v7452_v10, %v12428_v61  ;;  %7727 = vrot.lane.b32.xlu0 %v7716_v53, %s11055_s23  ;;  %v10900_v53 = vpop.eup %10899  ;;  %v7659_v0 = vadd.f32 %v7655_v24, %v7452_v10  ;;  %v9670_v55 = vmul.f32 -1.442695, %v7660_v41 }
 0xa7a   :  { %v7673_v13 = vadd.f32 1.0, %v10900_v53  ;;  %v10902_v26 = vpop.eup %10901 }
 0xa7b   :  { %7725 = vrot.lane.b32.xlu1 %v7715_v25, %s11055_s23  ;;  %v9669_v15 = vmul.f32 -1.442695, %v7659_v0  ;;  %v7746_v24 = vsub.f32 1.0, %v10902_v26  ;;  %v7770_v0 = vmul.f32 %v10902_v26, %v12900_v47  ;;  %v7809_v47 = vld [vmem:[#allocation2 + $0x4] sm:$0x1] }
 0xa7c   :  { %10903 = vrcp.f32 %v7673_v13 }
 0xa7d   :  { %7703 = vrot.lane.b32.xlu0 %v13054_v2, %s11055_s23 }
 0xa7f   :  { %7691 = vrot.lane.b32.xlu1 %v13059_v51, %s11055_s23 }
 0xa89   :  { %v10904_v36 = vpop.eup %10903 }
 0xa8a   :  { %v7745_v41 = vsub.f32 1.0, %v10904_v36 }
 0xaaf   :  { %v7724_v25 = vpop.permute.xlu0 %7723 }
 0xab0   :  { %v7734_v48 = vmul.f32 %v10902_v26, %v7724_v25 }
 0xab1   :  { %v7722_v46 = vpop.permute.xlu1 %7721 }
 0xab2   :  { %v7738_v28 = vadd.f32 %v7734_v48, %v7710_v59  ;;  %v7733_v6 = vmul.f32 %v10904_v36, %v7722_v46 }
 0xab4   :  { %10905 = vtanh.f32 %v7738_v28  ;;  %v7737_v32 = vadd.f32 %v7733_v6, %v7709_v31 }
 0xab6   :  { %10907 = vtanh.f32 %v7737_v32 }
 0xab7   :  { %10909 = vpow2.f32 %v9669_v15 }
 0xab8   :  { %10911 = vpow2.f32 %v9670_v55 }
 0xac1   :  { %v10906_v33 = vpop.eup %10905 }
 0xac2   :  { %7755 = vrot.lane.b32.xlu0 %v10906_v33, %s11056_s28 }
 0xac3   :  { %v10908_v52 = vpop.eup %10907 }
 0xac4   :  { %7753 = vrot.lane.b32.xlu1 %v10908_v52, %s11056_s28  ;;  %v10910_v53 = vpop.eup %10909 }
 0xac5   :  { %v10912_v1 = vpop.eup %10911  ;;  %v7675_v13 = vadd.f32 1.0, %v10910_v53  ;;  %v7769_v53 = vmul.f32 %v10904_v36, %v12903_v56 }
 0xac6   :  { %v7676_v25 = vadd.f32 1.0, %v10912_v1 }
 0xac7   :  { %10913 = vrcp.f32 %v7675_v13 }
 0xac8   :  { %10915 = vrcp.f32 %v7676_v25  ;;  %v7810_v25 = vld [vmem:[#allocation2 + $0xc] sm:$0x1] }
 0xad4   :  { %v13106_v59 = vpop.eup %10913 }
 0xad5   :  { %v13112_v28 = vpop.eup %10915  ;;  %v7747_v49 = vsub.f32 1.0, %v13106_v59 }
 0xaeb   :  { %v7728_v48 = vpop.permute.xlu0 %7727 }
 0xaec   :  { %v7736_v31 = vmul.f32 %v13112_v28, %v7728_v48  ;;  %v7811_v48 = vld [vmem:[#allocation2 + $0x14] sm:$0x1] }
 0xaed   :  { %v7726_v10 = vpop.permute.xlu1 %7725  ;;  %v8072_v26 = vrot.slane %v7811_v48, 6  ;;  %v7816_v48 = vld [vmem:[#allocation2 + $0x3c] sm:$0x1] }
 0xaee   :  { %v7735_v46 = vmul.f32 %v13106_v59, %v7726_v10  ;;  %v8070_v10 = vrot.slane %v7810_v25, 7  ;;  %v7786_v25 = vld [vmem:[#allocation2 + $0x4b] sm:$0x1] }
 0xaef   :  { %v13115_v32 = vpop.permute.xlu0 %7703 }
 0xaf0   :  { %v7739_v6 = vadd.f32 %v7735_v46, %v7711_v37  ;;  %v7813_v46 = vld [vmem:[#allocation2 + $0x24] sm:$0x1]  ;;  %v7812_v37 = vld [vmem:[#allocation2 + $0x1c] sm:$0x1] }
 0xaf1   :  { %v13117_v43 = vpop.permute.xlu1 %7691  ;;  %v8076_v36 = vrot.slane %v7813_v46, 4  ;;  %v7782_v46 = vld [vmem:[#allocation2 + $0x2b] sm:$0x1] }
 0xaf2   :  { %10917 = vtanh.f32 %v7739_v6  ;;  %v7712_v44 = vsel %vm53_vm0, %v13117_v43, %v13115_v32  ;;  %v8071_v6 = vsel %vm6512_vm6, %v8070_v10, %v7809_v47  ;;  %v7780_v10 = vld [vmem:[#allocation2 + $0x1b] sm:$0x1]  ;;  %v7787_v47 = vld [vmem:[#allocation2 + $0x53] sm:$0x1] }
 0xaf3   :  { %v7740_v34 = vadd.f32 %v7736_v31, %v7712_v44  ;;  %v8073_v56 = vsel %vm6515_vm7, %v8072_v26, %v8071_v6  ;;  %v7778_v31 = vld [vmem:[#allocation2 + $0xb] sm:$0x1]  ;;  %v7815_v44 = vld [vmem:[#allocation2 + $0x34] sm:$0x1]  ;;  %v7994_v45 = vrot.slane %v7787_v47, 6 }
 0xaf4   :  { %v7817_v47 = vld [vmem:[#allocation2 + $0x44] sm:$0x1] }
 0xaf5   :  { %10919 = vtanh.f32 %v7740_v34  ;;  %v8074_v34 = vrot.slane %v7812_v37, 5  ;;  %v13139_v37 = vld [vmem:[#allocation2 + $0x33] sm:$0x1] }
 0xaff   :  { %v10918_v33 = vpop.eup %10917 }
 0xb00   :  { %7757 = vrot.lane.b32.xlu1 %v10918_v33, %s11056_s28  ;;  %v7779_v33 = vld [vmem:[#allocation2 + $0x13] sm:$0x1] }
 0xb02   :  { %v10920_v58 = vpop.eup %10919 }
 0xb03   :  { %7759 = vrot.lane.b32.xlu0 %v10920_v58, %s11056_s28  ;;  %v7814_v58 = vld [vmem:[#allocation2 + $0x2c] sm:$0x1] }
 0xb34   :  { %v7756_v52 = vpop.permute.xlu0 %7755 }
 0xb35   :  { %v7766_v42 = vmul.f32 %v7756_v52, %v7746_v24  ;;  %v8075_v24 = vsel %vm6518_vm8, %v8074_v34, %v8073_v56  ;;  %v7978_v52 = vrot.slane %v7778_v31, 7  ;;  %v13143_v31 = vld [vmem:[#allocation2 + $0x3b] sm:$0x1]  ;;  %v7785_v34 = vld [vmem:[#allocation2 + $0x43] sm:$0x1] }
 0xb36   :  { %v7754_v15 = vpop.permute.xlu1 %7753 }
 0xb37   :  { %v13125_v55 = vadd.f32 %v7770_v0, %v7766_v42  ;;  %v7765_v1 = vmul.f32 %v7754_v15, %v7745_v41  ;;  %v8077_v0 = vsel %vm6521_vm9, %v8076_v36, %v8075_v24  ;;  %v8080_v42 = vrot.slane %v7815_v44, 2  ;;  %v7777_v41 = vld [vmem:[#allocation2 + $0x3] sm:$0x1] }
 0xb38   :  { %v7980_v15 = vrot.slane %v7779_v33, 6  ;;  %v7979_v6 = vsel %vm6512_vm6, %v7978_v52, %v7777_v41  ;;  %v7992_v33 = vrot.slane %v7786_v25, 7  ;;  %v7982_v24 = vrot.slane %v7780_v10, 5 }
 0xb39   :  { %v13128_v13 = vadd.f32 %v7769_v53, %v7765_v1  ;;  %7847 = vrot.lane.b32.xlu0 %v13125_v55, %s11057_s29  ;;  %v8078_v53 = vrot.slane %v7814_v58, 3  ;;  %v7781_v1 = vld [vmem:[#allocation2 + $0x23] sm:$0x1]  ;;  %v8082_v58 = vrot.slane %v7816_v48, 1  ;;  %v7988_v41 = vrot.slane %v13139_v37, 2 }
 0xb3a   :  { %v7981_v36 = vsel %vm6515_vm7, %v7980_v15, %v7979_v6  ;;  %v7984_v44 = vrot.slane %v7781_v1, 4  ;;  %v7791_v15 = vld [vmem:[#allocation2 + $0x73] sm:$0x1]  ;;  %v7826_v1 = vld [vmem:[#allocation2 + $0x8c] sm:$0x1]  ;;  %v7993_v10 = vsel %vm6512_vm6, %v7992_v33, %v7785_v34  ;;  %v7771_v34 = vmul.f32 %v13106_v59, %v12935_v35 }
 0xb3b   :  { %7845 = vrot.lane.b32.xlu1 %v13128_v13, %s11057_s29  ;;  %v8079_v26 = vsel %vm6524_vm10, %v8078_v53, %v8077_v0  ;;  %v7789_v0 = vld [vmem:[#allocation2 + $0x63] sm:$0x1]  ;;  %v7790_v53 = vld [vmem:[#allocation2 + $0x6b] sm:$0x1]  ;;  %v7983_v52 = vsel %vm6518_vm8, %v7982_v24, %v7981_v36  ;;  %v7827_v6 = vld [vmem:[#allocation2 + $0x94] sm:$0x1] }
 0xb3c   :  { %v8081_v56 = vsel %vm6527_vm11, %v8080_v42, %v8079_v26  ;;  %v7986_v42 = vrot.slane %v7782_v46, 3  ;;  %v7985_v25 = vsel %vm6521_vm9, %v7984_v44, %v7983_v52  ;;  %v8084_v26 = vrot.slane %v7818_v22, 7  ;;  %v7821_v36 = vld [vmem:[#allocation2 + $0x64] sm:$0x1]  ;;  %v13156_v37 = vld [vmem:[#allocation2 + $0x7b] sm:$0x1] }
 0xb3d   :  { %v13147_v50 = vsel %vm6530_vm12, %v8082_v58, %v8081_v56  ;;  %v7995_v56 = vsel %vm6515_vm7, %v7994_v45, %v7993_v10  ;;  %v7998_v58 = vrot.slane %v7789_v0, 4  ;;  %v8086_v46 = vrot.slane %v7819_v27, 6  ;;  %v7794_v48 = vld [vmem:[#allocation2 + $0x8b] sm:$0x1]  ;;  %v7795_v45 = vld [vmem:[#allocation2 + $0x93] sm:$0x1] }
 0xb3e   :  { %v8000_v11 = vrot.slane %v7790_v53, 3  ;;  %v8002_v44 = vrot.slane %v7791_v15, 2  ;;  %v8098_v52 = vrot.slane %v7826_v1, 7  ;;  %v7987_v33 = vsel %vm6524_vm10, %v7986_v42, %v7985_v25  ;;  %v7820_v10 = vld [vmem:[#allocation2 + $0x5c] sm:$0x1] }
 0xb3f   :  { %v8100_v12 = vrot.slane %v7827_v6, 6  ;;  %v7748_v0 = vsub.f32 1.0, %v13112_v28  ;;  %v7997_v27 = vsel %vm6518_vm8, %v7996_v18, %v7995_v56  ;;  %v8085_v40 = vsel %vm6512_vm6, %v8084_v26, %v7817_v47  ;;  %v7829_v15 = vld [vmem:[#allocation2 + $0xa4] sm:$0x1]  ;;  %v7828_v59 = vld [vmem:[#allocation2 + $0x9c] sm:$0x1] }
 0xb40   :  { %v8090_v53 = vrot.slane %v7821_v36, 4  ;;  %v7999_v35 = vsel %vm6521_vm9, %v7998_v58, %v7997_v27  ;;  %v8006_v42 = vrot.slane %v7794_v48, 7  ;;  %v7772_v25 = vmul.f32 %v13112_v28, %v12945_v57  ;;  %v7823_v18 = vld [vmem:[#allocation2 + $0x74] sm:$0x1]  ;;  %v7793_v47 = vld [vmem:[#allocation2 + $0x83] sm:$0x1] }
 0xb41   :  { %v8099_v56 = vsel %vm6512_vm6, %v8098_v52, %v7825_v30  ;;  %v8008_v26 = vrot.slane %v7795_v45, 6  ;;  %v8004_v36 = vrot.slane %v13156_v37, 1  ;;  %v8088_v58 = vrot.slane %v7820_v10, 5  ;;  %v7797_v48 = vld [vmem:[#allocation2 + $0xa3] sm:$0x1] }
 0xb42   :  { %v8001_v57 = vsel %vm6524_vm10, %v8000_v11, %v7999_v35  ;;  %v7831_v28 = vld [vmem:[#allocation2 + $0xb4] sm:$0x1]  ;;  %v8102_v30 = vrot.slane %v7828_v59, 5  ;;  %v7796_v52 = vld [vmem:[#allocation2 + $0x9b] sm:$0x1]  ;;  %v8094_v27 = vrot.slane %v7823_v18, 2  ;;  %v8007_v10 = vsel %vm6512_vm6, %v8006_v42, %v7793_v47 }
 0xb43   :  { %v8003_v45 = vsel %vm6527_vm11, %v8002_v44, %v8001_v57  ;;  %v7830_v37 = vld [vmem:[#allocation2 + $0xac] sm:$0x1]  ;;  %v8009_v11 = vsel %vm6515_vm7, %v8008_v26, %v8007_v10  ;;  %v7799_v35 = vld [vmem:[#allocation2 + $0xb3] sm:$0x1]  ;;  %v7824_v59 = vld [vmem:[#allocation2 + $0x7c] sm:$0x1] }
 0xb44   :  { %v8106_v42 = vrot.slane %v7830_v37, 3  ;;  %v13196_v18 = vsel %vm6530_vm12, %v8004_v36, %v8003_v45  ;;  %v7832_v47 = vld [vmem:[#allocation2 + $0xbc] sm:$0x1]  ;;  %v8096_v36 = vrot.slane %v7824_v59, 1  ;;  %v7800_v57 = vld [vmem:[#allocation2 + $0xbb] sm:$0x1] }
 0xb72   :  { %v7758_v24 = vpop.permute.xlu1 %7757 }
 0xb73   :  { %v7767_v22 = vmul.f32 %v7758_v24, %v7747_v49  ;;  %v8087_v49 = vsel %vm6515_vm7, %v8086_v46, %v8085_v40  ;;  %v7822_v24 = vld [vmem:[#allocation2 + $0x6c] sm:$0x1]  ;;  %v8101_v46 = vsel %vm6515_vm7, %v8100_v12, %v8099_v56 }
 0xb74   :  { %v8092_v44 = vrot.slane %v7822_v24, 3 }
 0xb75   :  { %v13164_v1 = vadd.f32 %v7771_v34, %v7767_v22  ;;  %v7760_v60 = vpop.permute.xlu0 %7759  ;;  %v8104_v34 = vrot.slane %v7829_v15, 4  ;;  %v8108_v15 = vrot.slane %v7831_v28, 2 }
 0xb76   :  { %v7768_v6 = vmul.f32 %v7760_v60, %v7748_v0  ;;  %v7989_v60 = vsel %vm6527_vm11, %v7988_v41, %v7987_v33  ;;  %v8089_v0 = vsel %vm6518_vm8, %v8088_v58, %v8087_v49  ;;  %v8103_v41 = vsel %vm6518_vm8, %v8102_v30, %v8101_v46 }
 0xb77   :  { %7849 = vrot.lane.b32.xlu1 %v13164_v1, %s11057_s29  ;;  %v8091_v12 = vsel %vm6521_vm9, %v8090_v53, %v8089_v0  ;;  %v8012_v33 = vrot.slane %v7797_v48, 4  ;;  %v8105_v40 = vsel %vm6521_vm9, %v8104_v34, %v8103_v41  ;;  %v8010_v49 = vrot.slane %v7796_v52, 5  ;;  %v13236_v41 = vld [vmem:[%s13783_s1 + $0x38] sm:$0xff] }
 0xb78   :  { %v13175_v22 = vadd.f32 %v7772_v25, %v7768_v6  ;;  %v7798_v25 = vld [vmem:[#allocation2 + $0xab] sm:$0x1]  ;;  %v13873_v6 = vrot.slane %v13143_v31, 1  ;;  %v8093_v56 = vsel %vm6524_vm10, %v8092_v44, %v8091_v12  ;;  %v8107_v58 = vsel %vm6524_vm10, %v8106_v42, %v8105_v40  ;;  %v13230_v12 = vld [vmem:[%s13783_s1 + $0x40] sm:$0xff] }
 0xb79   :  { %v8011_v24 = vsel %vm6518_vm8, %v8010_v49, %v8009_v11  ;;  %v8095_v26 = vsel %vm6527_vm11, %v8094_v27, %v8093_v56  ;;  %v8016_v46 = vrot.slane %v7799_v35, 2  ;;  %v8109_v34 = vsel %vm6527_vm11, %v8108_v15, %v8107_v58  ;;  %v13243_v11 = vld [vmem:[%s13783_s1 + $0x30] sm:$0xff] }
 0xb7a   :  { %7851 = vrot.lane.b32.xlu0 %v13175_v22, %s11057_s29  ;;  %v13193_v53 = vsel %vm6530_vm12, %v13873_v6, %v7989_v60  ;;  %v8013_v31 = vsel %vm6521_vm9, %v8012_v33, %v8011_v24  ;;  %v8014_v48 = vrot.slane %v7798_v25, 3  ;;  %v8110_v60 = vrot.slane %v7832_v47, 1  ;;  %v13250_v33 = vld [vmem:[%s13783_s1 + $0x28] sm:$0xff]  ;;  %v7835_v58 = vld [vmem:[#allocation2 + $0xd4] sm:$0x1] }
 0xb7b   :  { %8182 = vrot.lane.b32.xlu1 %v13147_v50, %s11055_s23  ;;  %v13209_v28 = vsel %vm6530_vm12, %v8096_v36, %v8095_v26  ;;  %v8018_v0 = vrot.slane %v7800_v57, 1  ;;  %v7834_v26 = vld [vmem:[#allocation2 + $0xcc] sm:$0x1] }
 0xb7c   :  { %v8015_v30 = vsel %vm6524_vm10, %v8014_v48, %v8013_v31  ;;  %v13215_v52 = vsel %vm6530_vm12, %v8110_v60, %v8109_v34  ;;  %v7802_v31 = vld [vmem:[#allocation2 + $0xcb] sm:$0x1]  ;;  %v8112_v36 = vrot.slane %v7834_v26, 7  ;;  %v7833_v34 = vld [vmem:[#allocation2 + $0xc4] sm:$0x1]  ;;  %v8114_v48 = vrot.slane %v7835_v58, 6 }
 0xb7d   :  { %v8017_v45 = vsel %vm6527_vm11, %v8016_v46, %v8015_v30  ;;  %v7803_v46 = vld [vmem:[#allocation2 + $0xd3] sm:$0x1]  ;;  %v7837_v60 = vld [vmem:[#allocation2 + $0xe4] sm:$0x1]  ;;  %v8020_v57 = vrot.slane %v7802_v31, 7 }
 0xb7e   :  { %8170 = vrot.lane.b32.xlu0 %v13193_v53, %s11055_s23  ;;  %v13221_v27 = vsel %vm6530_vm12, %v8018_v0, %v8017_v45  ;;  %v7801_v30 = vld [vmem:[#allocation2 + $0xc3] sm:$0x1]  ;;  %v7836_v45 = vld [vmem:[#allocation2 + $0xdc] sm:$0x1]  ;;  %v8022_v0 = vrot.slane %v7803_v46, 6 }
 0xb7f   :  { %8172 = vrot.lane.b32.xlu1 %v13196_v18, %s11055_s23  ;;  %v8021_v16 = vsel %vm6512_vm6, %v8020_v57, %v7801_v30  ;;  %v8116_v14 = vrot.slane %v7836_v45, 5  ;;  %v7806_v46 = vld [vmem:[#allocation2 + $0xeb] sm:$0x1]  ;;  %v8030_v30 = vrot.slane %v7807_v17, 2 }
 0xb80   :  { %v8023_v26 = vsel %vm6515_vm7, %v8022_v0, %v8021_v16  ;;  %v8028_v45 = vrot.slane %v7806_v46, 3 }
 0xb82   :  { %8184 = vrot.lane.b32.xlu0 %v13209_v28, %s11055_s23 }
 0xb83   :  { %8186 = vrot.lane.b32.xlu1 %v13215_v52, %s11055_s23 }
 0xb86   :  { %8174 = vrot.lane.b32.xlu0 %v13221_v27, %s11055_s23 }
 0xbab   :  { %v7848_v10 = vpop.permute.xlu0 %7847 }
 0xbad   :  { %v7846_v37 = vpop.permute.xlu1 %7845 }
 0xbae   :  { %10579 = vmatprep.mubr.msk.f32.mxu1 %vm6390_vm13, %v7846_v37  ;;  %v7805_v37 = vld [vmem:[#allocation2 + $0xe3] sm:$0x1] }
 0xbaf   :  { %10580 = vmatmul.mubr.msk.f32.vlgmr.msra.gmra.mxu1 %vm6390_vm13, %v7848_v10  ;;  %v8113_v10 = vsel %vm6512_vm6, %v8112_v36, %v7833_v34  ;;  %v8026_v58 = vrot.slane %v7805_v37, 4  ;;  %v7808_v37 = vld [vmem:[#allocation2 + $0xfb] sm:$0x1] }
 0xbb0   :  { %10600 = vmatpush3.msra.mxu1 %v13230_v12  ;;  %v8032_v17 = vrot.slane %v7808_v37, 1 }
 0xbb1   :  { %10601 = vmatprep.subr.mxu1 %v13236_v41 }
 0xbb2   :  { %10602 = vmatpush3.msra.mxu1 %v13236_v41 }
 0xbb3   :  { %10603 = vmatprep.subr.mxu1 %v13243_v11 }
 0xbb4   :  { %10604 = vmatpush3.msra.mxu1 %v13243_v11 }
 0xbb5   :  { %10605 = vmatprep.subr.mxu1 %v13250_v33 }
 0xbb6   :  { %10606 = vmatpush3.msra.mxu1 %v13250_v33 }
 0xbb7   :  { %10627 = vmatprep.subr.mxu1 %v13230_v12 }
 0xbe9   :  { %v7850_v44 = vpop.permute.xlu1 %7849 }
 0xbea   :  { %10582 = vmatprep.mubr.msk.f32.mxu1 %vm6390_vm13, %v7850_v44  ;;  %v7804_v44 = vld [vmem:[#allocation2 + $0xdb] sm:$0x1] }
 0xbeb   :  { %v8024_v31 = vrot.slane %v7804_v44, 5 }
 0xbec   :  { %v7852_v40 = vpop.permute.xlu0 %7851 }
 0xbed   :  { %10583 = vmatmul.mubr.msk.f32.gmra.mxu1 %vm6390_vm13, %v7852_v40  ;;  %v13257_v15 = vpop.permute.xlu1 %8182  ;;  %v8115_v40 = vsel %vm6515_vm7, %v8114_v48, %v8113_v10  ;;  %v8025_v48 = vsel %vm6518_vm8, %v8024_v31, %v8023_v26  ;;  %v7840_v10 = vld [vmem:[#allocation2 + $0xfc] sm:$0x1] }
 0xbee   :  { %v8117_v39 = vsel %vm6518_vm8, %v8116_v14, %v8115_v40  ;;  %v8027_v57 = vsel %vm6521_vm9, %v8026_v58, %v8025_v48  ;;  %v8124_v40 = vrot.slane %v7840_v10, 1  ;;  %v8130_v58 = vsel %vm53_vm0, %v13193_v53, %v13147_v50 }
 0xbef   :  { %v8134_v46 = vsel %vm6390_vm13, %v8130_v58, %v13193_v53 }
 0xbf0   :  { %v13259_v35 = vpop.permute.xlu0 %8170 }
 0xbf1   :  { %v13264_v49 = vsel %vm53_vm0, %v13257_v15, %v13259_v35  ;;  %v13266_v59 = vpop.permute.xlu1 %8172 }
 0xbf4   :  { %v13268_v42 = vpop.permute.xlu0 %8184 }
 0xbf5   :  { %v13273_v25 = vsel %vm53_vm0, %v13268_v42, %v13266_v59 }
 0xc6f   :  { %v13275_v6 = vpop.f32.mrf.mxu1 }
 0xc70   :  { %v8199_v56 = vadd.f32 %v13275_v6, %v12428_v61 }
 0xc71   :  { %v13279_v47 = vpop.f32.mrf.mxu1 }
 0xc72   :  { %v8198_v24 = vadd.f32 %v13279_v47, %v12428_v61  ;;  %8208 = vrot.lane.b32.xlu0 %v8199_v56, %s11055_s23  ;;  %v8118_v56 = vrot.slane %v7837_v60, 4  ;;  %v8120_v60 = vrot.slane %v7838_v9, 3  ;;  %v8029_v9 = vsel %vm6524_vm10, %v8028_v45, %v8027_v57 }
 0xc74   :  { %8206 = vrot.lane.b32.xlu1 %v8198_v24, %s11055_s23  ;;  %v7839_v24 = vld [vmem:[#allocation2 + $0xf4] sm:$0x1]  ;;  %v8119_v4 = vsel %vm6521_vm9, %v8118_v56, %v8117_v39  ;;  %v8031_v56 = vsel %vm6527_vm11, %v8030_v30, %v8029_v9 }
 0xc75   :  { %v8122_v36 = vrot.slane %v7839_v24, 2  ;;  %v8121_v0 = vsel %vm6524_vm10, %v8120_v60, %v8119_v4  ;;  %v8131_v4 = vsel %vm53_vm0, %v13196_v18, %v13209_v28  ;;  %v13313_v26 = vsel %vm6530_vm12, %v8032_v17, %v8031_v56 }
 0xc76   :  { %v8135_v31 = vsel %vm6390_vm13, %v8131_v4, %v13196_v18  ;;  %v8138_v60 = vsel %vm6678_vm14, %v8134_v46, %v13147_v50 }
 0xc77   :  { %v8123_v39 = vsel %vm6527_vm11, %v8122_v36, %v8121_v0  ;;  %v8139_v36 = vsel %vm6678_vm14, %v8135_v31, %v13209_v28  ;;  %v8142_v10 = vadd.f32 %v8138_v60, %v13279_v47  ;;  %v8195_v47 = vsel %vm53_vm0, %v13266_v59, %v13268_v42 }
 0xc78   :  { %v13305_v24 = vsel %vm6530_vm12, %v8124_v40, %v8123_v39  ;;  %v8143_v48 = vadd.f32 %v13275_v6, %v8139_v36  ;;  %v13330_v39 = vpop.permute.xlu0 %8174  ;;  %v8194_v31 = vsel %vm53_vm0, %v13259_v35, %v13257_v15  ;;  %v8132_v36 = vsel %vm53_vm0, %v13221_v27, %v13215_v52 }
 0xc79   :  { %v9675_v30 = vmul.f32 -1.442695, %v8142_v10  ;;  %v8133_v60 = vsel %vm53_vm0, %v13313_v26, %v13305_v24  ;;  %v8136_v59 = vsel %vm6390_vm13, %v8132_v36, %v13221_v27 }
 0xc7a   :  { %v9676_v57 = vmul.f32 -1.442695, %v8143_v48  ;;  %v8137_v15 = vsel %vm6390_vm13, %v8133_v60, %v13313_v26  ;;  %v8140_v35 = vsel %vm6678_vm14, %v8136_v59, %v13215_v52 }
 0xc7c   :  { %10921 = vpow2.f32 %v9676_v57  ;;  %v8141_v57 = vsel %vm6678_vm14, %v8137_v15, %v13305_v24 }
 0xc7d   :  { %10923 = vpow2.f32 %v9675_v30 }
 0xcad   :  { %v13291_v34 = vpop.f32.mrf.mxu1 }
 0xcae   :  { %v8201_v16 = vadd.f32 %v13291_v34, %v12428_v61  ;;  %v8145_v30 = vadd.f32 %v13291_v34, %v8141_v57 }
 0xcaf   :  { %v7937_v14 = vpop.f32.mrf.mxu1 }
 0xcb0   :  { %v8200_v44 = vadd.f32 %v7937_v14, %v12428_v61  ;;  %8212 = vrot.lane.b32.xlu0 %v8201_v16, %s11055_s23  ;;  %v10922_v16 = vpop.eup %10921  ;;  %v8144_v10 = vadd.f32 %v8140_v35, %v7937_v14 }
 0xcb1   :  { %v10924_v45 = vpop.eup %10923  ;;  %v8159_v0 = vadd.f32 1.0, %v10922_v16 }
 0xcb2   :  { %8210 = vrot.lane.b32.xlu1 %v8200_v44, %s11055_s23  ;;  %v8158_v37 = vadd.f32 1.0, %v10924_v45  ;;  %v13332_v44 = vpop.permute.xlu1 %8186  ;;  %v9677_v16 = vmul.f32 -1.442695, %v8144_v10  ;;  %v9678_v45 = vmul.f32 -1.442695, %v8145_v30 }
 0xcb3   :  { %10925 = vrcp.f32 %v8159_v0  ;;  %v8196_v14 = vsel %vm53_vm0, %v13330_v39, %v13332_v44 }
 0xcb4   :  { %8188 = vrot.lane.b32.xlu0 %v13305_v24, %s11055_s23  ;;  %10927 = vrcp.f32 %v8158_v37 }
 0xcb6   :  { %8176 = vrot.lane.b32.xlu1 %v13313_v26, %s11055_s23 }
 0xcc0   :  { %v10926_v6 = vpop.eup %10925 }
 0xcc1   :  { %v10928_v56 = vpop.eup %10927  ;;  %v8231_v35 = vsub.f32 1.0, %v10926_v6  ;;  %v8255_v57 = vmul.f32 %v10926_v6, %v13125_v55 }
 0xce4   :  { %v8209_v9 = vpop.permute.xlu0 %8208 }
 0xce5   :  { %v8219_v40 = vmul.f32 %v10926_v6, %v8209_v9 }
 0xce6   :  { %v8207_v17 = vpop.permute.xlu1 %8206 }
 0xce7   :  { %v8223_v4 = vadd.f32 %v8219_v40, %v8195_v47  ;;  %v8218_v58 = vmul.f32 %v10928_v56, %v8207_v17 }
 0xce9   :  { %10929 = vtanh.f32 %v8223_v4  ;;  %v8222_v46 = vadd.f32 %v8218_v58, %v8194_v31 }
 0xceb   :  { %10931 = vtanh.f32 %v8222_v46 }
 0xcec   :  { %10933 = vpow2.f32 %v9677_v16  ;;  %v8230_v16 = vsub.f32 1.0, %v10928_v56 }
 0xced   :  { %10935 = vpow2.f32 %v9678_v45 }
 0xcf6   :  { %v10930_v48 = vpop.eup %10929 }
 0xcf7   :  { %8240 = vrot.lane.b32.xlu0 %v10930_v48, %s11056_s28 }
 0xcf8   :  { %v10932_v42 = vpop.eup %10931 }
 0xcf9   :  { %8238 = vrot.lane.b32.xlu1 %v10932_v42, %s11056_s28  ;;  %v10934_v0 = vpop.eup %10933 }
 0xcfa   :  { %v10936_v37 = vpop.eup %10935  ;;  %v8160_v9 = vadd.f32 1.0, %v10934_v0 }
 0xcfb   :  { %v8161_v40 = vadd.f32 1.0, %v10936_v37  ;;  %v8254_v37 = vmul.f32 %v10928_v56, %v13128_v13 }
 0xcfc   :  { %10937 = vrcp.f32 %v8160_v9 }
 0xcfd   :  { %10939 = vrcp.f32 %v8161_v40 }
 0xd09   :  { %v10938_v17 = vpop.eup %10937 }
 0xd0a   :  { %v10940_v31 = vpop.eup %10939  ;;  %v8256_v55 = vmul.f32 %v10938_v17, %v13164_v1 }
 0xd0b   :  { %v8257_v13 = vmul.f32 %v10940_v31, %v13175_v22 }
 0xd22   :  { %v8213_v47 = vpop.permute.xlu0 %8212 }
 0xd23   :  { %v8221_v46 = vmul.f32 %v10940_v31, %v8213_v47  ;;  %v8232_v47 = vsub.f32 1.0, %v10938_v17 }
 0xd24   :  { %v8211_v4 = vpop.permute.xlu1 %8210 }
 0xd25   :  { %v8220_v58 = vmul.f32 %v10938_v17, %v8211_v4 }
 0xd26   :  { %v13360_v36 = vpop.permute.xlu0 %8188 }
 0xd27   :  { %v8224_v34 = vadd.f32 %v8220_v58, %v8196_v14  ;;  %v8233_v58 = vsub.f32 1.0, %v10940_v31 }
 0xd28   :  { %v13362_v48 = vpop.permute.xlu1 %8176 }
 0xd29   :  { %10941 = vtanh.f32 %v8224_v34  ;;  %v8197_v60 = vsel %vm53_vm0, %v13362_v48, %v13360_v36 }
 0xd2a   :  { %v8225_v59 = vadd.f32 %v8221_v46, %v8197_v60 }
 0xd2c   :  { %10943 = vtanh.f32 %v8225_v59 }
 0xd36   :  { %v10942_v42 = vpop.eup %10941 }
 0xd37   :  { %8242 = vrot.lane.b32.xlu1 %v10942_v42, %s11056_s28 }
 0xd39   :  { %v10944_v15 = vpop.eup %10943 }
 0xd3a   :  { %8244 = vrot.lane.b32.xlu0 %v10944_v15, %s11056_s28 }
 0xd69   :  { %v8241_v10 = vpop.permute.xlu0 %8240 }
 0xd6a   :  { %v8251_v30 = vmul.f32 %v8241_v10, %v8231_v35 }
 0xd6b   :  { %v8239_v45 = vpop.permute.xlu1 %8238 }
 0xd6c   :  { %v13370_v0 = vadd.f32 %v8255_v57, %v8251_v30  ;;  %v8250_v9 = vmul.f32 %v8239_v45, %v8230_v16  ;;  %v8368_v16 = vsel %vm53_vm0, %v13209_v28, %v13196_v18  ;;  %v8367_v45 = vsel %vm53_vm0, %v13147_v50, %v13193_v53 }
 0xd6e   :  { %v13373_v40 = vadd.f32 %v8254_v37, %v8250_v9  ;;  %8268 = vrot.lane.b32.xlu0 %v13370_v0, %s11057_s29  ;;  %v8372_v37 = vsel %vm6390_vm13, %v8368_v16, %v13209_v28  ;;  %v8371_v9 = vsel %vm6390_vm13, %v8367_v45, %v13147_v50 }
 0xd70   :  { %8266 = vrot.lane.b32.xlu1 %v13373_v40, %s11057_s29 }
 0xda9   :  { %v8243_v4 = vpop.permute.xlu1 %8242 }
 0xdaa   :  { %v8252_v6 = vmul.f32 %v8243_v4, %v8232_v47  ;;  %v8376_v47 = vsel %vm6678_vm14, %v8372_v37, %v13196_v18 }
 0xdac   :  { %v13380_v14 = vadd.f32 %v8256_v55, %v8252_v6  ;;  %v8245_v34 = vpop.permute.xlu0 %8244  ;;  %v8375_v55 = vsel %vm6678_vm14, %v8371_v9, %v13193_v53 }
 0xdad   :  { %v8253_v56 = vmul.f32 %v8245_v34, %v8233_v58 }
 0xdae   :  { %8270 = vrot.lane.b32.xlu1 %v13380_v14, %s11057_s29 }
 0xdaf   :  { %v13385_v46 = vadd.f32 %v8257_v13, %v8253_v56 }
 0xdb1   :  { %8272 = vrot.lane.b32.xlu0 %v13385_v46, %s11057_s29 }
 0xde0   :  { %v8269_v59 = vpop.permute.xlu0 %8268 }
 0xde2   :  { %v8267_v60 = vpop.permute.xlu1 %8266 }
 0xde3   :  { %10593 = vmatprep.mubr.msk.f32.mxu0 %vm6390_vm13, %v8267_v60 }
 0xde4   :  { %10594 = vmatmul.mubr.msk.f32.vlgmr.msra.gmra.mxu0 %vm6390_vm13, %v8269_v59 }
 0xde5   :  { %10614 = vmatpush3.msra.mxu0 %v13230_v12 }
 0xde6   :  { %10615 = vmatprep.subr.mxu0 %v13236_v41 }
 0xde7   :  { %10616 = vmatpush3.msra.mxu0 %v13236_v41 }
 0xde8   :  { %10617 = vmatprep.subr.mxu0 %v13243_v11 }
 0xde9   :  { %10618 = vmatpush3.msra.mxu0 %v13243_v11 }
 0xdea   :  { %10619 = vmatprep.subr.mxu0 %v13250_v33 }
 0xdeb   :  { %10620 = vmatpush3.msra.mxu0 %v13250_v33 }
 0xe20   :  { %v8271_v1 = vpop.permute.xlu1 %8270 }
 0xe21   :  { %10596 = vmatprep.mubr.msk.f32.mxu0 %vm6390_vm13, %v8271_v1 }
 0xe23   :  { %v8273_v22 = vpop.permute.xlu0 %8272 }
 0xe24   :  { %10597 = vmatmul.mubr.msk.f32.gmra.mxu0 %vm6390_vm13, %v8273_v22 }
 0xea4   :  { %v10595_v17 = vpop.f32.mrf.mxu0 }
 0xea5   :  { %v8412_v31 = vadd.f32 %v10595_v17, %v12428_v61  ;;  %v8380_v4 = vadd.f32 %v10595_v17, %v8376_v47 }
 0xea6   :  { %v8348_v42 = vpop.f32.mrf.mxu0 }
 0xea7   :  { %v8411_v15 = vadd.f32 %v8348_v42, %v12428_v61  ;;  %8421 = vrot.lane.b32.xlu0 %v8412_v31, %s11055_s23  ;;  %v8379_v6 = vadd.f32 %v8375_v55, %v8348_v42  ;;  %v9684_v58 = vmul.f32 -1.442695, %v8380_v4  ;;  %v8370_v42 = vsel %vm53_vm0, %v13305_v24, %v13313_v26 }
 0xea9   :  { %8419 = vrot.lane.b32.xlu1 %v8411_v15, %s11055_s23  ;;  %v9683_v34 = vmul.f32 -1.442695, %v8379_v6  ;;  %10945 = vpow2.f32 %v9684_v58  ;;  %v8369_v15 = vsel %vm53_vm0, %v13215_v52, %v13221_v27 }
 0xeaa   :  { %v8373_v16 = vsel %vm6390_vm13, %v8369_v15, %v13215_v52 }
 0xeab   :  { %10947 = vpow2.f32 %v9683_v34  ;;  %v8377_v37 = vsel %vm6678_vm14, %v8373_v16, %v13221_v27 }
 0xeb6   :  { %v10946_v13 = vpop.eup %10945 }
 0xeb7   :  { %v8396_v60 = vadd.f32 1.0, %v10946_v13 }
 0xeb8   :  { %v10948_v56 = vpop.eup %10947 }
 0xeb9   :  { %v8395_v59 = vadd.f32 1.0, %v10948_v56  ;;  %10949 = vrcp.f32 %v8396_v60  ;;  %v8409_v60 = vsel %vm53_vm0, %v13332_v44, %v13330_v39 }
 0xebb   :  { %10951 = vrcp.f32 %v8395_v59 }
 0xec6   :  { %v10950_v28 = vpop.eup %10949 }
 0xec8   :  { %v10952_v22 = vpop.eup %10951 }
 0xec9   :  { %v8467_v39 = vmul.f32 %v10952_v22, %v13373_v40 }
 0xee4   :  { %v10598_v35 = vpop.f32.mrf.mxu0 }
 0xee5   :  { %v8414_v10 = vadd.f32 %v10598_v35, %v12428_v61 }
 0xee6   :  { %v8358_v57 = vpop.f32.mrf.mxu0 }
 0xee7   :  { %v8413_v30 = vadd.f32 %v8358_v57, %v12428_v61  ;;  %8425 = vrot.lane.b32.xlu0 %v8414_v10, %s11055_s23  ;;  %v8381_v9 = vadd.f32 %v8377_v37, %v8358_v57 }
 0xee9   :  { %8423 = vrot.lane.b32.xlu1 %v8413_v30, %s11055_s23  ;;  %v8374_v30 = vsel %vm6390_vm13, %v8370_v42, %v13305_v24  ;;  %v9685_v4 = vmul.f32 -1.442695, %v8381_v9 }
 0xf19   :  { %v8422_v50 = vpop.permute.xlu0 %8421 }
 0xf1a   :  { %v8432_v1 = vmul.f32 %v10950_v28, %v8422_v50 }
 0xf1b   :  { %v8420_v18 = vpop.permute.xlu1 %8419 }
 0xf1c   :  { %v8436_v17 = vadd.f32 %v8432_v1, %v13273_v25  ;;  %v8431_v31 = vmul.f32 %v10952_v22, %v8420_v18  ;;  %v8444_v18 = vsub.f32 1.0, %v10950_v28 }
 0xf1e   :  { %10953 = vtanh.f32 %v8436_v17  ;;  %v8435_v53 = vadd.f32 %v8431_v31, %v13264_v49  ;;  %v8378_v49 = vsel %vm6678_vm14, %v8374_v30, %v13313_v26  ;;  %v8443_v31 = vsub.f32 1.0, %v10952_v22 }
 0xf1f   :  { %v8382_v45 = vadd.f32 %v10598_v35, %v8378_v49  ;;  %v8410_v35 = vsel %vm53_vm0, %v13360_v36, %v13362_v48  ;;  %v8468_v36 = vmul.f32 %v10950_v28, %v13370_v0 }
 0xf20   :  { %10955 = vtanh.f32 %v8435_v53 }
 0xf21   :  { %v9686_v47 = vmul.f32 -1.442695, %v8382_v45 }
 0xf23   :  { %10957 = vpow2.f32 %v9686_v47 }
 0xf24   :  { %10959 = vpow2.f32 %v9685_v4 }
 0xf2b   :  { %v10954_v10 = vpop.eup %10953 }
 0xf2c   :  { %8453 = vrot.lane.b32.xlu0 %v10954_v10, %s11056_s28 }
 0xf2d   :  { %v10956_v25 = vpop.eup %10955 }
 0xf2e   :  { %8451 = vrot.lane.b32.xlu1 %v10956_v25, %s11056_s28 }
 0xf30   :  { %v10958_v24 = vpop.eup %10957 }
 0xf31   :  { %v10960_v55 = vpop.eup %10959  ;;  %v8398_v6 = vadd.f32 1.0, %v10958_v24 }
 0xf32   :  { %v8397_v58 = vadd.f32 1.0, %v10960_v55 }
 0xf33   :  { %10961 = vrcp.f32 %v8398_v6  ;;  %v8581_v6 = vsel %vm53_vm0, %v12978_v63, %v12965_v23 }
 0xf34   :  { %10963 = vrcp.f32 %v8397_v58  ;;  %v8580_v58 = vsel %vm53_vm0, %v12926_v29, %v12962_v20 }
 0xf40   :  { %v10962_v52 = vpop.eup %10961 }
 0xf41   :  { %v10964_v13 = vpop.eup %10963  ;;  %v8446_v10 = vsub.f32 1.0, %v10962_v52  ;;  %v8470_v0 = vmul.f32 %v10962_v52, %v13385_v46 }
 0xf42   :  { %v8445_v25 = vsub.f32 1.0, %v10964_v13  ;;  %v8469_v40 = vmul.f32 %v10964_v13, %v13380_v14 }
 0xf59   :  { %v8426_v34 = vpop.permute.xlu0 %8425 }
 0xf5a   :  { %v8434_v26 = vmul.f32 %v10962_v52, %v8426_v34  ;;  %v8585_v52 = vsel %vm6390_vm13, %v8581_v6, %v12978_v63  ;;  %v8584_v34 = vsel %vm6390_vm13, %v8580_v58, %v12926_v29 }
 0xf5b   :  { %v8424_v27 = vpop.permute.xlu1 %8423 }
 0xf5c   :  { %v8438_v57 = vadd.f32 %v8434_v26, %v8410_v35  ;;  %v8433_v56 = vmul.f32 %v10964_v13, %v8424_v27  ;;  %v8589_v26 = vsel %vm6678_vm14, %v8585_v52, %v12965_v23  ;;  %v8588_v35 = vsel %vm6678_vm14, %v8584_v34, %v12962_v20 }
 0xf5e   :  { %10965 = vtanh.f32 %v8438_v57  ;;  %v8437_v59 = vadd.f32 %v8433_v56, %v8409_v60 }
 0xf60   :  { %10967 = vtanh.f32 %v8437_v59 }
 0xf6b   :  { %v10966_v50 = vpop.eup %10965 }
 0xf6c   :  { %8457 = vrot.lane.b32.xlu0 %v10966_v50, %s11056_s28 }
 0xf6d   :  { %v10968_v1 = vpop.eup %10967 }
 0xf6e   :  { %8455 = vrot.lane.b32.xlu1 %v10968_v1, %s11056_s28 }
 0xf9e   :  { %v8454_v17 = vpop.permute.xlu0 %8453 }
 0xf9f   :  { %v8464_v48 = vmul.f32 %v8454_v17, %v8444_v18 }
 0xfa0   :  { %v8452_v53 = vpop.permute.xlu1 %8451 }
 0xfa1   :  { %v13449_v42 = vadd.f32 %v8468_v36, %v8464_v48  ;;  %v8463_v44 = vmul.f32 %v8452_v53, %v8443_v31  ;;  %v8583_v31 = vsel %vm53_vm0, %v13054_v2, %v13059_v51  ;;  %v8582_v53 = vsel %vm53_vm0, %v12984_v7, %v12990_v62 }
 0xfa3   :  { %v13452_v15 = vadd.f32 %v8467_v39, %v8463_v44  ;;  %8481 = vrot.lane.b32.xlu0 %v13449_v42, %s11057_s29  ;;  %v8587_v44 = vsel %vm6390_vm13, %v8583_v31, %v13054_v2  ;;  %v8794_v31 = vsel %vm53_vm0, %v12748_v19, %v12709_v3 }
 0xfa5   :  { %8479 = vrot.lane.b32.xlu1 %v13452_v15, %s11057_s29 }
 0xfde   :  { %v8458_v30 = vpop.permute.xlu0 %8457 }
 0xfdf   :  { %v8466_v28 = vmul.f32 %v8458_v30, %v8446_v10  ;;  %v8586_v10 = vsel %vm6390_vm13, %v8582_v53, %v12984_v7  ;;  %v13874_v53 = vld [vmem:[#allocation16_spill] sm:$0xff] }
 0xfe0   :  { %v8456_v16 = vpop.permute.xlu1 %8455 }
 0xfe1   :  { %v13459_v49 = vadd.f32 %v8470_v0, %v8466_v28  ;;  %v8465_v22 = vmul.f32 %v8456_v16, %v8445_v25  ;;  %v8590_v0 = vsel %vm6678_vm14, %v8586_v10, %v12990_v62 }
 0xfe3   :  { %v13462_v45 = vadd.f32 %v8469_v40, %v8465_v22  ;;  %8485 = vrot.lane.b32.xlu0 %v13459_v49, %s11057_s29 }
 0xfe5   :  { %8483 = vrot.lane.b32.xlu1 %v13462_v45, %s11057_s29 }
0x1015   :  { %v8482_v9 = vpop.permute.xlu0 %8481 }
0x1017   :  { %v8480_v37 = vpop.permute.xlu1 %8479 }
0x1018   :  { %10607 = vmatprep.mubr.msk.f32.mxu1 %vm6390_vm13, %v8480_v37 }
0x1019   :  { %10608 = vmatmul.mubr.msk.f32.vlgmr.msra.gmra.mxu1 %vm6390_vm13, %v8482_v9 }
0x101a   :  { %10628 = vmatpush3.msra.mxu1 %v13230_v12 }
0x101b   :  { %10629 = vmatprep.subr.mxu1 %v13236_v41 }
0x101c   :  { %10630 = vmatpush3.msra.mxu1 %v13236_v41 }
0x101d   :  { %10631 = vmatprep.subr.mxu1 %v13243_v11 }
0x101e   :  { %10632 = vmatpush3.msra.mxu1 %v13243_v11 }
0x101f   :  { %10633 = vmatprep.subr.mxu1 %v13250_v33 }
0x1020   :  { %10634 = vmatpush3.msra.mxu1 %v13250_v33 }
0x1055   :  { %v8486_v46 = vpop.permute.xlu0 %8485 }
0x1057   :  { %v8484_v14 = vpop.permute.xlu1 %8483 }
0x1058   :  { %10610 = vmatprep.mubr.msk.f32.mxu1 %vm6390_vm13, %v8484_v14 }
0x1059   :  { %10611 = vmatmul.mubr.msk.f32.gmra.mxu1 %vm6390_vm13, %v8486_v46  ;;  %v8623_v46 = vsel %vm53_vm0, %v13115_v32, %v13117_v43 }
0x10d9   :  { %v10609_v47 = vpop.f32.mrf.mxu1 }
0x10da   :  { %v8625_v12 = vadd.f32 %v10609_v47, %v12428_v61  ;;  %v8593_v13 = vadd.f32 %v10609_v47, %v8589_v26 }
0x10db   :  { %v8561_v4 = vpop.f32.mrf.mxu1 }
0x10dc   :  { %v8624_v41 = vadd.f32 %v8561_v4, %v12428_v61  ;;  %8634 = vrot.lane.b32.xlu0 %v8625_v12, %s11055_s23  ;;  %v8592_v27 = vadd.f32 %v8588_v35, %v8561_v4  ;;  %v9692_v57 = vmul.f32 -1.442695, %v8593_v13  ;;  %v8622_v4 = vsel %vm53_vm0, %v13081_v8, %v13079_v21 }
0x10de   :  { %8632 = vrot.lane.b32.xlu1 %v8624_v41, %s11055_s23  ;;  %v9691_v56 = vmul.f32 -1.442695, %v8592_v27  ;;  %10969 = vpow2.f32 %v9692_v57 }
0x10e0   :  { %10971 = vpow2.f32 %v9691_v56 }
0x10eb   :  { %v10970_v60 = vpop.eup %10969 }
0x10ec   :  { %v8609_v50 = vadd.f32 1.0, %v10970_v60 }
0x10ed   :  { %v10972_v59 = vpop.eup %10971 }
0x10ee   :  { %v8608_v1 = vadd.f32 1.0, %v10972_v59  ;;  %10973 = vrcp.f32 %v8609_v50 }
0x10f0   :  { %10975 = vrcp.f32 %v8608_v1 }
0x10fb   :  { %v10974_v63 = vpop.eup %10973 }
0x10fc   :  { %v8681_v32 = vmul.f32 %v10974_v63, %v13449_v42 }
0x10fd   :  { %v10976_v17 = vpop.eup %10975 }
0x10fe   :  { %v8656_v6 = vsub.f32 1.0, %v10976_v17  ;;  %v8680_v21 = vmul.f32 %v10976_v17, %v13452_v15 }
0x1119   :  { %v10612_v11 = vpop.f32.mrf.mxu1 }
0x111a   :  { %v8627_v24 = vadd.f32 %v10612_v11, %v12428_v61 }
0x111b   :  { %v8571_v33 = vpop.f32.mrf.mxu1 }
0x111c   :  { %v8626_v55 = vadd.f32 %v8571_v33, %v12428_v61  ;;  %8638 = vrot.lane.b32.xlu0 %v8627_v24, %s11055_s23  ;;  %v8594_v28 = vadd.f32 %v8590_v0, %v8571_v33  ;;  %v8657_v33 = vsub.f32 1.0, %v10974_v63 }
0x111e   :  { %8636 = vrot.lane.b32.xlu1 %v8626_v55, %s11055_s23  ;;  %v9693_v16 = vmul.f32 -1.442695, %v8594_v28 }
0x114e   :  { %v8635_v29 = vpop.permute.xlu0 %8634 }
0x114f   :  { %v8645_v18 = vmul.f32 %v10974_v63, %v8635_v29 }
0x1150   :  { %v8633_v23 = vpop.permute.xlu1 %8632 }
0x1151   :  { %v8649_v36 = vadd.f32 %v8645_v18, %v13022_v38  ;;  %v8644_v48 = vmul.f32 %v10976_v17, %v8633_v23 }
0x1153   :  { %10977 = vtanh.f32 %v8649_v36  ;;  %v8648_v20 = vadd.f32 %v8644_v48, %v13013_v54  ;;  %v8591_v54 = vsel %vm6678_vm14, %v8587_v44, %v13059_v51  ;;  %v8798_v44 = vsel %vm6390_vm13, %v8794_v31, %v12748_v19  ;;  %v13885_v31 = vld [vmem:[#allocation25_spill] sm:$0xff] }
0x1154   :  { %v8595_v30 = vadd.f32 %v10612_v11, %v8591_v54  ;;  %v8802_v10 = vsel %vm6678_vm14, %v8798_v44, %v12709_v3  ;;  %v13875_v3 = vld [vmem:[#allocation24_spill] sm:$0xff] }
0x1155   :  { %10979 = vtanh.f32 %v8648_v20 }
0x1156   :  { %v9694_v25 = vmul.f32 -1.442695, %v8595_v30 }
0x1158   :  { %10981 = vpow2.f32 %v9694_v25 }
0x1159   :  { %10983 = vpow2.f32 %v9693_v16 }
0x1160   :  { %v10978_v39 = vpop.eup %10977 }
0x1161   :  { %8666 = vrot.lane.b32.xlu0 %v10978_v39, %s11056_s28  ;;  %v8793_v39 = vsel %vm53_vm0, %v13874_v53, %v12739_v5 }
0x1162   :  { %v10980_v38 = vpop.eup %10979 }
0x1163   :  { %8664 = vrot.lane.b32.xlu1 %v10980_v38, %s11056_s28  ;;  %v8797_v38 = vsel %vm6390_vm13, %v8793_v39, %v13874_v53  ;;  %v13886_v53 = vld [vmem:[#allocation26_spill] sm:$0xff] }
0x1164   :  { %v8801_v30 = vsel %vm6678_vm14, %v8797_v38, %v12739_v5  ;;  %v8835_v39 = vsel %vm53_vm0, %v13886_v53, %v13885_v31  ;;  %v13894_v31 = vld [vmem:[#allocation4_spill] sm:$0xff]  ;;  %v13895_v53 = vld [vmem:[#allocation6_spill] sm:$0xff] }
0x1165   :  { %v10982_v2 = vpop.eup %10981 }
0x1166   :  { %v10984_v40 = vpop.eup %10983  ;;  %v8611_v22 = vadd.f32 1.0, %v10982_v2 }
0x1167   :  { %v8610_v37 = vadd.f32 1.0, %v10984_v40 }
0x1168   :  { %10985 = vrcp.f32 %v8611_v22 }
0x1169   :  { %10987 = vrcp.f32 %v8610_v37 }
0x1175   :  { %v10986_v7 = vpop.eup %10985 }
0x1176   :  { %v10988_v14 = vpop.eup %10987  ;;  %v8659_v26 = vsub.f32 1.0, %v10986_v7  ;;  %v8683_v42 = vmul.f32 %v10986_v7, %v13459_v49 }
0x1177   :  { %v8658_v27 = vsub.f32 1.0, %v10988_v14  ;;  %v8682_v15 = vmul.f32 %v10988_v14, %v13462_v45 }
0x118e   :  { %v8639_v9 = vpop.permute.xlu0 %8638 }
0x118f   :  { %v8647_v51 = vmul.f32 %v10986_v7, %v8639_v9 }
0x1190   :  { %v8637_v62 = vpop.permute.xlu1 %8636 }
0x1191   :  { %v8651_v47 = vadd.f32 %v8647_v51, %v8623_v46  ;;  %v8646_v12 = vmul.f32 %v10988_v14, %v8637_v62  ;;  %v13876_v51 = vld [vmem:[#allocation23_spill] sm:$0xff] }
0x1192   :  { %v8834_v14 = vsel %vm53_vm0, %v13876_v51, %v13875_v3 }
0x1193   :  { %10989 = vtanh.f32 %v8651_v47  ;;  %v8650_v41 = vadd.f32 %v8646_v12, %v8622_v4  ;;  %v13877_v47 = vld [vmem:[#allocation21_spill] sm:$0xff]  ;;  %v13878_v12 = vld [vmem:[#allocation22_spill] sm:$0xff] }
0x1194   :  { %v8833_v4 = vsel %vm53_vm0, %v13878_v12, %v13877_v47 }
0x1195   :  { %10991 = vtanh.f32 %v8650_v41 }
0x11a0   :  { %v10990_v11 = vpop.eup %10989 }
0x11a1   :  { %8670 = vrot.lane.b32.xlu0 %v10990_v11, %s11056_s28  ;;  %v13879_v11 = vld [vmem:[#allocation20_spill] sm:$0xff] }
0x11a2   :  { %v10992_v24 = vpop.eup %10991 }
0x11a3   :  { %8668 = vrot.lane.b32.xlu1 %v10992_v24, %s11056_s28  ;;  %v13880_v24 = vld [vmem:[#allocation19_spill] sm:$0xff] }
0x11d3   :  { %v8667_v55 = vpop.permute.xlu0 %8666 }
0x11d4   :  { %v8677_v43 = vmul.f32 %v8667_v55, %v8657_v33  ;;  %v8796_v33 = vsel %vm53_vm0, %v13880_v24, %v13879_v11  ;;  %v13881_v55 = vld [vmem:[#allocation18_spill] sm:$0xff] }
0x11d5   :  { %v8665_v58 = vpop.permute.xlu1 %8664 }
0x11d6   :  { %v13528_v52 = vadd.f32 %v8681_v32, %v8677_v43  ;;  %v8676_v8 = vmul.f32 %v8665_v58, %v8656_v6  ;;  %v13882_v32 = vld [vmem:[#allocation17_spill] sm:$0xff]  ;;  %v8800_v58 = vsel %vm6390_vm13, %v8796_v33, %v13880_v24  ;;  %v13888_v33 = vld [vmem:[#allocation11_spill] sm:$0xff] }
0x11d7   :  { %v8795_v43 = vsel %vm53_vm0, %v13882_v32, %v13881_v55 }
0x11d8   :  { %v13531_v34 = vadd.f32 %v8680_v21, %v8676_v8  ;;  %8694 = vrot.lane.b32.xlu0 %v13528_v52, %s11057_s29  ;;  %v8799_v8 = vsel %vm6390_vm13, %v8795_v43, %v13882_v32 }
0x11da   :  { %8692 = vrot.lane.b32.xlu1 %v13531_v34, %s11057_s29 }
0x1213   :  { %v8671_v13 = vpop.permute.xlu0 %8670 }
0x1214   :  { %v8679_v35 = vmul.f32 %v8671_v13, %v8659_v26  ;;  %v8804_v26 = vsel %vm6678_vm14, %v8800_v58, %v13879_v11 }
0x1215   :  { %v8669_v57 = vpop.permute.xlu1 %8668 }
0x1216   :  { %v13538_v56 = vadd.f32 %v8683_v42, %v8679_v35  ;;  %v8678_v60 = vmul.f32 %v8669_v57, %v8658_v27  ;;  %v8803_v42 = vsel %vm6678_vm14, %v8799_v8, %v13881_v55 }
0x1218   :  { %v13541_v59 = vadd.f32 %v8682_v15, %v8678_v60  ;;  %8698 = vrot.lane.b32.xlu0 %v13538_v56, %s11057_s29 }
0x121a   :  { %8696 = vrot.lane.b32.xlu1 %v13541_v59, %s11057_s29 }
0x124a   :  { %v8695_v1 = vpop.permute.xlu0 %8694 }
0x124c   :  { %v8693_v50 = vpop.permute.xlu1 %8692 }
0x124d   :  { %10621 = vmatprep.mubr.msk.f32.mxu0 %vm6390_vm13, %v8693_v50 }
0x124e   :  { %10622 = vmatmul.mubr.msk.f32.vlgmr.msra.gmra.mxu0 %vm6390_vm13, %v8695_v1 }
0x128a   :  { %v8699_v63 = vpop.permute.xlu0 %8698 }
0x128c   :  { %v8697_v49 = vpop.permute.xlu1 %8696 }
0x128d   :  { %10624 = vmatprep.mubr.msk.f32.mxu0 %vm6390_vm13, %v8697_v49 }
0x128e   :  { %10625 = vmatmul.mubr.msk.f32.gmra.mxu0 %vm6390_vm13, %v8699_v63 }
0x130e   :  { %v10623_v45 = vpop.f32.mrf.mxu0 }
0x130f   :  { %v8838_v29 = vadd.f32 %v10623_v45, %v12428_v61  ;;  %v8806_v54 = vadd.f32 %v10623_v45, %v8802_v10 }
0x1310   :  { %v8774_v18 = vpop.f32.mrf.mxu0 }
0x1311   :  { %v8837_v17 = vadd.f32 %v8774_v18, %v12428_v61  ;;  %8847 = vrot.lane.b32.xlu0 %v8838_v29, %s11055_s23  ;;  %v8805_v0 = vadd.f32 %v8801_v30, %v8774_v18  ;;  %v9700_v28 = vmul.f32 -1.442695, %v8806_v54  ;;  %v13883_v18 = vld [vmem:[#allocation28_spill] sm:$0xff] }
0x1313   :  { %8845 = vrot.lane.b32.xlu1 %v8837_v17, %s11055_s23  ;;  %v9699_v25 = vmul.f32 -1.442695, %v8805_v0  ;;  %10993 = vpow2.f32 %v9700_v28  ;;  %v13884_v17 = vld [vmem:[#allocation27_spill] sm:$0xff] }
0x1315   :  { %10995 = vpow2.f32 %v9699_v25 }
0x1320   :  { %v10994_v16 = vpop.eup %10993 }
0x1321   :  { %v8822_v40 = vadd.f32 1.0, %v10994_v16 }
0x1322   :  { %v10996_v2 = vpop.eup %10995 }
0x1323   :  { %v8821_v22 = vadd.f32 1.0, %v10996_v2  ;;  %10997 = vrcp.f32 %v8822_v40 }
0x1325   :  { %10999 = vrcp.f32 %v8821_v22 }
0x1330   :  { %v10998_v19 = vpop.eup %10997 }
0x1331   :  { %v8870_v54 = vsub.f32 1.0, %v10998_v19  ;;  %v8894_v0 = vmul.f32 %v10998_v19, %v13528_v52 }
0x1332   :  { %v11000_v9 = vpop.eup %10999 }
0x1333   :  { %v8869_v25 = vsub.f32 1.0, %v11000_v9  ;;  %v8893_v40 = vmul.f32 %v11000_v9, %v13531_v34 }
0x134e   :  { %v10626_v23 = vpop.f32.mrf.mxu0 }
0x134f   :  { %v8840_v36 = vadd.f32 %v10626_v23, %v12428_v61  ;;  %v8808_v13 = vadd.f32 %v10626_v23, %v8804_v26  ;;  %v8836_v23 = vsel %vm53_vm0, %v13884_v17, %v13883_v18 }
0x1350   :  { %v8784_v48 = vpop.f32.mrf.mxu0 }
0x1351   :  { %v8839_v20 = vadd.f32 %v8784_v48, %v12428_v61  ;;  %8851 = vrot.lane.b32.xlu0 %v8840_v36, %s11055_s23  ;;  %v8807_v35 = vadd.f32 %v8803_v42, %v8784_v48  ;;  %v9702_v27 = vmul.f32 -1.442695, %v8808_v13 }
0x1353   :  { %8849 = vrot.lane.b32.xlu1 %v8839_v20, %s11055_s23  ;;  %v9701_v57 = vmul.f32 -1.442695, %v8807_v35 }
0x1383   :  { %v8848_v37 = vpop.permute.xlu0 %8847 }
0x1384   :  { %v8858_v7 = vmul.f32 %v10998_v19, %v8848_v37 }
0x1385   :  { %v8846_v5 = vpop.permute.xlu1 %8845 }
0x1386   :  { %v8862_v46 = vadd.f32 %v8858_v7, %v8834_v14  ;;  %v8857_v62 = vmul.f32 %v11000_v9, %v8846_v5 }
0x1388   :  { %11001 = vtanh.f32 %v8862_v46  ;;  %v8861_v41 = vadd.f32 %v8857_v62, %v8833_v4  ;;  %v13887_v4 = vld [vmem:[#allocation10_spill] sm:$0xff] }
0x138a   :  { %11003 = vtanh.f32 %v8861_v41 }
0x138b   :  { %11005 = vpow2.f32 %v9702_v27 }
0x138c   :  { %11007 = vpow2.f32 %v9701_v57 }
0x1395   :  { %v11002_v6 = vpop.eup %11001 }
0x1396   :  { %8879 = vrot.lane.b32.xlu0 %v11002_v6, %s11056_s28  ;;  %v13889_v6 = vld [vmem:[#allocation12_spill] sm:$0xff] }
0x1397   :  { %v11004_v21 = vpop.eup %11003 }
0x1398   :  { %8877 = vrot.lane.b32.xlu1 %v11004_v21, %s11056_s28  ;;  %v11006_v15 = vpop.eup %11005 }
0x1399   :  { %v11008_v60 = vpop.eup %11007  ;;  %v8824_v50 = vadd.f32 1.0, %v11006_v15 }
0x139a   :  { %v8823_v1 = vadd.f32 1.0, %v11008_v60 }
0x139b   :  { %11009 = vrcp.f32 %v8824_v50 }
0x139c   :  { %11011 = vrcp.f32 %v8823_v1 }
0x13a8   :  { %v11010_v49 = vpop.eup %11009 }
0x13a9   :  { %v11012_v29 = vpop.eup %11011  ;;  %v8872_v7 = vsub.f32 1.0, %v11010_v49  ;;  %v8896_v52 = vmul.f32 %v11010_v49, %v13538_v56 }
0x13aa   :  { %v8871_v51 = vsub.f32 1.0, %v11012_v29  ;;  %v8895_v34 = vmul.f32 %v11012_v29, %v13541_v59 }
0x13c3   :  { %v8852_v63 = vpop.permute.xlu0 %8851 }
0x13c4   :  { %v8860_v45 = vmul.f32 %v11010_v49, %v8852_v63  ;;  %v13891_v63 = vld [vmem:[#allocation8_spill] sm:$0xff] }
0x13c5   :  { %v8850_v36 = vpop.permute.xlu1 %8849 }
0x13c6   :  { %v8864_v48 = vadd.f32 %v8860_v45, %v8836_v23  ;;  %v8859_v20 = vmul.f32 %v11012_v29, %v8850_v36  ;;  %v13892_v23 = vld [vmem:[#allocation5_spill] sm:$0xff]  ;;  %v13893_v36 = vld [vmem:[#allocation7_spill] sm:$0xff] }
0x13c8   :  { %11013 = vtanh.f32 %v8864_v48  ;;  %v8863_v44 = vadd.f32 %v8859_v20, %v8835_v39  ;;  %v9046_v48 = vsel %vm53_vm0, %v13893_v36, %v13892_v23  ;;  %v9008_v39 = vsel %vm53_vm0, %v13895_v53, %v13894_v31  ;;  %v9238_v23 = vld [vmem:[%s13783_s1 + $0xb8] sm:$0xff]  ;;  %v9237_v36 = vld [vmem:[%s13783_s1 + $0xb0] sm:$0xff] }
0x13ca   :  { %11015 = vtanh.f32 %v8863_v44 }
0x13d5   :  { %v11014_v38 = vpop.eup %11013 }
0x13d6   :  { %8883 = vrot.lane.b32.xlu0 %v11014_v38, %s11056_s28 }
0x13d7   :  { %v11016_v10 = vpop.eup %11015 }
0x13d8   :  { %8881 = vrot.lane.b32.xlu1 %v11016_v10, %s11056_s28  ;;  %v9012_v10 = vsel %vm6390_vm13, %v9008_v39, %v13895_v53  ;;  %v9232_v53 = vld [vmem:[%s13783_s1 + $0x88] sm:$0xff]  ;;  %v9231_v39 = vld [vmem:[%s13783_s1 + $0x80] sm:$0xff] }
0x1408   :  { %v8880_v30 = vpop.permute.xlu0 %8879 }
0x1409   :  { %v8890_v28 = vmul.f32 %v8880_v30, %v8870_v54  ;;  %v9016_v54 = vsel %vm6678_vm14, %v9012_v10, %v13894_v31  ;;  %v9233_v31 = vld [vmem:[%s13783_s1 + $0x90] sm:$0xff] }
0x140a   :  { %v8878_v16 = vpop.permute.xlu1 %8877 }
0x140b   :  { %v13604_v2 = vadd.f32 %v8894_v0, %v8890_v28  ;;  %v8889_v22 = vmul.f32 %v8878_v16, %v8869_v25 }
0x140d   :  { %v13607_v37 = vadd.f32 %v8893_v40, %v8889_v22  ;;  %8907 = vrot.lane.b32.xlu0 %v13604_v2, %s11057_s29 }
0x140f   :  { %8905 = vrot.lane.b32.xlu1 %v13607_v37, %s11057_s29 }
0x1448   :  { %v8884_v3 = vpop.permute.xlu0 %8883 }
0x1449   :  { %v8892_v19 = vmul.f32 %v8884_v3, %v8872_v7 }
0x144a   :  { %v8882_v14 = vpop.permute.xlu1 %8881 }
0x144b   :  { %v13614_v5 = vadd.f32 %v8896_v52, %v8892_v19  ;;  %v8891_v9 = vmul.f32 %v8882_v14, %v8871_v51  ;;  %v13896_v51 = vld [vmem:[#allocation14_spill] sm:$0xff]  ;;  %v13897_v14 = vld [vmem:[#allocation15_spill] sm:$0xff] }
0x144d   :  { %v13617_v46 = vadd.f32 %v8895_v34, %v8891_v9  ;;  %8911 = vrot.lane.b32.xlu0 %v13614_v5, %s11057_s29  ;;  %v9049_v34 = vsel %vm53_vm0, %v13897_v14, %v13896_v51 }
0x144f   :  { %8909 = vrot.lane.b32.xlu1 %v13617_v46, %s11057_s29 }
0x147f   :  { %v8908_v47 = vpop.permute.xlu0 %8907 }
0x1481   :  { %v8906_v62 = vpop.permute.xlu1 %8905 }
0x1482   :  { %10635 = vmatprep.mubr.msk.f32.mxu1 %vm6390_vm13, %v8906_v62 }
0x1483   :  { %10636 = vmatmul.mubr.msk.f32.vlgmr.msra.gmra.mxu1 %vm6390_vm13, %v8908_v47 }
0x14bf   :  { %v8912_v12 = vpop.permute.xlu0 %8911 }
0x14c1   :  { %v8910_v56 = vpop.permute.xlu1 %8909 }
0x14c2   :  { %10638 = vmatprep.mubr.msk.f32.mxu1 %vm6390_vm13, %v8910_v56  ;;  %v13898_v56 = vld [vmem:[#allocation13_spill] sm:$0xff] }
0x14c3   :  { %10639 = vmatmul.mubr.msk.f32.gmra.mxu1 %vm6390_vm13, %v8912_v12  ;;  %v13899_v12 = vld [vmem:[#allocation9_spill] sm:$0xff] }
0x1543   :  { %v10637_v59 = vpop.f32.mrf.mxu1 }
0x1544   :  { %v9019_v41 = vadd.f32 %v10637_v59, %v13887_v4  ;;  %v9051_v11 = vadd.f32 %v10637_v59, %v12428_v61  ;;  %v9048_v59 = vsel %vm53_vm0, %v13899_v12, %v13898_v56  ;;  %v9336_v56 = vld [vmem:[%s13783_s1 + $0xf8] sm:$0xff]  ;;  %v9335_v12 = vld [vmem:[%s13783_s1 + $0xf0] sm:$0xff] }
0x1545   :  { %v8987_v24 = vpop.f32.mrf.mxu1 }
0x1546   :  { %v9018_v55 = vadd.f32 %v13888_v33, %v8987_v24  ;;  %v9050_v32 = vadd.f32 %v8987_v24, %v12428_v61  ;;  %9060 = vrot.lane.b32.xlu0 %v9051_v11, %s11055_s23  ;;  %v9708_v13 = vmul.f32 -1.442695, %v9019_v41  ;;  %v9117_v41 = vld [vmem:[%s13783_s1 + $0x60] sm:$0xff]  ;;  %v9116_v11 = vld [vmem:[%s13783_s1 + $0x58] sm:$0xff]  ;;  %v9115_v24 = vld [vmem:[%s13783_s1 + $0x50] sm:$0xff] }
0x1547   :  { %10641 = vmatprep.subr.mxu0 %v9117_v41 }
0x1548   :  { %9058 = vrot.lane.b32.xlu1 %v9050_v32, %s11055_s23  ;;  %v9707_v42 = vmul.f32 -1.442695, %v9018_v55  ;;  %11017 = vpow2.f32 %v9708_v13  ;;  %10642 = vmatpush3.msra.mxu0 %v9117_v41  ;;  %v9114_v32 = vld [vmem:[%s13783_s1 + $0x48] sm:$0xff]  ;;  %v9716_v41 = vld [vmem:[%s13785_s2 + $0x5] ss:$0 sm:$0xff] }
0x1549   :  { %10643 = vmatprep.subr.mxu0 %v9116_v11 }
0x154a   :  { %11019 = vpow2.f32 %v9707_v42  ;;  %10644 = vmatpush3.msra.mxu0 %v9116_v11 }
0x154b   :  { %10645 = vmatprep.subr.mxu0 %v9115_v24 }
0x154c   :  { %10646 = vmatpush3.msra.mxu0 %v9115_v24 }
0x154d   :  { %10647 = vmatprep.subr.mxu0 %v9114_v32 }
0x154e   :  { %10648 = vmatpush3.msra.mxu0 %v9114_v32 }
0x1555   :  { %v11018_v35 = vpop.eup %11017 }
0x1556   :  { %v9035_v57 = vadd.f32 1.0, %v11018_v35 }
0x1557   :  { %v11020_v27 = vpop.eup %11019 }
0x1558   :  { %v9034_v15 = vadd.f32 1.0, %v11020_v27  ;;  %11021 = vrcp.f32 %v9035_v57  ;;  %v9243_v57 = vld [vmem:[%s13783_s1 + $0xe0] sm:$0xff] }
0x1559   :  { %10655 = vmatprep.subr.mxu1 %v9243_v57 }
0x155a   :  { %11023 = vrcp.f32 %v9034_v15  ;;  %10656 = vmatpush3.msra.mxu1 %v9243_v57 }
0x1565   :  { %v11022_v60 = vpop.eup %11021 }
0x1567   :  { %v13638_v49 = vpop.eup %11023 }
0x1568   :  { %v9106_v42 = vmul.f32 %v13638_v49, %v13607_v37  ;;  %v9241_v37 = vld [vmem:[%s13783_s1 + $0xd0] sm:$0xff] }
0x1583   :  { %v10640_v43 = vpop.f32.mrf.mxu1 }
0x1584   :  { %v9021_v58 = vadd.f32 %v10640_v43, %v13889_v6  ;;  %v9053_v21 = vadd.f32 %v10640_v43, %v12428_v61  ;;  %v9083_v43 = vsub.f32 1.0, %v11022_v60 }
0x1585   :  { %v8997_v8 = vpop.f32.mrf.mxu1 }
0x1586   :  { %v9052_v26 = vadd.f32 %v8997_v8, %v12428_v61  ;;  %9064 = vrot.lane.b32.xlu0 %v9053_v21, %s11055_s23  ;;  %v13890_v61 = vld [vmem:[#allocation3_spill] sm:$0xff]  ;;  %v9020_v30 = vadd.f32 %v9016_v54, %v8997_v8  ;;  %v9710_v0 = vmul.f32 -1.442695, %v9021_v58  ;;  %v9107_v58 = vmul.f32 %v11022_v60, %v13604_v2  ;;  %v9242_v2 = vld [vmem:[%s13783_s1 + $0xd8] sm:$0xff] }
0x1587   :  { %v9047_v45 = vsel %vm53_vm0, %v13891_v63, %v13890_v61  ;;  %v9082_v8 = vsub.f32 1.0, %v13638_v49  ;;  %10657 = vmatprep.subr.mxu1 %v9242_v2  ;;  %v9239_v63 = vld [vmem:[%s13783_s1 + $0xc0] sm:$0xff]  ;;  %vm9445_vm0 = vcmask 48128  }
0x1588   :  { %9062 = vrot.lane.b32.xlu1 %v9052_v26, %s11055_s23  ;;  %v9709_v28 = vmul.f32 -1.442695, %v9020_v30  ;;  %10658 = vmatpush3.msra.mxu1 %v9242_v2  ;;  %v9230_v30 = vld [vmem:[%s13783_s1 + $0x78] sm:$0xff] }
0x1589   :  { %10659 = vmatprep.subr.mxu1 %v9241_v37 }
0x158a   :  { %10660 = vmatpush3.msra.mxu1 %v9241_v37 }
0x15b8   :  { %v9061_v50 = vpop.permute.xlu0 %9060 }
0x15b9   :  { %v9071_v1 = vmul.f32 %v11022_v60, %v9061_v50  ;;  %v9240_v60 = vld [vmem:[%s13783_s1 + $0xc8] sm:$0xff] }
0x15ba   :  { %v9059_v29 = vpop.permute.xlu1 %9058  ;;  %10661 = vmatprep.subr.mxu1 %v9240_v60 }
0x15bb   :  { %v9075_v18 = vadd.f32 %v9071_v1, %v9047_v45  ;;  %v9070_v17 = vmul.f32 %v13638_v49, %v9059_v29  ;;  %10662 = vmatpush3.msra.mxu1 %v9240_v60 }
0x15bc   :  { %10663 = vmatprep.subr.mxu1 %v9239_v63 }
0x15bd   :  { %11025 = vtanh.f32 %v9075_v18  ;;  %v9074_v20 = vadd.f32 %v9070_v17, %v9046_v48  ;;  %10664 = vmatpush3.msra.mxu1 %v9239_v63  ;;  %v9235_v48 = vld [vmem:[%s13783_s1 + $0xa0] sm:$0xff] }
0x15be   :  { %10665 = vmatprep.subr.mxu1 %v9238_v23 }
0x15bf   :  { %11027 = vtanh.f32 %v9074_v20  ;;  %10666 = vmatpush3.msra.mxu1 %v9238_v23  ;;  %v9234_v20 = vld [vmem:[%s13783_s1 + $0x98] sm:$0xff] }
0x15c0   :  { %11029 = vpow2.f32 %v9710_v0  ;;  %10667 = vmatprep.subr.mxu1 %v9237_v36  ;;  %v9229_v0 = vld [vmem:[%s13783_s1 + $0x70] sm:$0xff] }
0x15c1   :  { %11031 = vpow2.f32 %v9709_v28  ;;  %10668 = vmatpush3.msra.mxu1 %v9237_v36  ;;  %v9228_v28 = vld [vmem:[%s13783_s1 + $0x68] sm:$0xff] }
0x15ca   :  { %v11026_v44 = vpop.eup %11025 }
0x15cb   :  { %9092 = vrot.lane.b32.xlu0 %v11026_v44, %s11056_s28 }
0x15cc   :  { %v11028_v38 = vpop.eup %11027 }
0x15cd   :  { %9090 = vrot.lane.b32.xlu1 %v11028_v38, %s11056_s28  ;;  %v11030_v25 = vpop.eup %11029 }
0x15ce   :  { %v11032_v16 = vpop.eup %11031  ;;  %v9037_v40 = vadd.f32 1.0, %v11030_v25  ;;  %v9341_v25 = vld [vmem:[%s13783_s1 + $0x120] sm:$0xff] }
0x15cf   :  { %v9036_v22 = vadd.f32 1.0, %v11032_v16  ;;  %v9340_v16 = vld [vmem:[%s13783_s1 + $0x118] sm:$0xff]  ;;  %10693 = vmatprep.subr.mxu0 %v9341_v25 }
0x15d0   :  { %11033 = vrcp.f32 %v9037_v40  ;;  %v9339_v40 = vld [vmem:[%s13783_s1 + $0x110] sm:$0xff] }
0x15d1   :  { %11035 = vrcp.f32 %v9036_v22  ;;  %v9338_v22 = vld [vmem:[%s13783_s1 + $0x108] sm:$0xff] }
0x15dd   :  { %v11034_v7 = vpop.eup %11033 }
0x15de   :  { %v11036_v19 = vpop.eup %11035  ;;  %v9085_v15 = vsub.f32 1.0, %v11034_v7  ;;  %v9109_v1 = vmul.f32 %v11034_v7, %v13614_v5 }
0x15df   :  { %v9084_v61 = vsub.f32 1.0, %v11036_v19  ;;  %v9108_v18 = vmul.f32 %v11036_v19, %v13617_v46  ;;  %v9236_v46 = vld [vmem:[%s13783_s1 + $0xa8] sm:$0xff] }
0x15e0   :  { %10669 = vmatprep.subr.mxu1 %v9236_v46 }
0x15e1   :  { %10670 = vmatpush3.msra.mxu1 %v9236_v46 }
0x15e2   :  { %10671 = vmatprep.subr.mxu1 %v9235_v48 }
0x15e3   :  { %10672 = vmatpush3.msra.mxu1 %v9235_v48 }
0x15e4   :  { %10673 = vmatprep.subr.mxu1 %v9234_v20 }
0x15e5   :  { %10674 = vmatpush3.msra.mxu1 %v9234_v20 }
0x15e6   :  { %10675 = vmatprep.subr.mxu1 %v9233_v31 }
0x15e7   :  { %10676 = vmatpush3.msra.mxu1 %v9233_v31 }
0x15e8   :  { %10677 = vmatprep.subr.mxu1 %v9232_v53 }
0x15e9   :  { %10678 = vmatpush3.msra.mxu1 %v9232_v53 }
0x15ea   :  { %10679 = vmatprep.subr.mxu1 %v9231_v39 }
0x15eb   :  { %10680 = vmatpush3.msra.mxu1 %v9231_v39 }
0x15ec   :  { %10681 = vmatprep.subr.mxu1 %v9230_v30 }
0x15ed   :  { %10682 = vmatpush3.msra.mxu1 %v9230_v30 }
0x15ee   :  { %10683 = vmatprep.subr.mxu1 %v9229_v0 }
0x15ef   :  { %10684 = vmatpush3.msra.mxu1 %v9229_v0 }
0x15f0   :  { %10685 = vmatprep.subr.mxu1 %v9228_v28 }
0x15f1   :  { %10686 = vmatpush3.msra.mxu1 %v9228_v28 }
0x15f8   :  { %v9065_v3 = vpop.permute.xlu0 %9064 }
0x15f9   :  { %v9073_v52 = vmul.f32 %v11034_v7, %v9065_v3  ;;  %v9337_v7 = vld [vmem:[%s13783_s1 + $0x100] sm:$0xff] }
0x15fa   :  { %v9063_v9 = vpop.permute.xlu1 %9062 }
0x15fb   :  { %v9077_v62 = vadd.f32 %v9073_v52, %v9049_v34  ;;  %v9072_v47 = vmul.f32 %v11036_v19, %v9063_v9  ;;  %v9711_v52 = vld [vmem:[%s13785_s2 + $0x4] ss:$0 sm:$0xff] }
0x15fd   :  { %11037 = vtanh.f32 %v9077_v62  ;;  %v9076_v4 = vadd.f32 %v9072_v47, %v9048_v59  ;;  %v9334_v59 = vld [vmem:[%s13783_s1 + $0xe8] sm:$0xff] }
0x15ff   :  { %11039 = vtanh.f32 %v9076_v4 }
0x160a   :  { %v11038_v33 = vpop.eup %11037 }
0x160b   :  { %9096 = vrot.lane.b32.xlu0 %v11038_v33, %s11056_s28 }
0x160c   :  { %v11040_v55 = vpop.eup %11039 }
0x160d   :  { %9094 = vrot.lane.b32.xlu1 %v11040_v55, %s11056_s28 }
0x163d   :  { %v9093_v6 = vpop.permute.xlu0 %9092 }
0x163e   :  { %v9103_v21 = vmul.f32 %v9093_v6, %v9083_v43 }
0x163f   :  { %v9091_v26 = vpop.permute.xlu1 %9090 }
0x1640   :  { %v9111_v13 = vadd.f32 %v9107_v58, %v9103_v21  ;;  %v9102_v35 = vmul.f32 %v9091_v26, %v9082_v8  ;;  %v9717_v58 = vld [vmem:[%s13785_s2 + $0x6] ss:$0 sm:$0xff] }
0x1642   :  { %v9110_v27 = vadd.f32 %v9106_v42, %v9102_v35  ;;  %9129 = vrot.lane.b32.xlu0 %v9111_v13, %s11057_s29 }
0x1644   :  { %9127 = vrot.lane.b32.xlu1 %v9110_v27, %s11057_s29 }
0x167d   :  { %v9097_v50 = vpop.permute.xlu0 %9096 }
0x167e   :  { %v9105_v49 = vmul.f32 %v9097_v50, %v9085_v15 }
0x167f   :  { %v9095_v45 = vpop.permute.xlu1 %9094 }
0x1680   :  { %v9113_v29 = vadd.f32 %v9109_v1, %v9105_v49  ;;  %v9104_v17 = vmul.f32 %v9095_v45, %v9084_v61 }
0x1682   :  { %v9112_v5 = vadd.f32 %v9108_v18, %v9104_v17  ;;  %9133 = vrot.lane.b32.xlu0 %v9113_v29, %s11057_s29 }
0x1684   :  { %9131 = vrot.lane.b32.xlu1 %v9112_v5, %s11057_s29 }
0x16b4   :  { %v9130_v38 = vpop.permute.xlu0 %9129 }
0x16b6   :  { %v9128_v44 = vpop.permute.xlu1 %9127 }
0x16b7   :  { %10649 = vmatprep.mubr.msk.f32.mxu0 %vm6390_vm13, %v9128_v44 }
0x16b8   :  { %10650 = vmatmul.mubr.msk.f32.vlgmr.msra.gmra.mxu0 %vm6390_vm13, %v9130_v38 }
0x16b9   :  { %10694 = vmatpush3.msra.mxu0 %v9341_v25 }
0x16ba   :  { %10695 = vmatprep.subr.mxu0 %v9340_v16 }
0x16bb   :  { %10696 = vmatpush3.msra.mxu0 %v9340_v16 }
0x16bc   :  { %10697 = vmatprep.subr.mxu0 %v9339_v40 }
0x16bd   :  { %10698 = vmatpush3.msra.mxu0 %v9339_v40 }
0x16be   :  { %10699 = vmatprep.subr.mxu0 %v9338_v22 }
0x16bf   :  { %10700 = vmatpush3.msra.mxu0 %v9338_v22 }
0x16c0   :  { %10701 = vmatprep.subr.mxu0 %v9337_v7 }
0x16c1   :  { %10702 = vmatpush3.msra.mxu0 %v9337_v7 }
0x16c2   :  { %10703 = vmatprep.subr.mxu0 %v9336_v56 }
0x16c3   :  { %10704 = vmatpush3.msra.mxu0 %v9336_v56 }
0x16c4   :  { %10705 = vmatprep.subr.mxu0 %v9335_v12 }
0x16c5   :  { %10706 = vmatpush3.msra.mxu0 %v9335_v12 }
0x16c6   :  { %10707 = vmatprep.subr.mxu0 %v9334_v59 }
0x16c7   :  { %10708 = vmatpush3.msra.mxu0 %v9334_v59 }
0x16f4   :  { %v9134_v54 = vpop.permute.xlu0 %9133 }
0x16f6   :  { %v9132_v10 = vpop.permute.xlu1 %9131 }
0x16f7   :  { %10652 = vmatprep.mubr.msk.f32.mxu0 %vm6390_vm13, %v9132_v10 }
0x16f8   :  { %10653 = vmatmul.mubr.msk.f32.gmra.mxu0 %vm6390_vm13, %v9134_v54 }
0x1778   :  { %v10651_v3 = vpop.f32.mrf.mxu0 }
0x1779   :  { %v9215_v14 = vadd.f32 %v10651_v3, %v9711_v52 }
0x177a   :  { %v9209_v19 = vpop.f32.mrf.mxu0 }
0x177b   :  { %v9210_v51 = vadd.f32 %v9711_v52, %v9209_v19 }
0x177d   :  { %10687 = vmatprep.mubr.f32.mxu1 %v9210_v51 }
0x177e   :  { %10688 = vmatmul.mubr.f32.vlgmr.msra.gmra.mxu1 %v9215_v14 }
0x17b8   :  { %v10654_v34 = vpop.f32.mrf.mxu0 }
0x17b9   :  { %v9225_v47 = vadd.f32 %v10654_v34, %v9711_v52 }
0x17ba   :  { %v9219_v9 = vpop.f32.mrf.mxu0 }
0x17bb   :  { %v9220_v62 = vadd.f32 %v9711_v52, %v9219_v9 }
0x17bd   :  { %10690 = vmatprep.mubr.f32.mxu1 %v9220_v62 }
0x17be   :  { %10691 = vmatmul.mubr.f32.gmra.mxu1 %v9225_v47 }
0x183e   :  { %v10689_v4 = vpop.f32.mrf.mxu1 }
0x183f   :  { %v9321_v33 = vadd.f32 %v10689_v4, %v9716_v41 }
0x1840   :  { %v9315_v11 = vpop.f32.mrf.mxu1 }
0x1841   :  { %v9316_v24 = vadd.f32 %v9716_v41, %v9315_v11 }
0x1843   :  { %10709 = vmatprep.mubr.msk.f32.mxu0 %vm9347_vm15, %v9316_v24 }
0x1844   :  { %10710 = vmatmul.mubr.msk.f32.vlgmr.msra.gmra.mxu0 %vm9347_vm15, %v9321_v33 }
0x187e   :  { %v10692_v55 = vpop.f32.mrf.mxu1 }
0x187f   :  { %v9331_v6 = vadd.f32 %v10692_v55, %v9716_v41 }
0x1880   :  { %v9325_v32 = vpop.f32.mrf.mxu1 }
0x1881   :  { %v9326_v43 = vadd.f32 %v9716_v41, %v9325_v32 }
0x1883   :  { %10712 = vmatprep.mubr.msk.f32.mxu0 %vm9347_vm15, %v9326_v43 }
0x1884   :  { %10713 = vmatmul.mubr.msk.f32.gmra.mxu0 %vm9347_vm15, %v9331_v6 }
0x1904   :  { %v10711_v21 = vpop.f32.mrf.mxu0 }
0x1905   :  { %v9432_v8 = vadd.f32 %v10711_v21, %v9717_v58 }
0x1906   :  { %v9426_v26 = vpop.f32.mrf.mxu0 }
0x1907   :  { %9447 = vst.msk [vmem:[%s13786_s3 + $0x8] sm:$0xff] %vm9445_vm0, %v9432_v8  ;;  %v9427_v13 = vadd.f32 %v9717_v58, %v9426_v26 }
0x1909   :  { %9446 = vst.msk [vmem:[%s13786_s3] sm:$0xff] %vm9445_vm0, %v9427_v13 }
0x1944   :  { %v10714_v42 = vpop.f32.mrf.mxu0 }
0x1945   :  { %v9442_v35 = vadd.f32 %v10714_v42, %v9717_v58 }
0x1946   :  { %v9436_v27 = vpop.f32.mrf.mxu0 }
0x1947   :  { %9449 = vst.msk [vmem:[%s13786_s3 + $0x18] sm:$0xff] %vm9445_vm0, %v9442_v35  ;;  %v9437_v57 = vadd.f32 %v9717_v58, %v9436_v27 }
0x1949   :  { %9448 = vst.msk [vmem:[%s13786_s3 + $0x10] sm:$0xff] %vm9445_vm0, %v9437_v57 }

</bundles_post_ra>
